<compile_context>
chip_gen: v6e
topology: v6e:2x2x1
jax: 0.10.0
libtpu: 0.0.40
codegen_flags: <defaults>
</compile_context>

<pallas_src>
import functools

import jax
import jax.numpy as jnp
from jax.experimental import pallas as pl
from jax.experimental.pallas import tpu as pltpu

F32 = jnp.float32
BF16 = jnp.bfloat16
K_SIZE = 3        # TCN kernel_size (TCN default when args is None)
LN_EPS = 1e-8     # nn.LayerNorm(out_channel, eps=1e-08)
BETA = 0.25


def _full_spec(arr):
    """Whole-array BlockSpec (block == full shape, same block for every grid step)."""
    return pl.BlockSpec(arr.shape, lambda i, n=arr.ndim: (0,) * n)


def _ln_relu(acc, g, be):
    mean = jnp.mean(acc, axis=-1, keepdims=True)
    var = jnp.mean((acc - mean) ** 2, axis=-1, keepdims=True)
    y = (acc - mean) * jax.lax.rsqrt(var + LN_EPS)
    return jnp.maximum(y * g + be, 0.0)


# ---------------------------------------------------------------------------
# Fused TCN kernel: [pre Linear] -> residual blocks -> output Linear -> [post Linear]
# ---------------------------------------------------------------------------
def _make_tcn_kernel(*, dilations, k, t, pad, has_pre, has_post):
    def kernel(*refs):
        it = iter(refs)
        x_ref = next(it)
        pre_w = pre_b = None
        if has_pre:
            pre_w, pre_b = next(it), next(it)
        w1s, b1s, g1s, be1s = next(it), next(it), next(it), next(it)
        w2s, b2s, g2s, be2s = next(it), next(it), next(it), next(it)
        a_s = next(it)
        out_w, out_b = next(it), next(it)
        post_w = post_b = None
        if has_post:
            post_w, post_b = next(it), next(it)
        o_ref = next(it)
        xbuf, ybuf = next(it), next(it)

        c = xbuf.shape[1]
        zeros_pad = jnp.zeros((pad, c), F32)
        xbuf[pl.ds(0, pad), :] = zeros_pad      # causal-pad rows must read as zeros
        ybuf[pl.ds(0, pad), :] = zeros_pad

        x0 = x_ref[0]                                                     # (t, c_in) f32
        if has_pre:
            h = (jnp.dot(x0.astype(BF16), pre_w[...],
                         preferred_element_type=F32) + pre_b[...])
        else:
            h = x0
        xbuf[pl.ds(pad, t), :] = h

        def causal_conv_ln_relu(buf, d, w, b, g, be):
            xv = buf[...]                                                 # (pad+t, c)
            taps = [xv[pad - (k - 1 - j) * d: pad - (k - 1 - j) * d + t, :]
                    for j in range(k)]
            st = jnp.concatenate(taps, axis=-1).astype(BF16)              # (t, k*c)
            acc = jnp.dot(st, w, preferred_element_type=F32) + b
            return _ln_relu(acc, g, be)

        for bi, d in enumerate(dilations):            # static unroll over residual blocks
            y1 = causal_conv_ln_relu(xbuf, d, w1s[bi], b1s[bi], g1s[bi], be1s[bi])
            ybuf[pl.ds(pad, t), :] = y1
            y2 = causal_conv_ln_relu(ybuf, 2 * d, w2s[bi], b2s[bi], g2s[bi], be2s[bi])
            xbuf[pl.ds(pad, t), :] = a_s[bi, 0] * y2 + xbuf[pl.ds(pad, t), :]  # x = a*out2 + x

        hfin = xbuf[pl.ds(pad, t), :]
        out = (jnp.dot(hfin.astype(BF16), out_w[...],
                       preferred_element_type=F32) + out_b[...])          # TCN.output
        if has_post:
            out = (jnp.dot(out.astype(BF16), post_w[...],
                           preferred_element_type=F32) + post_b[...])     # Decoder out proj
        o_ref[0] = out

    return kernel


def tcn_apply(x, tcn, *, dilations, pre_w=None, pre_b=None, post_w=None, post_b=None):
    bsz, t, c_in = x.shape
    c_mid = tcn['out_w'].shape[0]
    c_out = post_w.shape[1] if post_w is not None else tcn['out_w'].shape[1]
    k = K_SIZE
    pad = (k - 1) * 2 * max(dilations)
    has_pre = pre_w is not None
    has_post = post_w is not None

    args = [x]
    in_specs = [pl.BlockSpec((1, t, c_in), lambda i: (i, 0, 0))]
    if has_pre:
        args += [pre_w, pre_b]
        in_specs += [_full_spec(pre_w), _full_spec(pre_b)]
    dense = [tcn[n] for n in ('w1s', 'b1s', 'g1s', 'be1s', 'w2s', 'b2s', 'g2s', 'be2s')]
    args += dense
    in_specs += [_full_spec(a) for a in dense]
    args += [tcn['a_s']]
    in_specs += [pl.BlockSpec(memory_space=pltpu.MemorySpace.SMEM)]       # per-block gate a
    args += [tcn['out_w'], tcn['out_b']]
    in_specs += [_full_spec(tcn['out_w']), _full_spec(tcn['out_b'])]
    if has_post:
        args += [post_w, post_b]
        in_specs += [_full_spec(post_w), _full_spec(post_b)]

    kernel = _make_tcn_kernel(dilations=tuple(dilations), k=k, t=t, pad=pad,
                              has_pre=has_pre, has_post=has_post)
    return pl.pallas_call(
        kernel,
        grid=(bsz,),
        in_specs=in_specs,
        out_specs=pl.BlockSpec((1, t, c_out), lambda i: (i, 0, 0)),
        out_shape=jax.ShapeDtypeStruct((bsz, t, c_out), F32),
        scratch_shapes=[pltpu.VMEM((pad + t, c_mid), F32),
                        pltpu.VMEM((pad + t, c_mid), F32)],
        compiler_params=pltpu.CompilerParams(dimension_semantics=("parallel",)),
    )(*args)


# ---------------------------------------------------------------------------
# Fused quantize pipeline: quantize_input -> Quantize -> quantize_output
# ---------------------------------------------------------------------------
def _make_quantize_kernel(*, t, h, p, n_embed):
    def kernel(encp_ref, qin_w_ref, qin_b_ref, embed_ref, qout_w_ref, qout_b_ref,
               up_ref, id_ref, dsum_ref):
        # quantize_input: Conv2d(1->H, kernel=(W,H), stride=(W,H)) == one K=W*H matmul
        patches = encp_ref[0].astype(BF16)                                # (p, w*h)
        qi = (jnp.dot(patches, qin_w_ref[...],
                      preferred_element_type=F32) + qin_b_ref[...])       # (p, h)

        # nearest codebook entry (kept in f32 for argmin fidelity)
        e = embed_ref[...]                                                # (h, K)
        dist = (jnp.sum(qi * qi, axis=1, keepdims=True)
                - 2.0 * jnp.dot(qi, e, preferred_element_type=F32)
                + jnp.sum(e * e, axis=0, keepdims=True))                  # (p, K)
        min_d = jnp.min(dist, axis=1, keepdims=True)
        col = jax.lax.broadcasted_iota(jnp.int32, dist.shape, 1)
        ids = jnp.min(jnp.where(dist <= min_d, col.astype(F32), float(n_embed)),
                      axis=1, keepdims=True).astype(jnp.int32)            # (p, 1) argmin
        onehot = (col == ids).astype(F32)                                 # (p, K)
        # embedding lookup = onehot @ embed.T, expressed as a transposed contraction
        q = jax.lax.dot_general(onehot, e, (((1,), (1,)), ((), ())),
                                preferred_element_type=F32)               # (p, h)

        # diff = mse(q, in) + beta*mse(q, in) ; per-batch SSE here, scaled in the wrapper
        d2 = (q - qi) ** 2
        dsum_ref[0] = jnp.sum(jnp.sum(d2, axis=1, keepdims=True),
                              axis=0, keepdims=True)                      # (1, 1)

        # quantize_output: Conv1d(P->T, kernel=1): up[t, h] = sum_p Wq[t,p] * q[p,h] + bq[t]
        up = (jnp.dot(qout_w_ref[...], q.astype(BF16),
                      preferred_element_type=F32) + qout_b_ref[...])      # (t, h)
        up_ref[0] = up                      # straight-through value is exactly q upsampled
        id_ref[0] = ids

    return kernel


def quantize_pipeline(enc, qin_w, qin_b, embed, qout_w, qout_b, *, wave_length, beta):
    bsz, t, h = enc.shape
    p = t // wave_length
    n_embed = embed.shape[1]
    encp = enc.reshape(bsz, p, wave_length * h)       # row-major patch view (layout glue)

    up, ids, dsum = pl.pallas_call(
        _make_quantize_kernel(t=t, h=h, p=p, n_embed=n_embed),
        grid=(bsz,),
        in_specs=[pl.BlockSpec((1, p, wave_length * h), lambda i: (i, 0, 0)),
                  _full_spec(qin_w), _full_spec(qin_b), _full_spec(embed),
                  _full_spec(qout_w), _full_spec(qout_b)],
        out_specs=(pl.BlockSpec((1, t, h), lambda i: (i, 0, 0)),
                   pl.BlockSpec((1, p, 1), lambda i: (i, 0, 0)),
                   pl.BlockSpec((1, 1, 1), lambda i: (i, 0, 0))),
        out_shape=(jax.ShapeDtypeStruct((bsz, t, h), F32),
                   jax.ShapeDtypeStruct((bsz, p, 1), jnp.int32),
                   jax.ShapeDtypeStruct((bsz, 1, 1), F32)),
        compiler_params=pltpu.CompilerParams(dimension_semantics=("parallel",)),
    )(encp, qin_w, qin_b, embed, qout_w, qout_b)

    # detach() only affects gradients, so forward diff == (1+beta) * mse(q, input)
    diff = jnp.sum(dsum) * ((1.0 + beta) / (bsz * p * h))
    return up, diff, ids[:, :, 0]


# ---------------------------------------------------------------------------
# Deterministic parameter initialization (synthetic; no checkpoint loading)
# ---------------------------------------------------------------------------
def _xavier(key, shape):
    std = (2.0 / (shape[0] + shape[1])) ** 0.5
    return std * jax.random.normal(key, shape, F32)


def init_tcn(key, d_model, block_num, dilations=(1, 4)):
    nb = len(dilations) * block_num
    k = K_SIZE
    ks = jax.random.split(key, 4 * nb + 1)
    w1 = [0.1 * jax.random.normal(ks[4 * i + 0], (k * d_model, d_model), F32) for i in range(nb)]
    b1 = [0.01 * jax.random.normal(ks[4 * i + 1], (1, d_model), F32) for i in range(nb)]
    w2 = [0.1 * jax.random.normal(ks[4 * i + 2], (k * d_model, d_model), F32) for i in range(nb)]
    b2 = [0.01 * jax.random.normal(ks[4 * i + 3], (1, d_model), F32) for i in range(nb)]
    return dict(
        w1s=jnp.stack(w1).astype(BF16), b1s=jnp.stack(b1),                # conv1 (taps stacked on K)
        g1s=jnp.ones((nb, 1, d_model), F32), be1s=jnp.zeros((nb, 1, d_model), F32),
        w2s=jnp.stack(w2).astype(BF16), b2s=jnp.stack(b2),                # conv2
        g2s=jnp.ones((nb, 1, d_model), F32), be2s=jnp.zeros((nb, 1, d_model), F32),
        a_s=jnp.full((nb, 1), 1e-8, F32),                                 # residual gate a
        out_w=_xavier(ks[-1], (d_model, d_model)).astype(BF16),           # TCN.output Linear
        out_b=0.1 * jnp.ones((1, d_model), F32),
    )


def init_vqvae(key, data_shape, hidden_dim, n_embed, block_num, wave_length):
    t, f = data_shape
    p = t // wave_length
    ks = jax.random.split(key, 7)
    return dict(
        enc_in_w=_xavier(ks[0], (f, hidden_dim)).astype(BF16),            # Encoder.input_projection
        enc_in_b=0.1 * jnp.ones((1, hidden_dim), F32),
        enc_tcn=init_tcn(ks[1], hidden_dim, block_num),
        qin_w=(0.02 * jax.random.normal(ks[2], (wave_length * hidden_dim, hidden_dim),
                                        F32)).astype(BF16),               # quantize_input conv
        qin_b=jnp.zeros((1, hidden_dim), F32),
        embed=jax.random.normal(ks[3], (hidden_dim, n_embed), F32),       # codebook (dim, n_embed)
        qout_w=(0.1 * jax.random.normal(ks[4], (t, p), F32)).astype(BF16),  # Conv1d(P->T, k=1)
        qout_b=jnp.zeros((t, 1), F32),
        dec_tcn=init_tcn(ks[5], hidden_dim, block_num),
        dec_out_w=_xavier(ks[6], (hidden_dim, f)).astype(BF16),           # Decoder.output_projection
        dec_out_b=0.1 * jnp.ones((1, f), F32),
    )


# ---------------------------------------------------------------------------
# Forward pass
# ---------------------------------------------------------------------------
def vqvae_forward(params, x, *, wave_length, dilations, beta=BETA):
    # Encoder: Linear(F->H) -> residual blocks -> Linear(H->H)      (one fused kernel)
    enc = tcn_apply(x, params['enc_tcn'], dilations=dilations,
                    pre_w=params['enc_in_w'], pre_b=params['enc_in_b'])
    # quantize_input -> Quantize -> quantize_output                 (one fused kernel)
    up, diff, ids = quantize_pipeline(enc, params['qin_w'], params['qin_b'],
                                      params['embed'], params['qout_w'], params['qout_b'],
                                      wave_length=wave_length, beta=beta)
    # Decoder: residual blocks -> Linear(H->H) -> Linear(H->F)      (one fused kernel)
    dec = tcn_apply(up, params['dec_tcn'], dilations=dilations,
                    post_w=params['dec_out_w'], post_b=params['dec_out_b'])
    return dec, diff, ids


if __name__ == "__main__":
    B = 2
    T, F_DIM = 64, 4          # data_shape (small; real model uses (5000, 12))
    HID = 32                  # hidden_dim
    N_EMBED = 64
    BLOCK_NUM = 1
    WAVE = 8                  # wave_length
    DILATIONS = (1, 4) * BLOCK_NUM

    key = jax.random.PRNGKey(0)
    kp, kx = jax.random.split(key)
    params = init_vqvae(kp, (T, F_DIM), HID, N_EMBED, BLOCK_NUM, WAVE)
    x = jax.random.normal(kx, (B, T, F_DIM), F32)

    fwd = jax.jit(functools.partial(vqvae_forward, wave_length=WAVE, dilations=DILATIONS))
    dec, diff, ids = fwd(params, x)
    jax.block_until_ready((dec, diff, ids))

    assert dec.shape == (B, T, F_DIM)
    assert ids.shape == (B, T // WAVE)
    assert diff.shape == ()
    assert bool(jnp.all(jnp.isfinite(dec)))
    print("KERNEL_OK")
</pallas_src>

<mosaic_0001>
module attributes {stable_mosaic.version = 11 : i64} {
  func.func @kernel(%arg0: i32, %arg1: memref<1x64x4xf32, #tpu.memory_space<vmem>>, %arg2: memref<4x32xbf16, #tpu.memory_space<vmem>>, %arg3: memref<1x32xf32, #tpu.memory_space<vmem>>, %arg4: memref<2x96x32xbf16, #tpu.memory_space<vmem>>, %arg5: memref<2x1x32xf32, #tpu.memory_space<vmem>>, %arg6: memref<2x1x32xf32, #tpu.memory_space<vmem>>, %arg7: memref<2x1x32xf32, #tpu.memory_space<vmem>>, %arg8: memref<2x96x32xbf16, #tpu.memory_space<vmem>>, %arg9: memref<2x1x32xf32, #tpu.memory_space<vmem>>, %arg10: memref<2x1x32xf32, #tpu.memory_space<vmem>>, %arg11: memref<2x1x32xf32, #tpu.memory_space<vmem>>, %arg12: memref<2x1xf32, #tpu.memory_space<smem>>, %arg13: memref<32x32xbf16, #tpu.memory_space<vmem>>, %arg14: memref<1x32xf32, #tpu.memory_space<vmem>>, %arg15: memref<1x64x32xf32, #tpu.memory_space<vmem>>, %arg16: memref<80x32xf32, #tpu.memory_space<vmem>>, %arg17: memref<80x32xf32, #tpu.memory_space<vmem>>) attributes {dimension_semantics = [#tpu.dimension_semantics<parallel>], iteration_bounds = array<i64: 2>, scalar_prefetch = 0 : i64, scratch_operands = 2 : i64, tpu.core_type = #tpu.core_type<tc>, window_params = [{transform_indices = @transform_0, window_bounds = array<i64: 1, 64, 4>}, {pipeline_mode = #tpu.pipeline_mode<synchronous>, transform_indices = @transform_1, window_bounds = array<i64: 4, 32>}, {pipeline_mode = #tpu.pipeline_mode<synchronous>, transform_indices = @transform_2, window_bounds = array<i64: 1, 32>}, {pipeline_mode = #tpu.pipeline_mode<synchronous>, transform_indices = @transform_3, window_bounds = array<i64: 2, 96, 32>}, {pipeline_mode = #tpu.pipeline_mode<synchronous>, transform_indices = @transform_4, window_bounds = array<i64: 2, 1, 32>}, {pipeline_mode = #tpu.pipeline_mode<synchronous>, transform_indices = @transform_5, window_bounds = array<i64: 2, 1, 32>}, {pipeline_mode = #tpu.pipeline_mode<synchronous>, transform_indices = @transform_6, window_bounds = array<i64: 2, 1, 32>}, {pipeline_mode = #tpu.pipeline_mode<synchronous>, transform_indices = @transform_7, window_bounds = array<i64: 2, 96, 32>}, {pipeline_mode = #tpu.pipeline_mode<synchronous>, transform_indices = @transform_8, window_bounds = array<i64: 2, 1, 32>}, {pipeline_mode = #tpu.pipeline_mode<synchronous>, transform_indices = @transform_9, window_bounds = array<i64: 2, 1, 32>}, {pipeline_mode = #tpu.pipeline_mode<synchronous>, transform_indices = @transform_10, window_bounds = array<i64: 2, 1, 32>}, {transform_indices = @transform_11, window_bounds = array<i64: 2, 1>}, {pipeline_mode = #tpu.pipeline_mode<synchronous>, transform_indices = @transform_12, window_bounds = array<i64: 32, 32>}, {pipeline_mode = #tpu.pipeline_mode<synchronous>, transform_indices = @transform_13, window_bounds = array<i64: 1, 32>}, {transform_indices = @transform_14, window_bounds = array<i64: 1, 64, 32>}]} {
    %cst = arith.constant 0.000000e+00 : f32
    %0 = vector.broadcast %cst : f32 to vector<16x32xf32>
    %c0 = arith.constant 0 : index
    %c0_0 = arith.constant 0 : index
    %1 = vector.load %arg16[%c0, %c0_0] : memref<80x32xf32, #tpu.memory_space<vmem>>, vector<16x32xf32>
    tpu.vector_store %arg16[%c0, %c0_0], %0 {strides = array<i32>} : memref<80x32xf32, #tpu.memory_space<vmem>>, vector<16x32xf32>,
    %c0_1 = arith.constant 0 : index
    %c0_2 = arith.constant 0 : index
    %2 = vector.load %arg17[%c0_1, %c0_2] : memref<80x32xf32, #tpu.memory_space<vmem>>, vector<16x32xf32>
    tpu.vector_store %arg17[%c0_1, %c0_2], %0 {strides = array<i32>} : memref<80x32xf32, #tpu.memory_space<vmem>>, vector<16x32xf32>,
    %c0_3 = arith.constant 0 : index
    %c0_4 = arith.constant 0 : index
    %c0_5 = arith.constant 0 : index
    %3 = vector.load %arg1[%c0_3, %c0_4, %c0_5] : memref<1x64x4xf32, #tpu.memory_space<vmem>>, vector<1x64x4xf32>
    %4 = vector.shape_cast %3 : vector<1x64x4xf32> to vector<64x4xf32>
    %5 = arith.truncf %4 : vector<64x4xf32> to vector<64x4xbf16>
    %c0_6 = arith.constant 0 : index
    %c0_7 = arith.constant 0 : index
    %6 = vector.load %arg2[%c0_6, %c0_7] : memref<4x32xbf16, #tpu.memory_space<vmem>>, vector<4x32xbf16>
    %cst_8 = arith.constant dense<0.000000e+00> : vector<64x32xf32>
    %7 = tpu.matmul %5, %6, %cst_8 {dimension_numbers = #tpu.dot_dimension_numbers<[1], [0], [0], [1], [0, 0, 1, 1], [], []>} : vector<64x4xbf16>, vector<4x32xbf16>, vector<64x32xf32> -> vector<64x32xf32>
    %c0_9 = arith.constant 0 : index
    %c0_10 = arith.constant 0 : index
    %8 = vector.load %arg3[%c0_9, %c0_10] : memref<1x32xf32, #tpu.memory_space<vmem>>, vector<1x32xf32>
    %9 = vector.broadcast %8 : vector<1x32xf32> to vector<64x32xf32>
    %10 = arith.addf %7, %9 : vector<64x32xf32>
    %c16 = arith.constant 16 : index
    %c0_11 = arith.constant 0 : index
    %11 = vector.load %arg16[%c16, %c0_11] : memref<80x32xf32, #tpu.memory_space<vmem>>, vector<64x32xf32>
    tpu.vector_store %arg16[%c16, %c0_11], %10 {strides = array<i32>} : memref<80x32xf32, #tpu.memory_space<vmem>>, vector<64x32xf32>,
    %c0_12 = arith.constant 0 : index
    %c0_13 = arith.constant 0 : index
    %c0_14 = arith.constant 0 : index
    %12 = vector.load %arg4[%c0_12, %c0_13, %c0_14] : memref<2x96x32xbf16, #tpu.memory_space<vmem>>, vector<1x96x32xbf16>
    %13 = vector.shape_cast %12 : vector<1x96x32xbf16> to vector<96x32xbf16>
    %c0_15 = arith.constant 0 : index
    %c0_16 = arith.constant 0 : index
    %c0_17 = arith.constant 0 : index
    %14 = vector.load %arg5[%c0_15, %c0_16, %c0_17] : memref<2x1x32xf32, #tpu.memory_space<vmem>>, vector<1x1x32xf32>
    %15 = vector.shape_cast %14 : vector<1x1x32xf32> to vector<1x32xf32>
    %c0_18 = arith.constant 0 : index
    %c0_19 = arith.constant 0 : index
    %c0_20 = arith.constant 0 : index
    %16 = vector.load %arg6[%c0_18, %c0_19, %c0_20] : memref<2x1x32xf32, #tpu.memory_space<vmem>>, vector<1x1x32xf32>
    %17 = vector.shape_cast %16 : vector<1x1x32xf32> to vector<1x32xf32>
    %c0_21 = arith.constant 0 : index
    %c0_22 = arith.constant 0 : index
    %c0_23 = arith.constant 0 : index
    %18 = vector.load %arg7[%c0_21, %c0_22, %c0_23] : memref<2x1x32xf32, #tpu.memory_space<vmem>>, vector<1x1x32xf32>
    %19 = vector.shape_cast %18 : vector<1x1x32xf32> to vector<1x32xf32>
    %c0_24 = arith.constant 0 : index
    %c0_25 = arith.constant 0 : index
    %20 = vector.load %arg16[%c0_24, %c0_25] : memref<80x32xf32, #tpu.memory_space<vmem>>, vector<80x32xf32>
    %21 = vector.extract_strided_slice %20 {offsets = [14, 0], sizes = [64, 32], strides = [1, 1]} : vector<80x32xf32> to vector<64x32xf32>
    %22 = vector.extract_strided_slice %20 {offsets = [15, 0], sizes = [64, 32], strides = [1, 1]} : vector<80x32xf32> to vector<64x32xf32>
    %23 = vector.extract_strided_slice %20 {offsets = [16, 0], sizes = [64, 32], strides = [1, 1]} : vector<80x32xf32> to vector<64x32xf32>
    %24 = tpu.concatenate %21, %22, %23 in 1 : vector<64x32xf32>, vector<64x32xf32>, vector<64x32xf32> -> vector<64x96xf32>
    %25 = arith.truncf %24 : vector<64x96xf32> to vector<64x96xbf16>
    %cst_26 = arith.constant dense<0.000000e+00> : vector<64x32xf32>
    %26 = tpu.matmul %25, %13, %cst_26 {dimension_numbers = #tpu.dot_dimension_numbers<[1], [0], [0], [1], [0, 0, 1, 1], [], []>} : vector<64x96xbf16>, vector<96x32xbf16>, vector<64x32xf32> -> vector<64x32xf32>
    %27 = vector.broadcast %15 : vector<1x32xf32> to vector<64x32xf32>
    %28 = arith.addf %26, %27 : vector<64x32xf32>
    %cst_27 = arith.constant dense<0.000000e+00> : vector<64xf32>
    %29 = vector.multi_reduction <add>, %28, %cst_27 [1] : vector<64x32xf32> to vector<64xf32>
    %30 = vector.shape_cast %29 : vector<64xf32> to vector<64x1xf32>
    %cst_28 = arith.constant 3.200000e+01 : f32
    %31 = vector.broadcast %cst_28 : f32 to vector<64x1xf32>
    %32 = arith.divf %30, %31 : vector<64x1xf32>
    %33 = vector.broadcast %32 : vector<64x1xf32> to vector<64x32xf32>
    %34 = arith.subf %28, %33 : vector<64x32xf32>
    %35 = arith.mulf %34, %34 : vector<64x32xf32>
    %cst_29 = arith.constant dense<0.000000e+00> : vector<64xf32>
    %36 = vector.multi_reduction <add>, %35, %cst_29 [1] : vector<64x32xf32> to vector<64xf32>
    %37 = vector.shape_cast %36 : vector<64xf32> to vector<64x1xf32>
    %cst_30 = arith.constant 3.200000e+01 : f32
    %38 = vector.broadcast %cst_30 : f32 to vector<64x1xf32>
    %39 = arith.divf %37, %38 : vector<64x1xf32>
    %40 = vector.broadcast %32 : vector<64x1xf32> to vector<64x32xf32>
    %41 = arith.subf %28, %40 : vector<64x32xf32>
    %cst_31 = arith.constant 9.99999993E-9 : f32
    %42 = vector.broadcast %cst_31 : f32 to vector<64x1xf32>
    %43 = arith.addf %39, %42 : vector<64x1xf32>
    %44 = math.rsqrt %43 : vector<64x1xf32>
    %45 = vector.broadcast %44 : vector<64x1xf32> to vector<64x32xf32>
    %46 = arith.mulf %41, %45 : vector<64x32xf32>
    %47 = vector.broadcast %17 : vector<1x32xf32> to vector<64x32xf32>
    %48 = arith.mulf %46, %47 : vector<64x32xf32>
    %49 = vector.broadcast %19 : vector<1x32xf32> to vector<64x32xf32>
    %50 = arith.addf %48, %49 : vector<64x32xf32>
    %cst_32 = arith.constant 0.000000e+00 : f32
    %51 = vector.broadcast %cst_32 : f32 to vector<64x32xf32>
    %52 = arith.maximumf %50, %51 : vector<64x32xf32>
    %c16_33 = arith.constant 16 : index
    %c0_34 = arith.constant 0 : index
    %53 = vector.load %arg17[%c16_33, %c0_34] : memref<80x32xf32, #tpu.memory_space<vmem>>, vector<64x32xf32>
    tpu.vector_store %arg17[%c16_33, %c0_34], %52 {strides = array<i32>} : memref<80x32xf32, #tpu.memory_space<vmem>>, vector<64x32xf32>,
    %c0_35 = arith.constant 0 : index
    %c0_36 = arith.constant 0 : index
    %c0_37 = arith.constant 0 : index
    %54 = vector.load %arg8[%c0_35, %c0_36, %c0_37] : memref<2x96x32xbf16, #tpu.memory_space<vmem>>, vector<1x96x32xbf16>
    %55 = vector.shape_cast %54 : vector<1x96x32xbf16> to vector<96x32xbf16>
    %c0_38 = arith.constant 0 : index
    %c0_39 = arith.constant 0 : index
    %c0_40 = arith.constant 0 : index
    %56 = vector.load %arg9[%c0_38, %c0_39, %c0_40] : memref<2x1x32xf32, #tpu.memory_space<vmem>>, vector<1x1x32xf32>
    %57 = vector.shape_cast %56 : vector<1x1x32xf32> to vector<1x32xf32>
    %c0_41 = arith.constant 0 : index
    %c0_42 = arith.constant 0 : index
    %c0_43 = arith.constant 0 : index
    %58 = vector.load %arg10[%c0_41, %c0_42, %c0_43] : memref<2x1x32xf32, #tpu.memory_space<vmem>>, vector<1x1x32xf32>
    %59 = vector.shape_cast %58 : vector<1x1x32xf32> to vector<1x32xf32>
    %c0_44 = arith.constant 0 : index
    %c0_45 = arith.constant 0 : index
    %c0_46 = arith.constant 0 : index
    %60 = vector.load %arg11[%c0_44, %c0_45, %c0_46] : memref<2x1x32xf32, #tpu.memory_space<vmem>>, vector<1x1x32xf32>
    %61 = vector.shape_cast %60 : vector<1x1x32xf32> to vector<1x32xf32>
    %c0_47 = arith.constant 0 : index
    %c0_48 = arith.constant 0 : index
    %62 = vector.load %arg17[%c0_47, %c0_48] : memref<80x32xf32, #tpu.memory_space<vmem>>, vector<80x32xf32>
    %63 = vector.extract_strided_slice %62 {offsets = [12, 0], sizes = [64, 32], strides = [1, 1]} : vector<80x32xf32> to vector<64x32xf32>
    %64 = vector.extract_strided_slice %62 {offsets = [14, 0], sizes = [64, 32], strides = [1, 1]} : vector<80x32xf32> to vector<64x32xf32>
    %65 = vector.extract_strided_slice %62 {offsets = [16, 0], sizes = [64, 32], strides = [1, 1]} : vector<80x32xf32> to vector<64x32xf32>
    %66 = tpu.concatenate %63, %64, %65 in 1 : vector<64x32xf32>, vector<64x32xf32>, vector<64x32xf32> -> vector<64x96xf32>
    %67 = arith.truncf %66 : vector<64x96xf32> to vector<64x96xbf16>
    %cst_49 = arith.constant dense<0.000000e+00> : vector<64x32xf32>
    %68 = tpu.matmul %67, %55, %cst_49 {dimension_numbers = #tpu.dot_dimension_numbers<[1], [0], [0], [1], [0, 0, 1, 1], [], []>} : vector<64x96xbf16>, vector<96x32xbf16>, vector<64x32xf32> -> vector<64x32xf32>
    %69 = vector.broadcast %57 : vector<1x32xf32> to vector<64x32xf32>
    %70 = arith.addf %68, %69 : vector<64x32xf32>
    %cst_50 = arith.constant dense<0.000000e+00> : vector<64xf32>
    %71 = vector.multi_reduction <add>, %70, %cst_50 [1] : vector<64x32xf32> to vector<64xf32>
    %72 = vector.shape_cast %71 : vector<64xf32> to vector<64x1xf32>
    %cst_51 = arith.constant 3.200000e+01 : f32
    %73 = vector.broadcast %cst_51 : f32 to vector<64x1xf32>
    %74 = arith.divf %72, %73 : vector<64x1xf32>
    %75 = vector.broadcast %74 : vector<64x1xf32> to vector<64x32xf32>
    %76 = arith.subf %70, %75 : vector<64x32xf32>
    %77 = arith.mulf %76, %76 : vector<64x32xf32>
    %cst_52 = arith.constant dense<0.000000e+00> : vector<64xf32>
    %78 = vector.multi_reduction <add>, %77, %cst_52 [1] : vector<64x32xf32> to vector<64xf32>
    %79 = vector.shape_cast %78 : vector<64xf32> to vector<64x1xf32>
    %cst_53 = arith.constant 3.200000e+01 : f32
    %80 = vector.broadcast %cst_53 : f32 to vector<64x1xf32>
    %81 = arith.divf %79, %80 : vector<64x1xf32>
    %82 = vector.broadcast %74 : vector<64x1xf32> to vector<64x32xf32>
    %83 = arith.subf %70, %82 : vector<64x32xf32>
    %cst_54 = arith.constant 9.99999993E-9 : f32
    %84 = vector.broadcast %cst_54 : f32 to vector<64x1xf32>
    %85 = arith.addf %81, %84 : vector<64x1xf32>
    %86 = math.rsqrt %85 : vector<64x1xf32>
    %87 = vector.broadcast %86 : vector<64x1xf32> to vector<64x32xf32>
    %88 = arith.mulf %83, %87 : vector<64x32xf32>
    %89 = vector.broadcast %59 : vector<1x32xf32> to vector<64x32xf32>
    %90 = arith.mulf %88, %89 : vector<64x32xf32>
    %91 = vector.broadcast %61 : vector<1x32xf32> to vector<64x32xf32>
    %92 = arith.addf %90, %91 : vector<64x32xf32>
    %cst_55 = arith.constant 0.000000e+00 : f32
    %93 = vector.broadcast %cst_55 : f32 to vector<64x32xf32>
    %94 = arith.maximumf %92, %93 : vector<64x32xf32>
    %c0_56 = arith.constant 0 : index
    %c0_57 = arith.constant 0 : index
    %95 = memref.load %arg12[%c0_56, %c0_57] : memref<2x1xf32, #tpu.memory_space<smem>>
    %96 = vector.broadcast %95 : f32 to vector<64x32xf32>
    %97 = arith.mulf %96, %94 : vector<64x32xf32>
    %c16_58 = arith.constant 16 : index
    %c0_59 = arith.constant 0 : index
    %98 = vector.load %arg16[%c16_58, %c0_59] : memref<80x32xf32, #tpu.memory_space<vmem>>, vector<64x32xf32>
    %99 = arith.addf %97, %98 : vector<64x32xf32>
    %c16_60 = arith.constant 16 : index
    %c0_61 = arith.constant 0 : index
    %100 = vector.load %arg16[%c16_60, %c0_61] : memref<80x32xf32, #tpu.memory_space<vmem>>, vector<64x32xf32>
    tpu.vector_store %arg16[%c16_60, %c0_61], %99 {strides = array<i32>} : memref<80x32xf32, #tpu.memory_space<vmem>>, vector<64x32xf32>,
    %c1 = arith.constant 1 : index
    %c0_62 = arith.constant 0 : index
    %c0_63 = arith.constant 0 : index
    %101 = vector.load %arg4[%c1, %c0_62, %c0_63] : memref<2x96x32xbf16, #tpu.memory_space<vmem>>, vector<1x96x32xbf16>
    %102 = vector.shape_cast %101 : vector<1x96x32xbf16> to vector<96x32xbf16>
    %c1_64 = arith.constant 1 : index
    %c0_65 = arith.constant 0 : index
    %c0_66 = arith.constant 0 : index
    %103 = vector.load %arg5[%c1_64, %c0_65, %c0_66] : memref<2x1x32xf32, #tpu.memory_space<vmem>>, vector<1x1x32xf32>
    %104 = vector.shape_cast %103 : vector<1x1x32xf32> to vector<1x32xf32>
    %c1_67 = arith.constant 1 : index
    %c0_68 = arith.constant 0 : index
    %c0_69 = arith.constant 0 : index
    %105 = vector.load %arg6[%c1_67, %c0_68, %c0_69] : memref<2x1x32xf32, #tpu.memory_space<vmem>>, vector<1x1x32xf32>
    %106 = vector.shape_cast %105 : vector<1x1x32xf32> to vector<1x32xf32>
    %c1_70 = arith.constant 1 : index
    %c0_71 = arith.constant 0 : index
    %c0_72 = arith.constant 0 : index
    %107 = vector.load %arg7[%c1_70, %c0_71, %c0_72] : memref<2x1x32xf32, #tpu.memory_space<vmem>>, vector<1x1x32xf32>
    %108 = vector.shape_cast %107 : vector<1x1x32xf32> to vector<1x32xf32>
    %c0_73 = arith.constant 0 : index
    %c0_74 = arith.constant 0 : index
    %109 = vector.load %arg16[%c0_73, %c0_74] : memref<80x32xf32, #tpu.memory_space<vmem>>, vector<80x32xf32>
    %110 = vector.extract_strided_slice %109 {offsets = [8, 0], sizes = [64, 32], strides = [1, 1]} : vector<80x32xf32> to vector<64x32xf32>
    %111 = vector.extract_strided_slice %109 {offsets = [12, 0], sizes = [64, 32], strides = [1, 1]} : vector<80x32xf32> to vector<64x32xf32>
    %112 = vector.extract_strided_slice %109 {offsets = [16, 0], sizes = [64, 32], strides = [1, 1]} : vector<80x32xf32> to vector<64x32xf32>
    %113 = tpu.concatenate %110, %111, %112 in 1 : vector<64x32xf32>, vector<64x32xf32>, vector<64x32xf32> -> vector<64x96xf32>
    %114 = arith.truncf %113 : vector<64x96xf32> to vector<64x96xbf16>
    %cst_75 = arith.constant dense<0.000000e+00> : vector<64x32xf32>
    %115 = tpu.matmul %114, %102, %cst_75 {dimension_numbers = #tpu.dot_dimension_numbers<[1], [0], [0], [1], [0, 0, 1, 1], [], []>} : vector<64x96xbf16>, vector<96x32xbf16>, vector<64x32xf32> -> vector<64x32xf32>
    %116 = vector.broadcast %104 : vector<1x32xf32> to vector<64x32xf32>
    %117 = arith.addf %115, %116 : vector<64x32xf32>
    %cst_76 = arith.constant dense<0.000000e+00> : vector<64xf32>
    %118 = vector.multi_reduction <add>, %117, %cst_76 [1] : vector<64x32xf32> to vector<64xf32>
    %119 = vector.shape_cast %118 : vector<64xf32> to vector<64x1xf32>
    %cst_77 = arith.constant 3.200000e+01 : f32
    %120 = vector.broadcast %cst_77 : f32 to vector<64x1xf32>
    %121 = arith.divf %119, %120 : vector<64x1xf32>
    %122 = vector.broadcast %121 : vector<64x1xf32> to vector<64x32xf32>
    %123 = arith.subf %117, %122 : vector<64x32xf32>
    %124 = arith.mulf %123, %123 : vector<64x32xf32>
    %cst_78 = arith.constant dense<0.000000e+00> : vector<64xf32>
    %125 = vector.multi_reduction <add>, %124, %cst_78 [1] : vector<64x32xf32> to vector<64xf32>
    %126 = vector.shape_cast %125 : vector<64xf32> to vector<64x1xf32>
    %cst_79 = arith.constant 3.200000e+01 : f32
    %127 = vector.broadcast %cst_79 : f32 to vector<64x1xf32>
    %128 = arith.divf %126, %127 : vector<64x1xf32>
    %129 = vector.broadcast %121 : vector<64x1xf32> to vector<64x32xf32>
    %130 = arith.subf %117, %129 : vector<64x32xf32>
    %cst_80 = arith.constant 9.99999993E-9 : f32
    %131 = vector.broadcast %cst_80 : f32 to vector<64x1xf32>
    %132 = arith.addf %128, %131 : vector<64x1xf32>
    %133 = math.rsqrt %132 : vector<64x1xf32>
    %134 = vector.broadcast %133 : vector<64x1xf32> to vector<64x32xf32>
    %135 = arith.mulf %130, %134 : vector<64x32xf32>
    %136 = vector.broadcast %106 : vector<1x32xf32> to vector<64x32xf32>
    %137 = arith.mulf %135, %136 : vector<64x32xf32>
    %138 = vector.broadcast %108 : vector<1x32xf32> to vector<64x32xf32>
    %139 = arith.addf %137, %138 : vector<64x32xf32>
    %cst_81 = arith.constant 0.000000e+00 : f32
    %140 = vector.broadcast %cst_81 : f32 to vector<64x32xf32>
    %141 = arith.maximumf %139, %140 : vector<64x32xf32>
    %c16_82 = arith.constant 16 : index
    %c0_83 = arith.constant 0 : index
    %142 = vector.load %arg17[%c16_82, %c0_83] : memref<80x32xf32, #tpu.memory_space<vmem>>, vector<64x32xf32>
    tpu.vector_store %arg17[%c16_82, %c0_83], %141 {strides = array<i32>} : memref<80x32xf32, #tpu.memory_space<vmem>>, vector<64x32xf32>,
    %c1_84 = arith.constant 1 : index
    %c0_85 = arith.constant 0 : index
    %c0_86 = arith.constant 0 : index
    %143 = vector.load %arg8[%c1_84, %c0_85, %c0_86] : memref<2x96x32xbf16, #tpu.memory_space<vmem>>, vector<1x96x32xbf16>
    %144 = vector.shape_cast %143 : vector<1x96x32xbf16> to vector<96x32xbf16>
    %c1_87 = arith.constant 1 : index
    %c0_88 = arith.constant 0 : index
    %c0_89 = arith.constant 0 : index
    %145 = vector.load %arg9[%c1_87, %c0_88, %c0_89] : memref<2x1x32xf32, #tpu.memory_space<vmem>>, vector<1x1x32xf32>
    %146 = vector.shape_cast %145 : vector<1x1x32xf32> to vector<1x32xf32>
    %c1_90 = arith.constant 1 : index
    %c0_91 = arith.constant 0 : index
    %c0_92 = arith.constant 0 : index
    %147 = vector.load %arg10[%c1_90, %c0_91, %c0_92] : memref<2x1x32xf32, #tpu.memory_space<vmem>>, vector<1x1x32xf32>
    %148 = vector.shape_cast %147 : vector<1x1x32xf32> to vector<1x32xf32>
    %c1_93 = arith.constant 1 : index
    %c0_94 = arith.constant 0 : index
    %c0_95 = arith.constant 0 : index
    %149 = vector.load %arg11[%c1_93, %c0_94, %c0_95] : memref<2x1x32xf32, #tpu.memory_space<vmem>>, vector<1x1x32xf32>
    %150 = vector.shape_cast %149 : vector<1x1x32xf32> to vector<1x32xf32>
    %c0_96 = arith.constant 0 : index
    %c0_97 = arith.constant 0 : index
    %151 = vector.load %arg17[%c0_96, %c0_97] : memref<80x32xf32, #tpu.memory_space<vmem>>, vector<80x32xf32>
    %152 = vector.extract_strided_slice %151 {offsets = [0, 0], sizes = [64, 32], strides = [1, 1]} : vector<80x32xf32> to vector<64x32xf32>
    %153 = vector.extract_strided_slice %151 {offsets = [8, 0], sizes = [64, 32], strides = [1, 1]} : vector<80x32xf32> to vector<64x32xf32>
    %154 = vector.extract_strided_slice %151 {offsets = [16, 0], sizes = [64, 32], strides = [1, 1]} : vector<80x32xf32> to vector<64x32xf32>
    %155 = tpu.concatenate %152, %153, %154 in 1 : vector<64x32xf32>, vector<64x32xf32>, vector<64x32xf32> -> vector<64x96xf32>
    %156 = arith.truncf %155 : vector<64x96xf32> to vector<64x96xbf16>
    %cst_98 = arith.constant dense<0.000000e+00> : vector<64x32xf32>
    %157 = tpu.matmul %156, %144, %cst_98 {dimension_numbers = #tpu.dot_dimension_numbers<[1], [0], [0], [1], [0, 0, 1, 1], [], []>} : vector<64x96xbf16>, vector<96x32xbf16>, vector<64x32xf32> -> vector<64x32xf32>
    %158 = vector.broadcast %146 : vector<1x32xf32> to vector<64x32xf32>
    %159 = arith.addf %157, %158 : vector<64x32xf32>
    %cst_99 = arith.constant dense<0.000000e+00> : vector<64xf32>
    %160 = vector.multi_reduction <add>, %159, %cst_99 [1] : vector<64x32xf32> to vector<64xf32>
    %161 = vector.shape_cast %160 : vector<64xf32> to vector<64x1xf32>
    %cst_100 = arith.constant 3.200000e+01 : f32
    %162 = vector.broadcast %cst_100 : f32 to vector<64x1xf32>
    %163 = arith.divf %161, %162 : vector<64x1xf32>
    %164 = vector.broadcast %163 : vector<64x1xf32> to vector<64x32xf32>
    %165 = arith.subf %159, %164 : vector<64x32xf32>
    %166 = arith.mulf %165, %165 : vector<64x32xf32>
    %cst_101 = arith.constant dense<0.000000e+00> : vector<64xf32>
    %167 = vector.multi_reduction <add>, %166, %cst_101 [1] : vector<64x32xf32> to vector<64xf32>
    %168 = vector.shape_cast %167 : vector<64xf32> to vector<64x1xf32>
    %cst_102 = arith.constant 3.200000e+01 : f32
    %169 = vector.broadcast %cst_102 : f32 to vector<64x1xf32>
    %170 = arith.divf %168, %169 : vector<64x1xf32>
    %171 = vector.broadcast %163 : vector<64x1xf32> to vector<64x32xf32>
    %172 = arith.subf %159, %171 : vector<64x32xf32>
    %cst_103 = arith.constant 9.99999993E-9 : f32
    %173 = vector.broadcast %cst_103 : f32 to vector<64x1xf32>
    %174 = arith.addf %170, %173 : vector<64x1xf32>
    %175 = math.rsqrt %174 : vector<64x1xf32>
    %176 = vector.broadcast %175 : vector<64x1xf32> to vector<64x32xf32>
    %177 = arith.mulf %172, %176 : vector<64x32xf32>
    %178 = vector.broadcast %148 : vector<1x32xf32> to vector<64x32xf32>
    %179 = arith.mulf %177, %178 : vector<64x32xf32>
    %180 = vector.broadcast %150 : vector<1x32xf32> to vector<64x32xf32>
    %181 = arith.addf %179, %180 : vector<64x32xf32>
    %cst_104 = arith.constant 0.000000e+00 : f32
    %182 = vector.broadcast %cst_104 : f32 to vector<64x32xf32>
    %183 = arith.maximumf %181, %182 : vector<64x32xf32>
    %c1_105 = arith.constant 1 : index
    %c0_106 = arith.constant 0 : index
    %184 = memref.load %arg12[%c1_105, %c0_106] : memref<2x1xf32, #tpu.memory_space<smem>>
    %185 = vector.broadcast %184 : f32 to vector<64x32xf32>
    %186 = arith.mulf %185, %183 : vector<64x32xf32>
    %c16_107 = arith.constant 16 : index
    %c0_108 = arith.constant 0 : index
    %187 = vector.load %arg16[%c16_107, %c0_108] : memref<80x32xf32, #tpu.memory_space<vmem>>, vector<64x32xf32>
    %188 = arith.addf %186, %187 : vector<64x32xf32>
    %c16_109 = arith.constant 16 : index
    %c0_110 = arith.constant 0 : index
    %189 = vector.load %arg16[%c16_109, %c0_110] : memref<80x32xf32, #tpu.memory_space<vmem>>, vector<64x32xf32>
    tpu.vector_store %arg16[%c16_109, %c0_110], %188 {strides = array<i32>} : memref<80x32xf32, #tpu.memory_space<vmem>>, vector<64x32xf32>,
    %c16_111 = arith.constant 16 : index
    %c0_112 = arith.constant 0 : index
    %190 = vector.load %arg16[%c16_111, %c0_112] : memref<80x32xf32, #tpu.memory_space<vmem>>, vector<64x32xf32>
    %191 = arith.truncf %190 : vector<64x32xf32> to vector<64x32xbf16>
    %c0_113 = arith.constant 0 : index
    %c0_114 = arith.constant 0 : index
    %192 = vector.load %arg13[%c0_113, %c0_114] : memref<32x32xbf16, #tpu.memory_space<vmem>>, vector<32x32xbf16>
    %cst_115 = arith.constant dense<0.000000e+00> : vector<64x32xf32>
    %193 = tpu.matmul %191, %192, %cst_115 {dimension_numbers = #tpu.dot_dimension_numbers<[1], [0], [0], [1], [0, 0, 1, 1], [], []>} : vector<64x32xbf16>, vector<32x32xbf16>, vector<64x32xf32> -> vector<64x32xf32>
    %c0_116 = arith.constant 0 : index
    %c0_117 = arith.constant 0 : index
    %194 = vector.load %arg14[%c0_116, %c0_117] : memref<1x32xf32, #tpu.memory_space<vmem>>, vector<1x32xf32>
    %195 = vector.broadcast %194 : vector<1x32xf32> to vector<64x32xf32>
    %196 = arith.addf %193, %195 : vector<64x32xf32>
    %c0_118 = arith.constant 0 : index
    %c0_119 = arith.constant 0 : index
    %c0_120 = arith.constant 0 : index
    %197 = vector.load %arg15[%c0_118, %c0_119, %c0_120] : memref<1x64x32xf32, #tpu.memory_space<vmem>>, vector<1x64x32xf32>
    %198 = vector.shape_cast %197 : vector<1x64x32xf32> to vector<64x32xf32>
    %199 = vector.shape_cast %196 : vector<64x32xf32> to vector<1x64x32xf32>
    tpu.vector_store %arg15[%c0_118, %c0_119, %c0_120], %199 {strides = array<i32>} : memref<1x64x32xf32, #tpu.memory_space<vmem>>, vector<1x64x32xf32>,
    return
  }
  func.func @transform_0(%arg0: i32) -> (i32, i32, i32) {
    %c0_i32 = arith.constant 0 : i32
    %c0_i32_0 = arith.constant 0 : i32
    %c0_i32_1 = arith.constant 0 : i32
    return %arg0, %c0_i32, %c0_i32_0 : i32, i32, i32
  }
  func.func @transform_1(%arg0: i32) -> (i32, i32) {
    %c0_i32 = arith.constant 0 : i32
    %c0_i32_0 = arith.constant 0 : i32
    %c0_i32_1 = arith.constant 0 : i32
    return %c0_i32, %c0_i32_0 : i32, i32
  }
  func.func @transform_2(%arg0: i32) -> (i32, i32) {
    %c0_i32 = arith.constant 0 : i32
    %c0_i32_0 = arith.constant 0 : i32
    %c0_i32_1 = arith.constant 0 : i32
    return %c0_i32, %c0_i32_0 : i32, i32
  }
  func.func @transform_3(%arg0: i32) -> (i32, i32, i32) {
    %c0_i32 = arith.constant 0 : i32
    %c0_i32_0 = arith.constant 0 : i32
    %c0_i32_1 = arith.constant 0 : i32
    %c0_i32_2 = arith.constant 0 : i32
    return %c0_i32, %c0_i32_0, %c0_i32_1 : i32, i32, i32
  }
  func.func @transform_4(%arg0: i32) -> (i32, i32, i32) {
    %c0_i32 = arith.constant 0 : i32
    %c0_i32_0 = arith.constant 0 : i32
    %c0_i32_1 = arith.constant 0 : i32
    %c0_i32_2 = arith.constant 0 : i32
    return %c0_i32, %c0_i32_0, %c0_i32_1 : i32, i32, i32
  }
  func.func @transform_5(%arg0: i32) -> (i32, i32, i32) {
    %c0_i32 = arith.constant 0 : i32
    %c0_i32_0 = arith.constant 0 : i32
    %c0_i32_1 = arith.constant 0 : i32
    %c0_i32_2 = arith.constant 0 : i32
    return %c0_i32, %c0_i32_0, %c0_i32_1 : i32, i32, i32
  }
  func.func @transform_6(%arg0: i32) -> (i32, i32, i32) {
    %c0_i32 = arith.constant 0 : i32
    %c0_i32_0 = arith.constant 0 : i32
    %c0_i32_1 = arith.constant 0 : i32
    %c0_i32_2 = arith.constant 0 : i32
    return %c0_i32, %c0_i32_0, %c0_i32_1 : i32, i32, i32
  }
  func.func @transform_7(%arg0: i32) -> (i32, i32, i32) {
    %c0_i32 = arith.constant 0 : i32
    %c0_i32_0 = arith.constant 0 : i32
    %c0_i32_1 = arith.constant 0 : i32
    %c0_i32_2 = arith.constant 0 : i32
    return %c0_i32, %c0_i32_0, %c0_i32_1 : i32, i32, i32
  }
  func.func @transform_8(%arg0: i32) -> (i32, i32, i32) {
    %c0_i32 = arith.constant 0 : i32
    %c0_i32_0 = arith.constant 0 : i32
    %c0_i32_1 = arith.constant 0 : i32
    %c0_i32_2 = arith.constant 0 : i32
    return %c0_i32, %c0_i32_0, %c0_i32_1 : i32, i32, i32
  }
  func.func @transform_9(%arg0: i32) -> (i32, i32, i32) {
    %c0_i32 = arith.constant 0 : i32
    %c0_i32_0 = arith.constant 0 : i32
    %c0_i32_1 = arith.constant 0 : i32
    %c0_i32_2 = arith.constant 0 : i32
    return %c0_i32, %c0_i32_0, %c0_i32_1 : i32, i32, i32
  }
  func.func @transform_10(%arg0: i32) -> (i32, i32, i32) {
    %c0_i32 = arith.constant 0 : i32
    %c0_i32_0 = arith.constant 0 : i32
    %c0_i32_1 = arith.constant 0 : i32
    %c0_i32_2 = arith.constant 0 : i32
    return %c0_i32, %c0_i32_0, %c0_i32_1 : i32, i32, i32
  }
  func.func @transform_11(%arg0: i32) -> (i32, i32) {
    %c0_i32 = arith.constant 0 : i32
    %c0_i32_0 = arith.constant 0 : i32
    %c0_i32_1 = arith.constant 0 : i32
    return %c0_i32, %c0_i32_0 : i32, i32
  }
  func.func @transform_12(%arg0: i32) -> (i32, i32) {
    %c0_i32 = arith.constant 0 : i32
    %c0_i32_0 = arith.constant 0 : i32
    %c0_i32_1 = arith.constant 0 : i32
    return %c0_i32, %c0_i32_0 : i32, i32
  }
  func.func @transform_13(%arg0: i32) -> (i32, i32) {
    %c0_i32 = arith.constant 0 : i32
    %c0_i32_0 = arith.constant 0 : i32
    %c0_i32_1 = arith.constant 0 : i32
    return %c0_i32, %c0_i32_0 : i32, i32
  }
  func.func @transform_14(%arg0: i32) -> (i32, i32, i32) {
    %c0_i32 = arith.constant 0 : i32
    %c0_i32_0 = arith.constant 0 : i32
    %c0_i32_1 = arith.constant 0 : i32
    return %arg0, %c0_i32, %c0_i32_0 : i32, i32, i32
  }
}

module attributes {stable_mosaic.version = 11 : i64} {
  func.func @kernel(%arg0: i32, %arg1: memref<1x8x256xf32, #tpu.memory_space<vmem>>, %arg2: memref<256x32xbf16, #tpu.memory_space<vmem>>, %arg3: memref<1x32xf32, #tpu.memory_space<vmem>>, %arg4: memref<32x64xf32, #tpu.memory_space<vmem>>, %arg5: memref<64x8xbf16, #tpu.memory_space<vmem>>, %arg6: memref<64x1xf32, #tpu.memory_space<vmem>>, %arg7: memref<1x64x32xf32, #tpu.memory_space<vmem>>, %arg8: memref<1x8x1xi32, #tpu.memory_space<vmem>>, %arg9: memref<1x1x1xf32, #tpu.memory_space<vmem>>) attributes {dimension_semantics = [#tpu.dimension_semantics<parallel>], iteration_bounds = array<i64: 2>, scalar_prefetch = 0 : i64, scratch_operands = 0 : i64, tpu.core_type = #tpu.core_type<tc>, window_params = [{transform_indices = @transform_0, window_bounds = array<i64: 1, 8, 256>}, {pipeline_mode = #tpu.pipeline_mode<synchronous>, transform_indices = @transform_1, window_bounds = array<i64: 256, 32>}, {pipeline_mode = #tpu.pipeline_mode<synchronous>, transform_indices = @transform_2, window_bounds = array<i64: 1, 32>}, {pipeline_mode = #tpu.pipeline_mode<synchronous>, transform_indices = @transform_3, window_bounds = array<i64: 32, 64>}, {pipeline_mode = #tpu.pipeline_mode<synchronous>, transform_indices = @transform_4, window_bounds = array<i64: 64, 8>}, {pipeline_mode = #tpu.pipeline_mode<synchronous>, transform_indices = @transform_5, window_bounds = array<i64: 64, 1>}, {transform_indices = @transform_6, window_bounds = array<i64: 1, 64, 32>}, {transform_indices = @transform_7, window_bounds = array<i64: 1, 8, 1>}, {transform_indices = @transform_8, window_bounds = array<i64: 1, 1, 1>}]} {
    %c0 = arith.constant 0 : index
    %c0_0 = arith.constant 0 : index
    %c0_1 = arith.constant 0 : index
    %0 = vector.load %arg1[%c0, %c0_0, %c0_1] : memref<1x8x256xf32, #tpu.memory_space<vmem>>, vector<1x8x256xf32>
    %1 = vector.shape_cast %0 : vector<1x8x256xf32> to vector<8x256xf32>
    %2 = arith.truncf %1 : vector<8x256xf32> to vector<8x256xbf16>
    %c0_2 = arith.constant 0 : index
    %c0_3 = arith.constant 0 : index
    %3 = vector.load %arg2[%c0_2, %c0_3] : memref<256x32xbf16, #tpu.memory_space<vmem>>, vector<256x32xbf16>
    %cst = arith.constant dense<0.000000e+00> : vector<8x32xf32>
    %4 = tpu.matmul %2, %3, %cst {dimension_numbers = #tpu.dot_dimension_numbers<[1], [0], [0], [1], [0, 0, 1, 1], [], []>} : vector<8x256xbf16>, vector<256x32xbf16>, vector<8x32xf32> -> vector<8x32xf32>
    %c0_4 = arith.constant 0 : index
    %c0_5 = arith.constant 0 : index
    %5 = vector.load %arg3[%c0_4, %c0_5] : memref<1x32xf32, #tpu.memory_space<vmem>>, vector<1x32xf32>
    %6 = vector.broadcast %5 : vector<1x32xf32> to vector<8x32xf32>
    %7 = arith.addf %4, %6 : vector<8x32xf32>
    %c0_6 = arith.constant 0 : index
    %c0_7 = arith.constant 0 : index
    %8 = vector.load %arg4[%c0_6, %c0_7] : memref<32x64xf32, #tpu.memory_space<vmem>>, vector<32x64xf32>
    %9 = arith.mulf %7, %7 : vector<8x32xf32>
    %cst_8 = arith.constant dense<0.000000e+00> : vector<8xf32>
    %10 = vector.multi_reduction <add>, %9, %cst_8 [1] : vector<8x32xf32> to vector<8xf32>
    %11 = vector.shape_cast %10 : vector<8xf32> to vector<8x1xf32>
    %cst_9 = arith.constant dense<0.000000e+00> : vector<8x64xf32>
    %12 = tpu.matmul %7, %8, %cst_9 {dimension_numbers = #tpu.dot_dimension_numbers<[1], [0], [0], [1], [0, 0, 1, 1], [], []>} : vector<8x32xf32>, vector<32x64xf32>, vector<8x64xf32> -> vector<8x64xf32>
    %cst_10 = arith.constant 2.000000e+00 : f32
    %13 = vector.broadcast %cst_10 : f32 to vector<8x64xf32>
    %14 = arith.mulf %13, %12 : vector<8x64xf32>
    %15 = vector.broadcast %11 : vector<8x1xf32> to vector<8x64xf32>
    %16 = arith.subf %15, %14 : vector<8x64xf32>
    %17 = arith.mulf %8, %8 : vector<32x64xf32>
    %cst_11 = arith.constant dense<0.000000e+00> : vector<64xf32>
    %18 = vector.multi_reduction <add>, %17, %cst_11 [0] : vector<32x64xf32> to vector<64xf32>
    %19 = vector.shape_cast %18 : vector<64xf32> to vector<1x64xf32>
    %20 = vector.broadcast %19 : vector<1x64xf32> to vector<8x64xf32>
    %21 = arith.addf %16, %20 : vector<8x64xf32>
    %cst_12 = arith.constant dense<0x7F800000> : vector<8xf32>
    %22 = vector.multi_reduction <minimumf>, %21, %cst_12 [1] : vector<8x64xf32> to vector<8xf32>
    %23 = vector.shape_cast %22 : vector<8xf32> to vector<8x1xf32>
    %24 = tpu.iota {dimensions = array<i32: 1>} : vector<8x64xi32>
    %25 = vector.broadcast %23 : vector<8x1xf32> to vector<8x64xf32>
    %26 = arith.cmpf ole, %21, %25 : vector<8x64xf32>
    %27 = arith.sitofp %24 : vector<8x64xi32> to vector<8x64xf32>
    %cst_13 = arith.constant 6.400000e+01 : f32
    %28 = vector.broadcast %cst_13 : f32 to vector<8x64xf32>
    %29 = arith.select %26, %27, %28 : vector<8x64xi1>, vector<8x64xf32>
    %cst_14 = arith.constant dense<0x7F800000> : vector<8xf32>
    %30 = vector.multi_reduction <minimumf>, %29, %cst_14 [1] : vector<8x64xf32> to vector<8xf32>
    %31 = vector.shape_cast %30 : vector<8xf32> to vector<8x1xf32>
    %32 = arith.fptosi %31 : vector<8x1xf32> to vector<8x1xi32>
    %33 = vector.broadcast %32 : vector<8x1xi32> to vector<8x64xi32>
    %34 = arith.cmpi eq, %24, %33 : vector<8x64xi32>
    %35 = arith.extui %34 : vector<8x64xi1> to vector<8x64xi32>
    %36 = arith.sitofp %35 : vector<8x64xi32> to vector<8x64xf32>
    %cst_15 = arith.constant dense<0.000000e+00> : vector<8x32xf32>
    %37 = tpu.matmul %36, %8, %cst_15 {dimension_numbers = #tpu.dot_dimension_numbers<[1], [1], [0], [0], [0, 0, 1, 0], [], []>} : vector<8x64xf32>, vector<32x64xf32>, vector<8x32xf32> -> vector<8x32xf32>
    %38 = arith.subf %37, %7 : vector<8x32xf32>
    %39 = arith.mulf %38, %38 : vector<8x32xf32>
    %cst_16 = arith.constant dense<0.000000e+00> : vector<8xf32>
    %40 = vector.multi_reduction <add>, %39, %cst_16 [1] : vector<8x32xf32> to vector<8xf32>
    %41 = vector.shape_cast %40 : vector<8xf32> to vector<8x1xf32>
    %cst_17 = arith.constant dense<0.000000e+00> : vector<1xf32>
    %42 = vector.multi_reduction <add>, %41, %cst_17 [0] : vector<8x1xf32> to vector<1xf32>
    %43 = vector.shape_cast %42 : vector<1xf32> to vector<1x1xf32>
    %c0_18 = arith.constant 0 : index
    %c0_19 = arith.constant 0 : index
    %c0_20 = arith.constant 0 : index
    %44 = vector.load %arg9[%c0_18, %c0_19, %c0_20] : memref<1x1x1xf32, #tpu.memory_space<vmem>>, vector<1x1x1xf32>
    %45 = vector.shape_cast %44 : vector<1x1x1xf32> to vector<1x1xf32>
    %46 = vector.shape_cast %43 : vector<1x1xf32> to vector<1x1x1xf32>
    tpu.vector_store %arg9[%c0_18, %c0_19, %c0_20], %46 {strides = array<i32>} : memref<1x1x1xf32, #tpu.memory_space<vmem>>, vector<1x1x1xf32>,
    %c0_21 = arith.constant 0 : index
    %c0_22 = arith.constant 0 : index
    %47 = vector.load %arg5[%c0_21, %c0_22] : memref<64x8xbf16, #tpu.memory_space<vmem>>, vector<64x8xbf16>
    %48 = arith.truncf %37 : vector<8x32xf32> to vector<8x32xbf16>
    %cst_23 = arith.constant dense<0.000000e+00> : vector<64x32xf32>
    %49 = tpu.matmul %47, %48, %cst_23 {dimension_numbers = #tpu.dot_dimension_numbers<[1], [0], [0], [1], [0, 0, 1, 1], [], []>} : vector<64x8xbf16>, vector<8x32xbf16>, vector<64x32xf32> -> vector<64x32xf32>
    %c0_24 = arith.constant 0 : index
    %c0_25 = arith.constant 0 : index
    %50 = vector.load %arg6[%c0_24, %c0_25] : memref<64x1xf32, #tpu.memory_space<vmem>>, vector<64x1xf32>
    %51 = vector.broadcast %50 : vector<64x1xf32> to vector<64x32xf32>
    %52 = arith.addf %49, %51 : vector<64x32xf32>
    %c0_26 = arith.constant 0 : index
    %c0_27 = arith.constant 0 : index
    %c0_28 = arith.constant 0 : index
    %53 = vector.load %arg7[%c0_26, %c0_27, %c0_28] : memref<1x64x32xf32, #tpu.memory_space<vmem>>, vector<1x64x32xf32>
    %54 = vector.shape_cast %53 : vector<1x64x32xf32> to vector<64x32xf32>
    %55 = vector.shape_cast %52 : vector<64x32xf32> to vector<1x64x32xf32>
    tpu.vector_store %arg7[%c0_26, %c0_27, %c0_28], %55 {strides = array<i32>} : memref<1x64x32xf32, #tpu.memory_space<vmem>>, vector<1x64x32xf32>,
    %c0_29 = arith.constant 0 : index
    %c0_30 = arith.constant 0 : index
    %c0_31 = arith.constant 0 : index
    %56 = vector.load %arg8[%c0_29, %c0_30, %c0_31] : memref<1x8x1xi32, #tpu.memory_space<vmem>>, vector<1x8x1xi32>
    %57 = vector.shape_cast %56 : vector<1x8x1xi32> to vector<8x1xi32>
    %58 = vector.shape_cast %32 : vector<8x1xi32> to vector<1x8x1xi32>
    tpu.vector_store %arg8[%c0_29, %c0_30, %c0_31], %58 {strides = array<i32>} : memref<1x8x1xi32, #tpu.memory_space<vmem>>, vector<1x8x1xi32>,
    return
  }
  func.func @transform_0(%arg0: i32) -> (i32, i32, i32) {
    %c0_i32 = arith.constant 0 : i32
    %c0_i32_0 = arith.constant 0 : i32
    %c0_i32_1 = arith.constant 0 : i32
    return %arg0, %c0_i32, %c0_i32_0 : i32, i32, i32
  }
  func.func @transform_1(%arg0: i32) -> (i32, i32) {
    %c0_i32 = arith.constant 0 : i32
    %c0_i32_0 = arith.constant 0 : i32
    %c0_i32_1 = arith.constant 0 : i32
    return %c0_i32, %c0_i32_0 : i32, i32
  }
  func.func @transform_2(%arg0: i32) -> (i32, i32) {
    %c0_i32 = arith.constant 0 : i32
    %c0_i32_0 = arith.constant 0 : i32
    %c0_i32_1 = arith.constant 0 : i32
    return %c0_i32, %c0_i32_0 : i32, i32
  }
  func.func @transform_3(%arg0: i32) -> (i32, i32) {
    %c0_i32 = arith.constant 0 : i32
    %c0_i32_0 = arith.constant 0 : i32
    %c0_i32_1 = arith.constant 0 : i32
    return %c0_i32, %c0_i32_0 : i32, i32
  }
  func.func @transform_4(%arg0: i32) -> (i32, i32) {
    %c0_i32 = arith.constant 0 : i32
    %c0_i32_0 = arith.constant 0 : i32
    %c0_i32_1 = arith.constant 0 : i32
    return %c0_i32, %c0_i32_0 : i32, i32
  }
  func.func @transform_5(%arg0: i32) -> (i32, i32) {
    %c0_i32 = arith.constant 0 : i32
    %c0_i32_0 = arith.constant 0 : i32
    %c0_i32_1 = arith.constant 0 : i32
    return %c0_i32, %c0_i32_0 : i32, i32
  }
  func.func @transform_6(%arg0: i32) -> (i32, i32, i32) {
    %c0_i32 = arith.constant 0 : i32
    %c0_i32_0 = arith.constant 0 : i32
    %c0_i32_1 = arith.constant 0 : i32
    return %arg0, %c0_i32, %c0_i32_0 : i32, i32, i32
  }
  func.func @transform_7(%arg0: i32) -> (i32, i32, i32) {
    %c0_i32 = arith.constant 0 : i32
    %c0_i32_0 = arith.constant 0 : i32
    %c0_i32_1 = arith.constant 0 : i32
    return %arg0, %c0_i32, %c0_i32_0 : i32, i32, i32
  }
  func.func @transform_8(%arg0: i32) -> (i32, i32, i32) {
    %c0_i32 = arith.constant 0 : i32
    %c0_i32_0 = arith.constant 0 : i32
    %c0_i32_1 = arith.constant 0 : i32
    return %arg0, %c0_i32, %c0_i32_0 : i32, i32, i32
  }
}

module attributes {stable_mosaic.version = 11 : i64} {
  func.func @kernel(%arg0: i32, %arg1: memref<1x64x32xf32, #tpu.memory_space<vmem>>, %arg2: memref<2x96x32xbf16, #tpu.memory_space<vmem>>, %arg3: memref<2x1x32xf32, #tpu.memory_space<vmem>>, %arg4: memref<2x1x32xf32, #tpu.memory_space<vmem>>, %arg5: memref<2x1x32xf32, #tpu.memory_space<vmem>>, %arg6: memref<2x96x32xbf16, #tpu.memory_space<vmem>>, %arg7: memref<2x1x32xf32, #tpu.memory_space<vmem>>, %arg8: memref<2x1x32xf32, #tpu.memory_space<vmem>>, %arg9: memref<2x1x32xf32, #tpu.memory_space<vmem>>, %arg10: memref<2x1xf32, #tpu.memory_space<smem>>, %arg11: memref<32x32xbf16, #tpu.memory_space<vmem>>, %arg12: memref<1x32xf32, #tpu.memory_space<vmem>>, %arg13: memref<32x4xbf16, #tpu.memory_space<vmem>>, %arg14: memref<1x4xf32, #tpu.memory_space<vmem>>, %arg15: memref<1x64x4xf32, #tpu.memory_space<vmem>>, %arg16: memref<80x32xf32, #tpu.memory_space<vmem>>, %arg17: memref<80x32xf32, #tpu.memory_space<vmem>>) attributes {dimension_semantics = [#tpu.dimension_semantics<parallel>], iteration_bounds = array<i64: 2>, scalar_prefetch = 0 : i64, scratch_operands = 2 : i64, tpu.core_type = #tpu.core_type<tc>, window_params = [{transform_indices = @transform_0, window_bounds = array<i64: 1, 64, 32>}, {pipeline_mode = #tpu.pipeline_mode<synchronous>, transform_indices = @transform_1, window_bounds = array<i64: 2, 96, 32>}, {pipeline_mode = #tpu.pipeline_mode<synchronous>, transform_indices = @transform_2, window_bounds = array<i64: 2, 1, 32>}, {pipeline_mode = #tpu.pipeline_mode<synchronous>, transform_indices = @transform_3, window_bounds = array<i64: 2, 1, 32>}, {pipeline_mode = #tpu.pipeline_mode<synchronous>, transform_indices = @transform_4, window_bounds = array<i64: 2, 1, 32>}, {pipeline_mode = #tpu.pipeline_mode<synchronous>, transform_indices = @transform_5, window_bounds = array<i64: 2, 96, 32>}, {pipeline_mode = #tpu.pipeline_mode<synchronous>, transform_indices = @transform_6, window_bounds = array<i64: 2, 1, 32>}, {pipeline_mode = #tpu.pipeline_mode<synchronous>, transform_indices = @transform_7, window_bounds = array<i64: 2, 1, 32>}, {pipeline_mode = #tpu.pipeline_mode<synchronous>, transform_indices = @transform_8, window_bounds = array<i64: 2, 1, 32>}, {transform_indices = @transform_9, window_bounds = array<i64: 2, 1>}, {pipeline_mode = #tpu.pipeline_mode<synchronous>, transform_indices = @transform_10, window_bounds = array<i64: 32, 32>}, {pipeline_mode = #tpu.pipeline_mode<synchronous>, transform_indices = @transform_11, window_bounds = array<i64: 1, 32>}, {pipeline_mode = #tpu.pipeline_mode<synchronous>, transform_indices = @transform_12, window_bounds = array<i64: 32, 4>}, {pipeline_mode = #tpu.pipeline_mode<synchronous>, transform_indices = @transform_13, window_bounds = array<i64: 1, 4>}, {transform_indices = @transform_14, window_bounds = array<i64: 1, 64, 4>}]} {
    %cst = arith.constant 0.000000e+00 : f32
    %0 = vector.broadcast %cst : f32 to vector<16x32xf32>
    %c0 = arith.constant 0 : index
    %c0_0 = arith.constant 0 : index
    %1 = vector.load %arg16[%c0, %c0_0] : memref<80x32xf32, #tpu.memory_space<vmem>>, vector<16x32xf32>
    tpu.vector_store %arg16[%c0, %c0_0], %0 {strides = array<i32>} : memref<80x32xf32, #tpu.memory_space<vmem>>, vector<16x32xf32>,
    %c0_1 = arith.constant 0 : index
    %c0_2 = arith.constant 0 : index
    %2 = vector.load %arg17[%c0_1, %c0_2] : memref<80x32xf32, #tpu.memory_space<vmem>>, vector<16x32xf32>
    tpu.vector_store %arg17[%c0_1, %c0_2], %0 {strides = array<i32>} : memref<80x32xf32, #tpu.memory_space<vmem>>, vector<16x32xf32>,
    %c0_3 = arith.constant 0 : index
    %c0_4 = arith.constant 0 : index
    %c0_5 = arith.constant 0 : index
    %3 = vector.load %arg1[%c0_3, %c0_4, %c0_5] : memref<1x64x32xf32, #tpu.memory_space<vmem>>, vector<1x64x32xf32>
    %4 = vector.shape_cast %3 : vector<1x64x32xf32> to vector<64x32xf32>
    %c16 = arith.constant 16 : index
    %c0_6 = arith.constant 0 : index
    %5 = vector.load %arg16[%c16, %c0_6] : memref<80x32xf32, #tpu.memory_space<vmem>>, vector<64x32xf32>
    tpu.vector_store %arg16[%c16, %c0_6], %4 {strides = array<i32>} : memref<80x32xf32, #tpu.memory_space<vmem>>, vector<64x32xf32>,
    %c0_7 = arith.constant 0 : index
    %c0_8 = arith.constant 0 : index
    %c0_9 = arith.constant 0 : index
    %6 = vector.load %arg2[%c0_7, %c0_8, %c0_9] : memref<2x96x32xbf16, #tpu.memory_space<vmem>>, vector<1x96x32xbf16>
    %7 = vector.shape_cast %6 : vector<1x96x32xbf16> to vector<96x32xbf16>
    %c0_10 = arith.constant 0 : index
    %c0_11 = arith.constant 0 : index
    %c0_12 = arith.constant 0 : index
    %8 = vector.load %arg3[%c0_10, %c0_11, %c0_12] : memref<2x1x32xf32, #tpu.memory_space<vmem>>, vector<1x1x32xf32>
    %9 = vector.shape_cast %8 : vector<1x1x32xf32> to vector<1x32xf32>
    %c0_13 = arith.constant 0 : index
    %c0_14 = arith.constant 0 : index
    %c0_15 = arith.constant 0 : index
    %10 = vector.load %arg4[%c0_13, %c0_14, %c0_15] : memref<2x1x32xf32, #tpu.memory_space<vmem>>, vector<1x1x32xf32>
    %11 = vector.shape_cast %10 : vector<1x1x32xf32> to vector<1x32xf32>
    %c0_16 = arith.constant 0 : index
    %c0_17 = arith.constant 0 : index
    %c0_18 = arith.constant 0 : index
    %12 = vector.load %arg5[%c0_16, %c0_17, %c0_18] : memref<2x1x32xf32, #tpu.memory_space<vmem>>, vector<1x1x32xf32>
    %13 = vector.shape_cast %12 : vector<1x1x32xf32> to vector<1x32xf32>
    %c0_19 = arith.constant 0 : index
    %c0_20 = arith.constant 0 : index
    %14 = vector.load %arg16[%c0_19, %c0_20] : memref<80x32xf32, #tpu.memory_space<vmem>>, vector<80x32xf32>
    %15 = vector.extract_strided_slice %14 {offsets = [14, 0], sizes = [64, 32], strides = [1, 1]} : vector<80x32xf32> to vector<64x32xf32>
    %16 = vector.extract_strided_slice %14 {offsets = [15, 0], sizes = [64, 32], strides = [1, 1]} : vector<80x32xf32> to vector<64x32xf32>
    %17 = vector.extract_strided_slice %14 {offsets = [16, 0], sizes = [64, 32], strides = [1, 1]} : vector<80x32xf32> to vector<64x32xf32>
    %18 = tpu.concatenate %15, %16, %17 in 1 : vector<64x32xf32>, vector<64x32xf32>, vector<64x32xf32> -> vector<64x96xf32>
    %19 = arith.truncf %18 : vector<64x96xf32> to vector<64x96xbf16>
    %cst_21 = arith.constant dense<0.000000e+00> : vector<64x32xf32>
    %20 = tpu.matmul %19, %7, %cst_21 {dimension_numbers = #tpu.dot_dimension_numbers<[1], [0], [0], [1], [0, 0, 1, 1], [], []>} : vector<64x96xbf16>, vector<96x32xbf16>, vector<64x32xf32> -> vector<64x32xf32>
    %21 = vector.broadcast %9 : vector<1x32xf32> to vector<64x32xf32>
    %22 = arith.addf %20, %21 : vector<64x32xf32>
    %cst_22 = arith.constant dense<0.000000e+00> : vector<64xf32>
    %23 = vector.multi_reduction <add>, %22, %cst_22 [1] : vector<64x32xf32> to vector<64xf32>
    %24 = vector.shape_cast %23 : vector<64xf32> to vector<64x1xf32>
    %cst_23 = arith.constant 3.200000e+01 : f32
    %25 = vector.broadcast %cst_23 : f32 to vector<64x1xf32>
    %26 = arith.divf %24, %25 : vector<64x1xf32>
    %27 = vector.broadcast %26 : vector<64x1xf32> to vector<64x32xf32>
    %28 = arith.subf %22, %27 : vector<64x32xf32>
    %29 = arith.mulf %28, %28 : vector<64x32xf32>
    %cst_24 = arith.constant dense<0.000000e+00> : vector<64xf32>
    %30 = vector.multi_reduction <add>, %29, %cst_24 [1] : vector<64x32xf32> to vector<64xf32>
    %31 = vector.shape_cast %30 : vector<64xf32> to vector<64x1xf32>
    %cst_25 = arith.constant 3.200000e+01 : f32
    %32 = vector.broadcast %cst_25 : f32 to vector<64x1xf32>
    %33 = arith.divf %31, %32 : vector<64x1xf32>
    %34 = vector.broadcast %26 : vector<64x1xf32> to vector<64x32xf32>
    %35 = arith.subf %22, %34 : vector<64x32xf32>
    %cst_26 = arith.constant 9.99999993E-9 : f32
    %36 = vector.broadcast %cst_26 : f32 to vector<64x1xf32>
    %37 = arith.addf %33, %36 : vector<64x1xf32>
    %38 = math.rsqrt %37 : vector<64x1xf32>
    %39 = vector.broadcast %38 : vector<64x1xf32> to vector<64x32xf32>
    %40 = arith.mulf %35, %39 : vector<64x32xf32>
    %41 = vector.broadcast %11 : vector<1x32xf32> to vector<64x32xf32>
    %42 = arith.mulf %40, %41 : vector<64x32xf32>
    %43 = vector.broadcast %13 : vector<1x32xf32> to vector<64x32xf32>
    %44 = arith.addf %42, %43 : vector<64x32xf32>
    %cst_27 = arith.constant 0.000000e+00 : f32
    %45 = vector.broadcast %cst_27 : f32 to vector<64x32xf32>
    %46 = arith.maximumf %44, %45 : vector<64x32xf32>
    %c16_28 = arith.constant 16 : index
    %c0_29 = arith.constant 0 : index
    %47 = vector.load %arg17[%c16_28, %c0_29] : memref<80x32xf32, #tpu.memory_space<vmem>>, vector<64x32xf32>
    tpu.vector_store %arg17[%c16_28, %c0_29], %46 {strides = array<i32>} : memref<80x32xf32, #tpu.memory_space<vmem>>, vector<64x32xf32>,
    %c0_30 = arith.constant 0 : index
    %c0_31 = arith.constant 0 : index
    %c0_32 = arith.constant 0 : index
    %48 = vector.load %arg6[%c0_30, %c0_31, %c0_32] : memref<2x96x32xbf16, #tpu.memory_space<vmem>>, vector<1x96x32xbf16>
    %49 = vector.shape_cast %48 : vector<1x96x32xbf16> to vector<96x32xbf16>
    %c0_33 = arith.constant 0 : index
    %c0_34 = arith.constant 0 : index
    %c0_35 = arith.constant 0 : index
    %50 = vector.load %arg7[%c0_33, %c0_34, %c0_35] : memref<2x1x32xf32, #tpu.memory_space<vmem>>, vector<1x1x32xf32>
    %51 = vector.shape_cast %50 : vector<1x1x32xf32> to vector<1x32xf32>
    %c0_36 = arith.constant 0 : index
    %c0_37 = arith.constant 0 : index
    %c0_38 = arith.constant 0 : index
    %52 = vector.load %arg8[%c0_36, %c0_37, %c0_38] : memref<2x1x32xf32, #tpu.memory_space<vmem>>, vector<1x1x32xf32>
    %53 = vector.shape_cast %52 : vector<1x1x32xf32> to vector<1x32xf32>
    %c0_39 = arith.constant 0 : index
    %c0_40 = arith.constant 0 : index
    %c0_41 = arith.constant 0 : index
    %54 = vector.load %arg9[%c0_39, %c0_40, %c0_41] : memref<2x1x32xf32, #tpu.memory_space<vmem>>, vector<1x1x32xf32>
    %55 = vector.shape_cast %54 : vector<1x1x32xf32> to vector<1x32xf32>
    %c0_42 = arith.constant 0 : index
    %c0_43 = arith.constant 0 : index
    %56 = vector.load %arg17[%c0_42, %c0_43] : memref<80x32xf32, #tpu.memory_space<vmem>>, vector<80x32xf32>
    %57 = vector.extract_strided_slice %56 {offsets = [12, 0], sizes = [64, 32], strides = [1, 1]} : vector<80x32xf32> to vector<64x32xf32>
    %58 = vector.extract_strided_slice %56 {offsets = [14, 0], sizes = [64, 32], strides = [1, 1]} : vector<80x32xf32> to vector<64x32xf32>
    %59 = vector.extract_strided_slice %56 {offsets = [16, 0], sizes = [64, 32], strides = [1, 1]} : vector<80x32xf32> to vector<64x32xf32>
    %60 = tpu.concatenate %57, %58, %59 in 1 : vector<64x32xf32>, vector<64x32xf32>, vector<64x32xf32> -> vector<64x96xf32>
    %61 = arith.truncf %60 : vector<64x96xf32> to vector<64x96xbf16>
    %cst_44 = arith.constant dense<0.000000e+00> : vector<64x32xf32>
    %62 = tpu.matmul %61, %49, %cst_44 {dimension_numbers = #tpu.dot_dimension_numbers<[1], [0], [0], [1], [0, 0, 1, 1], [], []>} : vector<64x96xbf16>, vector<96x32xbf16>, vector<64x32xf32> -> vector<64x32xf32>
    %63 = vector.broadcast %51 : vector<1x32xf32> to vector<64x32xf32>
    %64 = arith.addf %62, %63 : vector<64x32xf32>
    %cst_45 = arith.constant dense<0.000000e+00> : vector<64xf32>
    %65 = vector.multi_reduction <add>, %64, %cst_45 [1] : vector<64x32xf32> to vector<64xf32>
    %66 = vector.shape_cast %65 : vector<64xf32> to vector<64x1xf32>
    %cst_46 = arith.constant 3.200000e+01 : f32
    %67 = vector.broadcast %cst_46 : f32 to vector<64x1xf32>
    %68 = arith.divf %66, %67 : vector<64x1xf32>
    %69 = vector.broadcast %68 : vector<64x1xf32> to vector<64x32xf32>
    %70 = arith.subf %64, %69 : vector<64x32xf32>
    %71 = arith.mulf %70, %70 : vector<64x32xf32>
    %cst_47 = arith.constant dense<0.000000e+00> : vector<64xf32>
    %72 = vector.multi_reduction <add>, %71, %cst_47 [1] : vector<64x32xf32> to vector<64xf32>
    %73 = vector.shape_cast %72 : vector<64xf32> to vector<64x1xf32>
    %cst_48 = arith.constant 3.200000e+01 : f32
    %74 = vector.broadcast %cst_48 : f32 to vector<64x1xf32>
    %75 = arith.divf %73, %74 : vector<64x1xf32>
    %76 = vector.broadcast %68 : vector<64x1xf32> to vector<64x32xf32>
    %77 = arith.subf %64, %76 : vector<64x32xf32>
    %cst_49 = arith.constant 9.99999993E-9 : f32
    %78 = vector.broadcast %cst_49 : f32 to vector<64x1xf32>
    %79 = arith.addf %75, %78 : vector<64x1xf32>
    %80 = math.rsqrt %79 : vector<64x1xf32>
    %81 = vector.broadcast %80 : vector<64x1xf32> to vector<64x32xf32>
    %82 = arith.mulf %77, %81 : vector<64x32xf32>
    %83 = vector.broadcast %53 : vector<1x32xf32> to vector<64x32xf32>
    %84 = arith.mulf %82, %83 : vector<64x32xf32>
    %85 = vector.broadcast %55 : vector<1x32xf32> to vector<64x32xf32>
    %86 = arith.addf %84, %85 : vector<64x32xf32>
    %cst_50 = arith.constant 0.000000e+00 : f32
    %87 = vector.broadcast %cst_50 : f32 to vector<64x32xf32>
    %88 = arith.maximumf %86, %87 : vector<64x32xf32>
    %c0_51 = arith.constant 0 : index
    %c0_52 = arith.constant 0 : index
    %89 = memref.load %arg10[%c0_51, %c0_52] : memref<2x1xf32, #tpu.memory_space<smem>>
    %90 = vector.broadcast %89 : f32 to vector<64x32xf32>
    %91 = arith.mulf %90, %88 : vector<64x32xf32>
    %c16_53 = arith.constant 16 : index
    %c0_54 = arith.constant 0 : index
    %92 = vector.load %arg16[%c16_53, %c0_54] : memref<80x32xf32, #tpu.memory_space<vmem>>, vector<64x32xf32>
    %93 = arith.addf %91, %92 : vector<64x32xf32>
    %c16_55 = arith.constant 16 : index
    %c0_56 = arith.constant 0 : index
    %94 = vector.load %arg16[%c16_55, %c0_56] : memref<80x32xf32, #tpu.memory_space<vmem>>, vector<64x32xf32>
    tpu.vector_store %arg16[%c16_55, %c0_56], %93 {strides = array<i32>} : memref<80x32xf32, #tpu.memory_space<vmem>>, vector<64x32xf32>,
    %c1 = arith.constant 1 : index
    %c0_57 = arith.constant 0 : index
    %c0_58 = arith.constant 0 : index
    %95 = vector.load %arg2[%c1, %c0_57, %c0_58] : memref<2x96x32xbf16, #tpu.memory_space<vmem>>, vector<1x96x32xbf16>
    %96 = vector.shape_cast %95 : vector<1x96x32xbf16> to vector<96x32xbf16>
    %c1_59 = arith.constant 1 : index
    %c0_60 = arith.constant 0 : index
    %c0_61 = arith.constant 0 : index
    %97 = vector.load %arg3[%c1_59, %c0_60, %c0_61] : memref<2x1x32xf32, #tpu.memory_space<vmem>>, vector<1x1x32xf32>
    %98 = vector.shape_cast %97 : vector<1x1x32xf32> to vector<1x32xf32>
    %c1_62 = arith.constant 1 : index
    %c0_63 = arith.constant 0 : index
    %c0_64 = arith.constant 0 : index
    %99 = vector.load %arg4[%c1_62, %c0_63, %c0_64] : memref<2x1x32xf32, #tpu.memory_space<vmem>>, vector<1x1x32xf32>
    %100 = vector.shape_cast %99 : vector<1x1x32xf32> to vector<1x32xf32>
    %c1_65 = arith.constant 1 : index
    %c0_66 = arith.constant 0 : index
    %c0_67 = arith.constant 0 : index
    %101 = vector.load %arg5[%c1_65, %c0_66, %c0_67] : memref<2x1x32xf32, #tpu.memory_space<vmem>>, vector<1x1x32xf32>
    %102 = vector.shape_cast %101 : vector<1x1x32xf32> to vector<1x32xf32>
    %c0_68 = arith.constant 0 : index
    %c0_69 = arith.constant 0 : index
    %103 = vector.load %arg16[%c0_68, %c0_69] : memref<80x32xf32, #tpu.memory_space<vmem>>, vector<80x32xf32>
    %104 = vector.extract_strided_slice %103 {offsets = [8, 0], sizes = [64, 32], strides = [1, 1]} : vector<80x32xf32> to vector<64x32xf32>
    %105 = vector.extract_strided_slice %103 {offsets = [12, 0], sizes = [64, 32], strides = [1, 1]} : vector<80x32xf32> to vector<64x32xf32>
    %106 = vector.extract_strided_slice %103 {offsets = [16, 0], sizes = [64, 32], strides = [1, 1]} : vector<80x32xf32> to vector<64x32xf32>
    %107 = tpu.concatenate %104, %105, %106 in 1 : vector<64x32xf32>, vector<64x32xf32>, vector<64x32xf32> -> vector<64x96xf32>
    %108 = arith.truncf %107 : vector<64x96xf32> to vector<64x96xbf16>
    %cst_70 = arith.constant dense<0.000000e+00> : vector<64x32xf32>
    %109 = tpu.matmul %108, %96, %cst_70 {dimension_numbers = #tpu.dot_dimension_numbers<[1], [0], [0], [1], [0, 0, 1, 1], [], []>} : vector<64x96xbf16>, vector<96x32xbf16>, vector<64x32xf32> -> vector<64x32xf32>
    %110 = vector.broadcast %98 : vector<1x32xf32> to vector<64x32xf32>
    %111 = arith.addf %109, %110 : vector<64x32xf32>
    %cst_71 = arith.constant dense<0.000000e+00> : vector<64xf32>
    %112 = vector.multi_reduction <add>, %111, %cst_71 [1] : vector<64x32xf32> to vector<64xf32>
    %113 = vector.shape_cast %112 : vector<64xf32> to vector<64x1xf32>
    %cst_72 = arith.constant 3.200000e+01 : f32
    %114 = vector.broadcast %cst_72 : f32 to vector<64x1xf32>
    %115 = arith.divf %113, %114 : vector<64x1xf32>
    %116 = vector.broadcast %115 : vector<64x1xf32> to vector<64x32xf32>
    %117 = arith.subf %111, %116 : vector<64x32xf32>
    %118 = arith.mulf %117, %117 : vector<64x32xf32>
    %cst_73 = arith.constant dense<0.000000e+00> : vector<64xf32>
    %119 = vector.multi_reduction <add>, %118, %cst_73 [1] : vector<64x32xf32> to vector<64xf32>
    %120 = vector.shape_cast %119 : vector<64xf32> to vector<64x1xf32>
    %cst_74 = arith.constant 3.200000e+01 : f32
    %121 = vector.broadcast %cst_74 : f32 to vector<64x1xf32>
    %122 = arith.divf %120, %121 : vector<64x1xf32>
    %123 = vector.broadcast %115 : vector<64x1xf32> to vector<64x32xf32>
    %124 = arith.subf %111, %123 : vector<64x32xf32>
    %cst_75 = arith.constant 9.99999993E-9 : f32
    %125 = vector.broadcast %cst_75 : f32 to vector<64x1xf32>
    %126 = arith.addf %122, %125 : vector<64x1xf32>
    %127 = math.rsqrt %126 : vector<64x1xf32>
    %128 = vector.broadcast %127 : vector<64x1xf32> to vector<64x32xf32>
    %129 = arith.mulf %124, %128 : vector<64x32xf32>
    %130 = vector.broadcast %100 : vector<1x32xf32> to vector<64x32xf32>
    %131 = arith.mulf %129, %130 : vector<64x32xf32>
    %132 = vector.broadcast %102 : vector<1x32xf32> to vector<64x32xf32>
    %133 = arith.addf %131, %132 : vector<64x32xf32>
    %cst_76 = arith.constant 0.000000e+00 : f32
    %134 = vector.broadcast %cst_76 : f32 to vector<64x32xf32>
    %135 = arith.maximumf %133, %134 : vector<64x32xf32>
    %c16_77 = arith.constant 16 : index
    %c0_78 = arith.constant 0 : index
    %136 = vector.load %arg17[%c16_77, %c0_78] : memref<80x32xf32, #tpu.memory_space<vmem>>, vector<64x32xf32>
    tpu.vector_store %arg17[%c16_77, %c0_78], %135 {strides = array<i32>} : memref<80x32xf32, #tpu.memory_space<vmem>>, vector<64x32xf32>,
    %c1_79 = arith.constant 1 : index
    %c0_80 = arith.constant 0 : index
    %c0_81 = arith.constant 0 : index
    %137 = vector.load %arg6[%c1_79, %c0_80, %c0_81] : memref<2x96x32xbf16, #tpu.memory_space<vmem>>, vector<1x96x32xbf16>
    %138 = vector.shape_cast %137 : vector<1x96x32xbf16> to vector<96x32xbf16>
    %c1_82 = arith.constant 1 : index
    %c0_83 = arith.constant 0 : index
    %c0_84 = arith.constant 0 : index
    %139 = vector.load %arg7[%c1_82, %c0_83, %c0_84] : memref<2x1x32xf32, #tpu.memory_space<vmem>>, vector<1x1x32xf32>
    %140 = vector.shape_cast %139 : vector<1x1x32xf32> to vector<1x32xf32>
    %c1_85 = arith.constant 1 : index
    %c0_86 = arith.constant 0 : index
    %c0_87 = arith.constant 0 : index
    %141 = vector.load %arg8[%c1_85, %c0_86, %c0_87] : memref<2x1x32xf32, #tpu.memory_space<vmem>>, vector<1x1x32xf32>
    %142 = vector.shape_cast %141 : vector<1x1x32xf32> to vector<1x32xf32>
    %c1_88 = arith.constant 1 : index
    %c0_89 = arith.constant 0 : index
    %c0_90 = arith.constant 0 : index
    %143 = vector.load %arg9[%c1_88, %c0_89, %c0_90] : memref<2x1x32xf32, #tpu.memory_space<vmem>>, vector<1x1x32xf32>
    %144 = vector.shape_cast %143 : vector<1x1x32xf32> to vector<1x32xf32>
    %c0_91 = arith.constant 0 : index
    %c0_92 = arith.constant 0 : index
    %145 = vector.load %arg17[%c0_91, %c0_92] : memref<80x32xf32, #tpu.memory_space<vmem>>, vector<80x32xf32>
    %146 = vector.extract_strided_slice %145 {offsets = [0, 0], sizes = [64, 32], strides = [1, 1]} : vector<80x32xf32> to vector<64x32xf32>
    %147 = vector.extract_strided_slice %145 {offsets = [8, 0], sizes = [64, 32], strides = [1, 1]} : vector<80x32xf32> to vector<64x32xf32>
    %148 = vector.extract_strided_slice %145 {offsets = [16, 0], sizes = [64, 32], strides = [1, 1]} : vector<80x32xf32> to vector<64x32xf32>
    %149 = tpu.concatenate %146, %147, %148 in 1 : vector<64x32xf32>, vector<64x32xf32>, vector<64x32xf32> -> vector<64x96xf32>
    %150 = arith.truncf %149 : vector<64x96xf32> to vector<64x96xbf16>
    %cst_93 = arith.constant dense<0.000000e+00> : vector<64x32xf32>
    %151 = tpu.matmul %150, %138, %cst_93 {dimension_numbers = #tpu.dot_dimension_numbers<[1], [0], [0], [1], [0, 0, 1, 1], [], []>} : vector<64x96xbf16>, vector<96x32xbf16>, vector<64x32xf32> -> vector<64x32xf32>
    %152 = vector.broadcast %140 : vector<1x32xf32> to vector<64x32xf32>
    %153 = arith.addf %151, %152 : vector<64x32xf32>
    %cst_94 = arith.constant dense<0.000000e+00> : vector<64xf32>
    %154 = vector.multi_reduction <add>, %153, %cst_94 [1] : vector<64x32xf32> to vector<64xf32>
    %155 = vector.shape_cast %154 : vector<64xf32> to vector<64x1xf32>
    %cst_95 = arith.constant 3.200000e+01 : f32
    %156 = vector.broadcast %cst_95 : f32 to vector<64x1xf32>
    %157 = arith.divf %155, %156 : vector<64x1xf32>
    %158 = vector.broadcast %157 : vector<64x1xf32> to vector<64x32xf32>
    %159 = arith.subf %153, %158 : vector<64x32xf32>
    %160 = arith.mulf %159, %159 : vector<64x32xf32>
    %cst_96 = arith.constant dense<0.000000e+00> : vector<64xf32>
    %161 = vector.multi_reduction <add>, %160, %cst_96 [1] : vector<64x32xf32> to vector<64xf32>
    %162 = vector.shape_cast %161 : vector<64xf32> to vector<64x1xf32>
    %cst_97 = arith.constant 3.200000e+01 : f32
    %163 = vector.broadcast %cst_97 : f32 to vector<64x1xf32>
    %164 = arith.divf %162, %163 : vector<64x1xf32>
    %165 = vector.broadcast %157 : vector<64x1xf32> to vector<64x32xf32>
    %166 = arith.subf %153, %165 : vector<64x32xf32>
    %cst_98 = arith.constant 9.99999993E-9 : f32
    %167 = vector.broadcast %cst_98 : f32 to vector<64x1xf32>
    %168 = arith.addf %164, %167 : vector<64x1xf32>
    %169 = math.rsqrt %168 : vector<64x1xf32>
    %170 = vector.broadcast %169 : vector<64x1xf32> to vector<64x32xf32>
    %171 = arith.mulf %166, %170 : vector<64x32xf32>
    %172 = vector.broadcast %142 : vector<1x32xf32> to vector<64x32xf32>
    %173 = arith.mulf %171, %172 : vector<64x32xf32>
    %174 = vector.broadcast %144 : vector<1x32xf32> to vector<64x32xf32>
    %175 = arith.addf %173, %174 : vector<64x32xf32>
    %cst_99 = arith.constant 0.000000e+00 : f32
    %176 = vector.broadcast %cst_99 : f32 to vector<64x32xf32>
    %177 = arith.maximumf %175, %176 : vector<64x32xf32>
    %c1_100 = arith.constant 1 : index
    %c0_101 = arith.constant 0 : index
    %178 = memref.load %arg10[%c1_100, %c0_101] : memref<2x1xf32, #tpu.memory_space<smem>>
    %179 = vector.broadcast %178 : f32 to vector<64x32xf32>
    %180 = arith.mulf %179, %177 : vector<64x32xf32>
    %c16_102 = arith.constant 16 : index
    %c0_103 = arith.constant 0 : index
    %181 = vector.load %arg16[%c16_102, %c0_103] : memref<80x32xf32, #tpu.memory_space<vmem>>, vector<64x32xf32>
    %182 = arith.addf %180, %181 : vector<64x32xf32>
    %c16_104 = arith.constant 16 : index
    %c0_105 = arith.constant 0 : index
    %183 = vector.load %arg16[%c16_104, %c0_105] : memref<80x32xf32, #tpu.memory_space<vmem>>, vector<64x32xf32>
    tpu.vector_store %arg16[%c16_104, %c0_105], %182 {strides = array<i32>} : memref<80x32xf32, #tpu.memory_space<vmem>>, vector<64x32xf32>,
    %c16_106 = arith.constant 16 : index
    %c0_107 = arith.constant 0 : index
    %184 = vector.load %arg16[%c16_106, %c0_107] : memref<80x32xf32, #tpu.memory_space<vmem>>, vector<64x32xf32>
    %185 = arith.truncf %184 : vector<64x32xf32> to vector<64x32xbf16>
    %c0_108 = arith.constant 0 : index
    %c0_109 = arith.constant 0 : index
    %186 = vector.load %arg11[%c0_108, %c0_109] : memref<32x32xbf16, #tpu.memory_space<vmem>>, vector<32x32xbf16>
    %cst_110 = arith.constant dense<0.000000e+00> : vector<64x32xf32>
    %187 = tpu.matmul %185, %186, %cst_110 {dimension_numbers = #tpu.dot_dimension_numbers<[1], [0], [0], [1], [0, 0, 1, 1], [], []>} : vector<64x32xbf16>, vector<32x32xbf16>, vector<64x32xf32> -> vector<64x32xf32>
    %c0_111 = arith.constant 0 : index
    %c0_112 = arith.constant 0 : index
    %188 = vector.load %arg12[%c0_111, %c0_112] : memref<1x32xf32, #tpu.memory_space<vmem>>, vector<1x32xf32>
    %189 = vector.broadcast %188 : vector<1x32xf32> to vector<64x32xf32>
    %190 = arith.addf %187, %189 : vector<64x32xf32>
    %191 = arith.truncf %190 : vector<64x32xf32> to vector<64x32xbf16>
    %c0_113 = arith.constant 0 : index
    %c0_114 = arith.constant 0 : index
    %192 = vector.load %arg13[%c0_113, %c0_114] : memref<32x4xbf16, #tpu.memory_space<vmem>>, vector<32x4xbf16>
    %cst_115 = arith.constant dense<0.000000e+00> : vector<64x4xf32>
    %193 = tpu.matmul %191, %192, %cst_115 {dimension_numbers = #tpu.dot_dimension_numbers<[1], [0], [0], [1], [0, 0, 1, 1], [], []>} : vector<64x32xbf16>, vector<32x4xbf16>, vector<64x4xf32> -> vector<64x4xf32>
    %c0_116 = arith.constant 0 : index
    %c0_117 = arith.constant 0 : index
    %194 = vector.load %arg14[%c0_116, %c0_117] : memref<1x4xf32, #tpu.memory_space<vmem>>, vector<1x4xf32>
    %195 = vector.broadcast %194 : vector<1x4xf32> to vector<64x4xf32>
    %196 = arith.addf %193, %195 : vector<64x4xf32>
    %c0_118 = arith.constant 0 : index
    %c0_119 = arith.constant 0 : index
    %c0_120 = arith.constant 0 : index
    %197 = vector.load %arg15[%c0_118, %c0_119, %c0_120] : memref<1x64x4xf32, #tpu.memory_space<vmem>>, vector<1x64x4xf32>
    %198 = vector.shape_cast %197 : vector<1x64x4xf32> to vector<64x4xf32>
    %199 = vector.shape_cast %196 : vector<64x4xf32> to vector<1x64x4xf32>
    tpu.vector_store %arg15[%c0_118, %c0_119, %c0_120], %199 {strides = array<i32>} : memref<1x64x4xf32, #tpu.memory_space<vmem>>, vector<1x64x4xf32>,
    return
  }
  func.func @transform_0(%arg0: i32) -> (i32, i32, i32) {
    %c0_i32 = arith.constant 0 : i32
    %c0_i32_0 = arith.constant 0 : i32
    %c0_i32_1 = arith.constant 0 : i32
    return %arg0, %c0_i32, %c0_i32_0 : i32, i32, i32
  }
  func.func @transform_1(%arg0: i32) -> (i32, i32, i32) {
    %c0_i32 = arith.constant 0 : i32
    %c0_i32_0 = arith.constant 0 : i32
    %c0_i32_1 = arith.constant 0 : i32
    %c0_i32_2 = arith.constant 0 : i32
    return %c0_i32, %c0_i32_0, %c0_i32_1 : i32, i32, i32
  }
  func.func @transform_2(%arg0: i32) -> (i32, i32, i32) {
    %c0_i32 = arith.constant 0 : i32
    %c0_i32_0 = arith.constant 0 : i32
    %c0_i32_1 = arith.constant 0 : i32
    %c0_i32_2 = arith.constant 0 : i32
    return %c0_i32, %c0_i32_0, %c0_i32_1 : i32, i32, i32
  }
  func.func @transform_3(%arg0: i32) -> (i32, i32, i32) {
    %c0_i32 = arith.constant 0 : i32
    %c0_i32_0 = arith.constant 0 : i32
    %c0_i32_1 = arith.constant 0 : i32
    %c0_i32_2 = arith.constant 0 : i32
    return %c0_i32, %c0_i32_0, %c0_i32_1 : i32, i32, i32
  }
  func.func @transform_4(%arg0: i32) -> (i32, i32, i32) {
    %c0_i32 = arith.constant 0 : i32
    %c0_i32_0 = arith.constant 0 : i32
    %c0_i32_1 = arith.constant 0 : i32
    %c0_i32_2 = arith.constant 0 : i32
    return %c0_i32, %c0_i32_0, %c0_i32_1 : i32, i32, i32
  }
  func.func @transform_5(%arg0: i32) -> (i32, i32, i32) {
    %c0_i32 = arith.constant 0 : i32
    %c0_i32_0 = arith.constant 0 : i32
    %c0_i32_1 = arith.constant 0 : i32
    %c0_i32_2 = arith.constant 0 : i32
    return %c0_i32, %c0_i32_0, %c0_i32_1 : i32, i32, i32
  }
  func.func @transform_6(%arg0: i32) -> (i32, i32, i32) {
    %c0_i32 = arith.constant 0 : i32
    %c0_i32_0 = arith.constant 0 : i32
    %c0_i32_1 = arith.constant 0 : i32
    %c0_i32_2 = arith.constant 0 : i32
    return %c0_i32, %c0_i32_0, %c0_i32_1 : i32, i32, i32
  }
  func.func @transform_7(%arg0: i32) -> (i32, i32, i32) {
    %c0_i32 = arith.constant 0 : i32
    %c0_i32_0 = arith.constant 0 : i32
    %c0_i32_1 = arith.constant 0 : i32
    %c0_i32_2 = arith.constant 0 : i32
    return %c0_i32, %c0_i32_0, %c0_i32_1 : i32, i32, i32
  }
  func.func @transform_8(%arg0: i32) -> (i32, i32, i32) {
    %c0_i32 = arith.constant 0 : i32
    %c0_i32_0 = arith.constant 0 : i32
    %c0_i32_1 = arith.constant 0 : i32
    %c0_i32_2 = arith.constant 0 : i32
    return %c0_i32, %c0_i32_0, %c0_i32_1 : i32, i32, i32
  }
  func.func @transform_9(%arg0: i32) -> (i32, i32) {
    %c0_i32 = arith.constant 0 : i32
    %c0_i32_0 = arith.constant 0 : i32
    %c0_i32_1 = arith.constant 0 : i32
    return %c0_i32, %c0_i32_0 : i32, i32
  }
  func.func @transform_10(%arg0: i32) -> (i32, i32) {
    %c0_i32 = arith.constant 0 : i32
    %c0_i32_0 = arith.constant 0 : i32
    %c0_i32_1 = arith.constant 0 : i32
    return %c0_i32, %c0_i32_0 : i32, i32
  }
  func.func @transform_11(%arg0: i32) -> (i32, i32) {
    %c0_i32 = arith.constant 0 : i32
    %c0_i32_0 = arith.constant 0 : i32
    %c0_i32_1 = arith.constant 0 : i32
    return %c0_i32, %c0_i32_0 : i32, i32
  }
  func.func @transform_12(%arg0: i32) -> (i32, i32) {
    %c0_i32 = arith.constant 0 : i32
    %c0_i32_0 = arith.constant 0 : i32
    %c0_i32_1 = arith.constant 0 : i32
    return %c0_i32, %c0_i32_0 : i32, i32
  }
  func.func @transform_13(%arg0: i32) -> (i32, i32) {
    %c0_i32 = arith.constant 0 : i32
    %c0_i32_0 = arith.constant 0 : i32
    %c0_i32_1 = arith.constant 0 : i32
    return %c0_i32, %c0_i32_0 : i32, i32
  }
  func.func @transform_14(%arg0: i32) -> (i32, i32, i32) {
    %c0_i32 = arith.constant 0 : i32
    %c0_i32_0 = arith.constant 0 : i32
    %c0_i32_1 = arith.constant 0 : i32
    return %arg0, %c0_i32, %c0_i32_0 : i32, i32, i32
  }
}

</mosaic_0001>

<bundles_post_ra>
// kernel: vqvae_forward.4
= control target key start
LH: loop header
LB: loop body
LE: loop exit
PB: predicated region body
PF: predicated region fallthrough
CT: control target
= control target key end

     0   :  { %s1208_s27 = smov 0   ;;  %s1379_s0 = inlined_call_operand.vmem [shape: f32[2,8,256], index: 0, kind: input, shape index: {}]   ;;  %s1380_s1 = inlined_call_operand.vmem [shape: bf16[256,32], index: 1, kind: input, shape index: {}]   ;;  %s1381_s2 = inlined_call_operand.vmem [shape: f32[1,32], index: 2, kind: input, shape index: {}]   ;;  %s1382_s3 = inlined_call_operand.vmem [shape: f32[32,64], index: 3, kind: input, shape index: {}]   ;;  %s1383_s4 = inlined_call_operand.vmem [shape: bf16[64,8], index: 4, kind: input, shape index: {}]   ;;  %s1384_s5 = inlined_call_operand.vmem [shape: f32[64,1], index: 5, kind: input, shape index: {}]   ;;  %s1385_s6 = inlined_call_operand.vmem [shape: f32[2,64,32], index: 6, kind: output, shape index: {0}]   ;;  %s1386_s7 = inlined_call_operand.vmem [shape: s32[2,8,1], index: 7, kind: output, shape index: {1}]   ;;  %s1387_s8 = inlined_call_operand.vmem [shape: f32[2,1,1], index: 8, kind: output, shape index: {2}]  }
   0x1 LB: > { %s1001_s28 = sadd.s32 4294967295, %s1158_s27   ;;  %p1005_p0 = scmp.ge.s32.totalorder %s1158_s27, 1  ;;  %s1158_s27 = sphi %s1208_s27, %s19_s27  }
   0x2   : > { %p267_p1 = scmp.lt.s32.totalorder %s1158_s27, 3 }
   0x4   : > { %p268_p2 = pnand %p1005_p0, %p267_p1 }
   0x5   : > { %p308_p3 = scmp.lt.s32.totalorder (!%p268_p2), %s1001_s28, 1 }
   0x6   : > { %271 = sbr.rel (%p268_p2) target bundleno = 1137 (0x471), region = 44 }
   0xb   : > { %v1132_v0 = vld [vmem:[%s1380_s1 + $0x78] sm:$0xff]   ;;  %v1134_v2 = vld [vmem:[%s1380_s1 + $0x70] sm:$0xff]   ;;  %v1160_v3 = vmov 0.0   ;;  %v1136_v5 = vld [vmem:[%s1380_s1 + $0x68] sm:$0xff]   ;;  %s1389_s28 = smov (!%p308_p3, %s1001_s28), 1  ;;  %vm1161_vm0 = vmmov 0   ;;  %v611_v58 = vlaneseq }
   0xc   : > { %v1133_v1 = vld [vmem:[%s1380_s1 + $0x38] sm:$0xff]   ;;  %1047 = vmatprep.subr.bf16.mxu0 %v1132_v0  ;;  %1084 = vmatprep.subr.mxu1 %v1160_v3  ;;  %v1135_v4 = vld [vmem:[%s1380_s1 + $0x30] sm:$0xff]   ;;  %v1137_v6 = vld [vmem:[%s1380_s1 + $0x28] sm:$0xff]   ;;  %s1045_s21 = sshll.u32 %s1389_s28, 4  ;;  %vm510_vm1 = vcmask 261120   ;;  %vm593_vm2 = vcmask 523264   ;;  %s324_s23 = scalar_lea.vmem %s1387_s8, %s1389_s28 }
   0xd   : > { %1048 = vmatpush3.bf16.msra.mxu0 %v1133_v1  ;;  %v1138_v7 = vld [vmem:[%s1380_s1 + $0x60] sm:$0xff]   ;;  %v1140_v9 = vld [vmem:[%s1380_s1 + $0x58] sm:$0xff]   ;;  %s312_s30 = scalar_lea.vmem %s1379_s0, %s1045_s21  ;;  %v1142_v11 = vld [vmem:[%s1380_s1 + $0x50] sm:$0xff]   ;;  %1092 = vmatprep.mubr.msk.f32.mxu1 %vm1161_vm0, %v1160_v3  ;;  %v612_v59 = vand.u32 127, %v611_v58  ;;  %v1162_v1 = vmov 0   ;;  %s1010_s25 = sshll.u32 %s1389_s28, 3 }
   0xe   : > { %1049 = vmatprep.subr.bf16.mxu0 %v1134_v2  ;;  %v1139_v8 = vld [vmem:[%s1380_s1 + $0x20] sm:$0xff]   ;;  %v1141_v10 = vld [vmem:[%s1380_s1 + $0x18] sm:$0xff]   ;;  %v327_v12 = vld [vmem:[%s312_s30 + $0x8] sm:$0xff]  ;;  %1131 = vset.pattern.permute.xlu1 %v1162_v1  ;;  %vm888_vm4 = vcmask 7168   ;;  %vm798_vm6 = vcmask 64512   ;;  %vm811_vm7 = vcmask 1043456  }
   0xf   : > { %v329_v13 = vpack.c.bf16 %v327_v12, %v327_v12  ;;  %v1143_v14 = vld [vmem:[%s1380_s1 + $0x10] sm:$0xff]   ;;  %v1144_v15 = vld [vmem:[%s1380_s1 + $0x48] sm:$0xff]   ;;  %v1146_v17 = vld [vmem:[%s1380_s1 + $0x40] sm:$0xff]   ;;  %v614_v60 = vcvt.s32.f32 %v612_v59  ;;  %1130 = vset.pattern.permute.xlu0 %v1162_v1  ;;  %vm719_vm8 = vcmask 0   ;;  %s1046_s24 = sshll.u32 %s1389_s28, 6 }
  0x10   : > { %v1145_v16 = vld [vmem:[%s1380_s1 + $0x8] sm:$0xff]   ;;  %v1147_v18 = vld [vmem:[%s1380_s1] sm:$0xff]   ;;  %v508_v21 = vld [vmem:[%s1382_s3 + $0x18] sm:$0xff]  ;;  %s317_s29 = scalar_lea.vmem %s1385_s6, %s1046_s24 }
  0x11   : > { %1050 = vmatpush3.bf16.msra.mxu0 %v1135_v4  ;;  %497 = vmatprep.mubr.bf16.mxu0 %v329_v13  ;;  %v326_v19 = vld [vmem:[%s312_s30] sm:$0xff]  ;;  %v507_v22 = vld [vmem:[%s1382_s3 + $0x10] sm:$0xff]  ;;  %v506_v23 = vld [vmem:[%s1382_s3 + $0x8] sm:$0xff]  ;;  %v592_v40 = vmul.f32 %v508_v21, %v508_v21  ;;  %s321_s30 = scalar_lea.vmem %s1386_s7, %s1010_s25 }
  0x12   : > { %1051 = vmatprep.subr.bf16.mxu0 %v1136_v5  ;;  %v328_v20 = vpack.c.bf16 %v326_v19, %v326_v19  ;;  %1085 = vmatpush3.msra.mxu1 %v508_v21  ;;  %v505_v24 = vld [vmem:[%s1382_s3] sm:$0xff]  ;;  %v590_v34 = vmul.f32 %v506_v23, %v506_v23  ;;  %v591_v36 = vmul.f32 %v507_v22, %v507_v22  ;;  %v731_v0 = vld [vmem:[%s1384_s5 + $0x8] sm:$0xff]  ;;  %v732_v2 = vld [vmem:[%s1384_s5 + $0x10] sm:$0xff] }
  0x13   : > { %1086 = vmatprep.subr.mxu1 %v1160_v3  ;;  %v1011_v26 = vld [vmem:[%s1381_s2] ss:$0 sm:$0xff]  ;;  %v589_v35 = vmul.f32 %v505_v24, %v505_v24  ;;  %v599_v43 = vsel %vm593_vm2, %v592_v40, 0.0  ;;  %v733_v4 = vld [vmem:[%s1384_s5 + $0x18] sm:$0xff]  ;;  %v1149_v19 = vld [vmem:[%s1383_s4 + $0x8] sm:$0xff]  }
  0x14   : > { %1087 = vmatpush3.msra.mxu1 %v507_v22  ;;  %v595_v37 = vsel %vm593_vm2, %v590_v34, 0.0  ;;  %v597_v41 = vsel %vm593_vm2, %v591_v36, 0.0  ;;  %v734_v5 = vld [vmem:[%s1384_s5 + $0x20] sm:$0xff] }
  0x15   : > { %1052 = vmatpush3.bf16.msra.mxu0 %v1137_v6  ;;  %1088 = vmatprep.subr.mxu1 %v1160_v3  ;;  %v594_v38 = vsel %vm593_vm2, %v589_v35, 0.0  ;;  %v735_v6 = vld [vmem:[%s1384_s5 + $0x28] sm:$0xff]  ;;  %v1148_v12 = vld [vmem:[%s1383_s4] sm:$0xff]  }
  0x16   : > { %1053 = vmatprep.subr.bf16.mxu0 %v1138_v7  ;;  %1089 = vmatpush3.msra.mxu1 %v506_v23  ;;  %v596_v39 = vadd.f32 %v595_v37, %v594_v38  ;;  %v736_v7 = vld [vmem:[%s1384_s5 + $0x30] sm:$0xff]  ;;  %v730_v13 = vld [vmem:[%s1384_s5] sm:$0xff] }
  0x17   : > { %1090 = vmatprep.subr.mxu1 %v1160_v3 }
  0x18   : > { %1091 = vmatpush3.msra.mxu1 %v505_v24  ;;  %v598_v42 = vadd.f32 %v597_v41, %v596_v39 }
  0x19   : > { %1054 = vmatpush3.bf16.msra.mxu0 %v1139_v8  ;;  %1095 = vmatprep.subr.mxu1 %v1160_v3 }
  0x1a   : > { %1055 = vmatprep.subr.bf16.mxu0 %v1140_v9  ;;  %v600_v44 = vadd.f32 %v599_v43, %v598_v42 }
  0x1c   : > { %v601_v45 = vrot.slane %v600_v44, 4 }
  0x1d   : > { %1056 = vmatpush3.bf16.msra.mxu0 %v1141_v10 }
  0x1e   : > { %1057 = vmatprep.subr.bf16.mxu0 %v1142_v11  ;;  %v602_v46 = vadd.f32 %v601_v45, %v600_v44 }
  0x20   : > { %v603_v47 = vrot.slane %v602_v46, 2 }
  0x21   : > { %1058 = vmatpush3.bf16.msra.mxu0 %v1143_v14 }
  0x22   : > { %1059 = vmatprep.subr.bf16.mxu0 %v1144_v15  ;;  %v604_v48 = vadd.f32 %v603_v47, %v602_v46 }
  0x24   : > { %v605_v49 = vrot.slane %v604_v48, 1 }
  0x25   : > { %1060 = vmatpush3.bf16.msra.mxu0 %v1145_v16 }
  0x26   : > { %1061 = vmatprep.subr.bf16.mxu0 %v1146_v17  ;;  %v606_v52 = vadd.f32 %v605_v49, %v604_v48 }
  0x29   : > { %1062 = vmatpush3.bf16.msra.mxu0 %v1147_v18 }
  0x2c   : > { %498 = vmatmul.mubr.bf16.vlgmr.msra.gmra.mxu0 %v328_v20  ;;  %v1150_v20 = vld [vmem:[%s1383_s4 + $0x10] sm:$0xff]  }
  0xec   : > { %v1063_v25 = vpop.f32.mrf.mxu0 }
  0xee   : > { %v1064_v27 = vpop.f32.mrf.mxu0 }
  0xef   : > { %v1065_v28 = vadd.f32 %v1064_v27, %v1063_v25 }
  0xf0   : > { %v1066_v29 = vpop.f32.mrf.mxu0 }
  0xf1   : > { %v1291_v30 = vadd.f32 %v1065_v28, %v1011_v26 }
  0xf2   : > { %v1067_v31 = vpop.f32.mrf.mxu0 }
  0xf3   : > { %1093 = vmatmul.mubr.msk.f32.vlgmr.msra.gmra.mxu1 %vm510_vm1, %v1291_v30  ;;  %v509_v32 = vmul.f32 %v1291_v30, %v1291_v30 }
  0xf4   : > { %1096 = vmatpush3.xpose.msk.msra.mxu1 %vm593_vm2, %v508_v21  ;;  %1103 = vmatprep.mubr.msk.f32.mxu1 %vm1161_vm0, %v1160_v3 }
  0xf5   : > { %v511_v33 = vsel %vm510_vm1, %v509_v32, 0.0  ;;  %1097 = vmatprep.subr.mxu1 %v1160_v3 }
  0xf6   : > { %512 = vadd.xlane.f32.xlu0 %v511_v33 }
  0xf8   : > { %1098 = vmatpush3.xpose.msk.msra.mxu1 %vm593_vm2, %v507_v22  ;;  %v1151_v22 = vld [vmem:[%s1383_s4 + $0x18] sm:$0xff]  }
  0xf9   : > { %1099 = vmatprep.subr.mxu1 %v1160_v3 }
  0xfc   : > { %1100 = vmatpush3.xpose.msk.msra.mxu1 %vm593_vm2, %v506_v23  ;;  %v737_v23 = vld [vmem:[%s1384_s5 + $0x38] sm:$0xff] }
  0xfd   : > { %1101 = vmatprep.subr.mxu1 %v1160_v3 }
 0x100   : > { %1102 = vmatpush3.xpose.msk.msra.mxu1 %vm593_vm2, %v505_v24 }
 0x17f   : > { %v513_v53 = vpop.xlane.xlu0 %512 }
 0x1b3   : > { %v583_v50 = vpop.f32.mrf.mxu1 }
 0x1b4   : > { %v587_v51 = vmul.f32 2.0, %v583_v50 }
 0x1b5   : > { %v1094_v54 = vpop.f32.mrf.mxu1 }
 0x1b6   : > { %v588_v55 = vsub.f32 %v513_v53, %v587_v51 }
 0x1b8   : > { %v607_v56 = vadd.f32 %v606_v52, %v588_v55 }
 0x1ba   : > { %v608_v57 = vsel %vm593_vm2, %v607_v56, inf }
 0x1bb   : > { %609 = vmin.xlane.f32.xlu0 %v608_v57 }
 0x1d1   : > { %740 = vperm.xlu0 %1130, %v730_v13  }
 0x244   : > { %v610_v61 = vpop.xlane.xlu0 %609 }
 0x245   : > { %vm613_vm3 = vcmp.le.f32.partialorder %v607_v56, %v610_v61 }
 0x246   : > { %v615_v62 = vsel %vm613_vm3, %v614_v60, 64.0 }
 0x247   : > { %v616_v63 = vsel %vm593_vm2, %v615_v62, inf }
 0x248   : > { %617 = vmin.xlane.f32.xlu1 %v616_v63 }
 0x24c   : > { %v741_v38 = vpop.permute.xlu0 %740 }
 0x259   : > { %745 = vperm.xlu1 %1131, %v731_v0  }
 0x25d   : > { %750 = vperm.xlu1 %1131, %v732_v2  }
 0x261   : > { %755 = vperm.xlu1 %1131, %v733_v4  }
 0x265   : > { %760 = vperm.xlu1 %1131, %v734_v5  }
 0x269   : > { %765 = vperm.xlu1 %1131, %v735_v6  }
 0x26d   : > { %770 = vperm.xlu1 %1131, %v736_v7  }
 0x2d1   : > { %v618_v8 = vpop.xlane.xlu1 %617 }
 0x2d2   : > { %v1117_v9 = vtrunc.f32 %v618_v8 }
 0x2d4   : > { %v1118_v10 = vcvt.f32.s32 %v1117_v9 }
 0x2d5   : > { %v746_v24 = vpop.permute.xlu1 %745 }
 0x2d6   : > { %vm620_vm5 = vcmp.eq.s32.totalorder %v612_v59, %v1118_v10  ;;  %889 = vst.msk [vmem:[%s321_s30] sm:$0xff] %vm888_vm4, %v1118_v10 }
 0x2d7   : > { %v1029_v11 = vsel %vm620_vm5, 1.0, %v1160_v3 }
 0x2d8   : > { %1104 = vmatmul.mubr.msk.f32.vlgmr.msra.gmra.mxu1 %vm593_vm2, %v1029_v11 }
 0x2d9   : > { %1108 = vmatprep.mubr.msk.bf16.mxu1 %vm798_vm6, %v1148_v12  ;;  %v751_v25 = vpop.permute.xlu1 %750 }
 0x2dd   : > { %v756_v26 = vpop.permute.xlu1 %755 }
 0x2e1   : > { %v761_v27 = vpop.permute.xlu1 %760 }
 0x2e5   : > { %v766_v28 = vpop.permute.xlu1 %765 }
 0x2e9   : > { %v771_v29 = vpop.permute.xlu1 %770 }
 0x398   : > { %v704_v14 = vpop.f32.mrf.mxu1 }
 0x399   : > { %v708_v15 = vsub.f32 %v704_v14, %v1291_v30  ;;  %v729_v16 = vpack.c.bf16 %v704_v14, %v704_v14 }
 0x39a   : > { %v1105_v3 = vpop.f32.mrf.mxu1 }
 0x39b   : > { %v709_v17 = vmul.f32 %v708_v15, %v708_v15  ;;  %1116 = vmatprep.subr.msk.bf16.mxu1 %vm811_vm7, %v729_v16  ;;  %v813_v18 = vsel %vm811_vm7, %v729_v16, 0 }
 0x39c   : > { %1107 = vmatpush3.bf16.msra.mxu1 %v813_v18 }
 0x39d   : > { %v710_v21 = vsel %vm510_vm1, %v709_v17, 0.0 }
 0x39e   : > { %711 = vadd.xlane.f32.xlu1 %v710_v21 }
 0x39f   : > { %1109 = vmatmul.mubr.msk.bf16.vlgmr.msra.gmra.mxu1 %vm798_vm6, %v1149_v19 }
 0x3a0   : > { %1112 = vmatprep.mubr.msk.bf16.mxu1 %vm798_vm6, %v1150_v20 }
 0x3a7   : > { %1113 = vmatmul.mubr.msk.bf16.gmra.mxu1 %vm798_vm6, %v1151_v22 }
 0x3af   : > { %775 = vperm.xlu1 %1131, %v737_v23  }
 0x427   : > { %v712_v30 = vpop.xlane.xlu1 %711 }
 0x428   : > { %v713_v31 = vrot.slane %v712_v30, 4 }
 0x42a   : > { %v714_v32 = vadd.f32 %v713_v31, %v712_v30 }
 0x42b   : > { %v776_v50 = vpop.permute.xlu1 %775 }
 0x42c   : > { %v715_v33 = vrot.slane %v714_v32, 2 }
 0x42e   : > { %v716_v34 = vadd.f32 %v715_v33, %v714_v32 }
 0x430   : > { %v717_v35 = vrot.slane %v716_v34, 1 }
 0x432   : > { %v718_v36 = vadd.f32 %v717_v35, %v716_v34 }
 0x434   : > { %720 = vst.msk [vmem:[%s324_s23] sm:$0x1] %vm719_vm8, %v718_v36 }
 0x45f   : > { %v1110_v37 = vpop.f32.mrf.mxu1 }
 0x460   : > { %v858_v39 = vadd.f32 %v1110_v37, %v751_v25 }
 0x461   : > { %v849_v40 = vpop.f32.mrf.mxu1 }
 0x462   : > { %882 = vst.msk [vmem:[%s317_s29 + $0x10] sm:$0xff] %vm510_vm1, %v858_v39  ;;  %v850_v41 = vadd.f32 %v849_v40, %v741_v38 }
 0x463   : > { %v1111_v42 = vpop.f32.mrf.mxu1 }
 0x464   : > { %880 = vst.msk [vmem:[%s317_s29] sm:$0xff] %vm510_vm1, %v850_v41  ;;  %v861_v43 = vadd.f32 %v1111_v42, %v756_v26 }
 0x465   : > { %v852_v44 = vpop.f32.mrf.mxu1 }
 0x466   : > { %883 = vst.msk [vmem:[%s317_s29 + $0x18] sm:$0xff] %vm510_vm1, %v861_v43  ;;  %v853_v45 = vadd.f32 %v852_v44, %v746_v24 }
 0x467   : > { %v1114_v46 = vpop.f32.mrf.mxu1 }
 0x468   : > { %881 = vst.msk [vmem:[%s317_s29 + $0x8] sm:$0xff] %vm510_vm1, %v853_v45  ;;  %v874_v47 = vadd.f32 %v1114_v46, %v771_v29 }
 0x469   : > { %v865_v48 = vpop.f32.mrf.mxu1 }
 0x46a   : > { %886 = vst.msk [vmem:[%s317_s29 + $0x30] sm:$0xff] %vm510_vm1, %v874_v47  ;;  %v866_v49 = vadd.f32 %v865_v48, %v761_v27 }
 0x46b   : > { %v1115_v51 = vpop.f32.mrf.mxu1 }
 0x46c   : > { %884 = vst.msk [vmem:[%s317_s29 + $0x20] sm:$0xff] %vm510_vm1, %v866_v49  ;;  %v877_v52 = vadd.f32 %v1115_v51, %v776_v50 }
 0x46d   : > { %v868_v53 = vpop.f32.mrf.mxu1 }
 0x46e   : > { %887 = vst.msk [vmem:[%s317_s29 + $0x38] sm:$0xff] %vm510_vm1, %v877_v52  ;;  %v869_v54 = vadd.f32 %v868_v53, %v766_v28 }
 0x470   : > { %885 = vst.msk [vmem:[%s317_s29 + $0x28] sm:$0xff] %vm510_vm1, %v869_v54 }
 0x471 PF: > { %s19_s27 = sadd.s32 1, %s1158_s27  }
 0x472   : > { %p16_p4 = scmp.ge.s32.totalorder %s19_s27, 4  }
 0x474   :  { %18 = sbr.rel (!%p16_p4) target bundleno = 1 (0x1), region = 98 }

// kernel: vqvae_forward.3
= control target key start
LH: loop header
LB: loop body
LE: loop exit
PB: predicated region body
PF: predicated region fallthrough
CT: control target
= control target key end

     0   :  { %19 = vsyncpa [#allocation5], 0  ;;  %s3101_s29 = smov 0   ;;  %s3866_s0 = inlined_call_operand.vmem [shape: f32[2,64,4], index: 0, kind: input, shape index: {}]   ;;  %s3867_s1 = inlined_call_operand.vmem [shape: bf16[4,32], index: 1, kind: input, shape index: {}]   ;;  %s3868_s2 = inlined_call_operand.vmem [shape: f32[1,32], index: 2, kind: input, shape index: {}]   ;;  %s3869_s3 = inlined_call_operand.vmem [shape: bf16[2,96,32], index: 3, kind: input, shape index: {}]   ;;  %s3870_s4 = inlined_call_operand.vmem [shape: f32[2,1,32], index: 4, kind: input, shape index: {}]   ;;  %s3871_s5 = inlined_call_operand.vmem [shape: f32[2,1,32], index: 5, kind: input, shape index: {}]   ;;  %s3872_s6 = inlined_call_operand.vmem [shape: f32[2,1,32], index: 6, kind: input, shape index: {}]   ;;  %s3873_s7 = inlined_call_operand.vmem [shape: bf16[2,96,32], index: 7, kind: input, shape index: {}]   ;;  %s3874_s8 = inlined_call_operand.vmem [shape: f32[2,1,32], index: 8, kind: input, shape index: {}]   ;;  %s3875_s9 = inlined_call_operand.vmem [shape: f32[2,1,32], index: 9, kind: input, shape index: {}]   ;;  %s3876_s10 = inlined_call_operand.vmem [shape: f32[2,1,32], index: 10, kind: input, shape index: {}]   ;;  %s3877_s11 = inlined_call_operand.vmem [shape: f32[2,1], index: 11, kind: input, shape index: {}]   ;;  %s3878_s12 = inlined_call_operand.vmem [shape: bf16[32,32], index: 12, kind: input, shape index: {}]   ;;  %s3879_s13 = inlined_call_operand.vmem [shape: f32[1,32], index: 13, kind: input, shape index: {}]   ;;  %s3880_s14 = inlined_call_operand.vmem [shape: f32[2,64,32], index: 14, kind: output, shape index: {}]  }
   0x1 LB: > { %s3107_s30 = sadd.s32 4294967295, %s3020_s29   ;;  %p2455_p0 = scmp.ge.s32.totalorder %s3020_s29, 1  ;;  %s3020_s29 = sphi %s3101_s29, %s25_s29  }
   0x2   : > { %p355_p1 = scmp.lt.s32.totalorder %s3020_s29, 3  ;;  %s398_s17 = sshll.u32 %s3877_s11, 4  ;;  %s399_s17 = int_to_ptr.vmem [resolvable:$true] %s398_s17 }
   0x3   : > { %p2729_p3 = scmp.eq.s32.totalorder %s3107_s30, 0  ;;  %s2995_s19 = scalar_lea.vmem %s399_s17, 32 }
   0x4   : > { %p3114_p2 = pnand %p2455_p0, %p355_p1  ;;  %p2996_p6 = scmp.ne.s32.totalorder %s399_s17, %s2995_s19 }
   0x5   : > { %p3003_p10 = scmp.lt.s32.totalorder %s399_s17, %s399_s17  ;;  %p3004_p11 = scmp.lt.s32.totalorder %s2995_s19, %s2995_s19 }
   0x6   : > { %p2725_p4 = pneg %p3114_p2 }
   0x7   : > { %p3005_p12 = por %p3004_p11, %p3003_p10 }
   0x8   : > { %p2726_p5 = pnand %p2729_p3, %p2725_p4 }
   0xa   : > { %p2997_p7 = pneg %p2726_p5 }
   0xc   : > { %p2998_p8 = pnand %p2997_p7, %p2996_p6 }
   0xe   : > { %p2999_p9 = pneg %p2998_p8 }
  0x10   : > { %p3006_p13 = pnand %p3005_p12, %p2999_p9 }
  0x12   : > { %3009 = shalt.err (!%p3006_p13)
}
  0x13   : > { %s3022_s20 = smov [#allocation4]   ;;  %425 = sbr.rel (%p3114_p2) target bundleno = 3091 (0xc13), region = 76 }
  0x14   : > { %2728 = dma.vmem_to_smem (!%p2726_p5), %s399_s17, 32, %s3022_s20, [#allocation5]  }
  0x18   : > { %3015 = dma.done.wait (%p2729_p3), [#allocation5], 32  }
  0x19   : > { %3017 = vsyncadd (%p2729_p3), [#allocation5], 4294967264 }
  0x1a   : > { %431 = sfence }
  0x1b   : > { %v500_v0 = vld [vmem:[%s3867_s1] sm:$0x3]  ;;  %vm521_vm0 = vcmask 1041408   ;;  %p472_p0 = scmp.lt.s32.totalorder %s3107_s30, 1  ;;  %vm508_vm1 = vcmask 31744   ;;  %vm483_vm2 = vcmask 261120  }
  0x1c   : > { %2720 = vmatprep.subr.msk.bf16.mxu0 %vm521_vm0, %v500_v0  ;;  %v523_v1 = vsel %vm521_vm0, %v500_v0, 0  ;;  %v3023_v14 = vmov 0.0   ;;  %v2903_v15 = vld [vmem:[%s3869_s3 + $0x28] sm:$0xff]   ;;  %v2464_v16 = vld [vmem:[%s3868_s2] ss:$0 sm:$0xff]  ;;  %v2905_v34 = vld [vmem:[%s3869_s3 + $0x18] sm:$0xff]  }
  0x1d   : > { %2615 = vmatpush3.bf16.msra.mxu0 %v523_v1  ;;  %s3883_s30 = smov (!%p472_p0, %s3107_s30), 1  ;;  %485 = vst.msk [vmem:[#allocation2 + $0x8] sm:$0xff] %vm483_vm2, %v3023_v14  ;;  %486 = vst.msk [vmem:[#allocation3] sm:$0xff] %vm483_vm2, %v3023_v14  ;;  %2624 = vmatprep.subr.bf16.mxu1 %v2903_v15  ;;  %v2904_v27 = vld [vmem:[%s3869_s3 + $0x20] sm:$0xff]   ;;  %vm631_vm3 = vcmask 1046528   ;;  %v2906_v45 = vld [vmem:[%s3869_s3 + $0x10] sm:$0xff]  }
  0x1e   : > { %s2561_s23 = sshll.u32 %s3883_s30, 6  ;;  %487 = vst.msk [vmem:[#allocation3 + $0x8] sm:$0xff] %vm483_vm2, %v3023_v14  ;;  %2625 = vmatpush3.bf16.msra.mxu1 %v2903_v15  ;;  %vm676_vm4 = vcmask 1045504   ;;  %v2907_v55 = vld [vmem:[%s3869_s3 + $0x8] sm:$0xff]   ;;  %s3025_s27 = smov 32   ;;  %vm728_vm5 = vcmask 523264  }
  0x1f   : > { %s476_s26 = scalar_lea.vmem %s3866_s0, %s2561_s23  ;;  %2626 = vmatprep.subr.bf16.mxu1 %v2904_v27  ;;  %vm754_vm6 = vcmask 1044480   ;;  %vm800_vm7 = vcmask 785408   ;;  %vm1104_vm8 = vcmask 1043456   ;;  %s1444_s20 = sld [smem:[#allocation4]] }
  0x20   : > { %v488_v2 = vld [vmem:[%s476_s26] sm:$0xff]  ;;  %v489_v3 = vld [vmem:[%s476_s26 + $0x8] sm:$0xff]  ;;  %v490_v4 = vld [vmem:[%s476_s26 + $0x10] sm:$0xff]  ;;  %s481_s16 = scalar_lea.vmem %s3880_s14, %s2561_s23 }
  0x21   : > { %v496_v5 = vpack.c.bf16 %v489_v3, %v488_v2  ;;  %v491_v6 = vld [vmem:[%s476_s26 + $0x18] sm:$0xff]  ;;  %v492_v7 = vld [vmem:[%s476_s26 + $0x20] sm:$0xff]  ;;  %v493_v8 = vld [vmem:[%s476_s26 + $0x28] sm:$0xff] }
  0x22   : > { %v497_v9 = vpack.c.bf16 %v491_v6, %v490_v4  ;;  %v498_v10 = vpack.c.bf16 %v493_v8, %v492_v7  ;;  %v494_v11 = vld [vmem:[%s476_s26 + $0x30] sm:$0xff]  ;;  %v495_v12 = vld [vmem:[%s476_s26 + $0x38] sm:$0xff]  ;;  %2627 = vmatpush3.bf16.msra.mxu1 %v2904_v27  ;;  %s3024_s26 = smov 64   ;;  %v2908_v3 = vld [vmem:[%s3869_s3] sm:$0xff]  }
  0x23   : > { %2616 = vmatprep.mubr.msk.bf16.mxu0 %vm508_vm1, %v496_v5  ;;  %v499_v13 = vpack.c.bf16 %v495_v12, %v494_v11  ;;  %2628 = vmatprep.subr.bf16.mxu1 %v2905_v34 }
  0x24   : > { %2617 = vmatmul.mubr.msk.bf16.vlgmr.msra.gmra.mxu0 %vm508_vm1, %v497_v9  ;;  %v3161_v32 = vld [vmem:[#allocation2 + $0x8] sm:$0xff] }
  0x25   : > { %2620 = vmatprep.mubr.msk.bf16.mxu0 %vm508_vm1, %v498_v10  ;;  %v632_v37 = vrot.slane %v3161_v32, 1 }
  0x26   : > { %2629 = vmatpush3.bf16.msra.mxu1 %v2905_v34 }
  0x27   : > { %2630 = vmatprep.subr.bf16.mxu1 %v2906_v45 }
  0x2a   : > { %2631 = vmatpush3.bf16.msra.mxu1 %v2906_v45 }
  0x2b   : > { %2632 = vmatprep.subr.bf16.mxu1 %v2907_v55 }
  0x2c   : > { %2621 = vmatmul.mubr.msk.bf16.gmra.mxu0 %vm508_vm1, %v499_v13 }
  0x2e   : > { %2633 = vmatpush3.bf16.msra.mxu1 %v2907_v55 }
  0x2f   : > { %2634 = vmatprep.subr.bf16.mxu1 %v2908_v3 }
  0x32   : > { %2635 = vmatpush3.bf16.msra.mxu1 %v2908_v3 }
  0xe4   : > { %v2618_v17 = vpop.f32.mrf.mxu0 }
  0xe5   : > { %v568_v18 = vadd.f32 %v2618_v17, %v2464_v16 }
  0xe6   : > { %v559_v19 = vpop.f32.mrf.mxu0 }
  0xe7   : > { %592 = vst.msk [vmem:[#allocation2 + $0x20] sm:$0xff] %vm483_vm2, %v568_v18  ;;  %v560_v20 = vadd.f32 %v2464_v16, %v559_v19 }
  0xe8   : > { %v2619_v21 = vpop.f32.mrf.mxu0 }
  0xe9   : > { %590 = vst.msk [vmem:[#allocation2 + $0x10] sm:$0xff] %vm483_vm2, %v560_v20  ;;  %v571_v22 = vadd.f32 %v2619_v21, %v2464_v16 }
  0xea   : > { %v562_v23 = vpop.f32.mrf.mxu0 }
  0xeb   : > { %593 = vst.msk [vmem:[#allocation2 + $0x28] sm:$0xff] %vm483_vm2, %v571_v22  ;;  %v563_v24 = vadd.f32 %v2464_v16, %v562_v23 }
  0xec   : > { %v2622_v25 = vpop.f32.mrf.mxu0 }
  0xed   : > { %591 = vst.msk [vmem:[#allocation2 + $0x18] sm:$0xff] %vm483_vm2, %v563_v24  ;;  %v584_v26 = vadd.f32 %v2622_v25, %v2464_v16 }
  0xee   : > { %v575_v28 = vpop.f32.mrf.mxu0  ;;  %v3170_v39 = vld [vmem:[#allocation2 + $0x20] sm:$0xff] }
  0xef   : > { %596 = vst.msk [vmem:[#allocation2 + $0x40] sm:$0xff] %vm483_vm2, %v584_v26  ;;  %v576_v29 = vadd.f32 %v2464_v16, %v575_v28  ;;  %v637_v46 = vrot.slane %v3170_v39, 1  ;;  %v680_v59 = vrot.slane %v3170_v39, 2 }
  0xf0   : > { %v2623_v30 = vpop.f32.mrf.mxu0  ;;  %v3159_v31 = vld [vmem:[#allocation2 + $0x10] sm:$0xff] }
  0xf1   : > { %594 = vst.msk [vmem:[#allocation2 + $0x30] sm:$0xff] %vm483_vm2, %v576_v29  ;;  %v587_v33 = vadd.f32 %v2623_v30, %v2464_v16  ;;  %v633_v38 = vrot.slane %v3159_v31, 1  ;;  %v677_v42 = vrot.slane %v3159_v31, 2 }
  0xf2   : > { %v578_v35 = vpop.f32.mrf.mxu0  ;;  %v3174_v41 = vld [vmem:[#allocation2 + $0x28] sm:$0xff] }
  0xf3   : > { %597 = vst.msk [vmem:[#allocation2 + $0x48] sm:$0xff] %vm483_vm2, %v587_v33  ;;  %v579_v36 = vadd.f32 %v2464_v16, %v578_v35  ;;  %v634_v48 = vsel %vm631_vm3, %v632_v37, %v633_v38  ;;  %v639_v50 = vrot.slane %v3174_v41, 1  ;;  %v682_v56 = vrot.slane %v3174_v41, 2 }
  0xf4   : > { %v3172_v40 = vld [vmem:[#allocation2 + $0x18] sm:$0xff] }
  0xf5   : > { %595 = vst.msk [vmem:[#allocation2 + $0x38] sm:$0xff] %vm483_vm2, %v579_v36  ;;  %v678_v43 = vrot.slane %v3172_v40, 2  ;;  %v635_v44 = vrot.slane %v3172_v40, 1  ;;  %v640_v57 = vsel %vm631_vm3, %v637_v46, %v639_v50  ;;  %v683_v4 = vsel %vm676_vm4, %v680_v59, %v682_v56 }
  0xf6   : > { %v3202_v62 = vld [vmem:[#allocation2 + $0x40] sm:$0xff] }
  0xf7   : > { %v679_v47 = vsel %vm676_vm4, %v677_v42, %v678_v43  ;;  %v636_v49 = vsel %vm631_vm3, %v633_v38, %v635_v44  ;;  %v638_v54 = vsel %vm631_vm3, %v635_v44, %v637_v46  ;;  %v681_v1 = vsel %vm676_vm4, %v678_v43, %v680_v59 }
  0xf8   : > { %v2753_v51 = vpack.i.bf16 %v679_v47, %v677_v42  ;;  %v2743_v52 = vpack.i.bf16 %v636_v49, %v634_v48  ;;  %v3188_v53 = vld [vmem:[#allocation2 + $0x30] sm:$0xff]  ;;  %v2748_v60 = vpack.i.bf16 %v640_v57, %v638_v54  ;;  %v645_v8 = vrot.slane %v3202_v62, 1 }
  0xf9   : > { %v641_v58 = vrot.slane %v3188_v53, 1  ;;  %v684_v5 = vrot.slane %v3188_v53, 2  ;;  %v2758_v11 = vpack.i.bf16 %v683_v4, %v681_v1  ;;  %v688_v16 = vrot.slane %v3202_v62, 2 }
  0xfa   : > { %2754 = vrot.lane.b32.xlu1 %v2753_v51, %s3024_s26  ;;  %2744 = vrot.lane.b32.xlu0 %v2743_v52, %s3025_s27  ;;  %v3204_v63 = vld [vmem:[#allocation2 + $0x48] sm:$0xff] }
  0xfb   : > { %v642_v6 = vsel %vm631_vm3, %v639_v50, %v641_v58  ;;  %v647_v9 = vrot.slane %v3204_v63, 1  ;;  %v685_v14 = vsel %vm676_vm4, %v682_v56, %v684_v5  ;;  %v690_v17 = vrot.slane %v3204_v63, 2 }
  0xfc   : > { %v3200_v61 = vld [vmem:[#allocation2 + $0x38] sm:$0xff] }
  0xfd   : > { %v643_v0 = vrot.slane %v3200_v61, 1  ;;  %v686_v2 = vrot.slane %v3200_v61, 2  ;;  %v648_v15 = vsel %vm631_vm3, %v645_v8, %v647_v9  ;;  %v691_v21 = vsel %vm676_vm4, %v688_v16, %v690_v17 }
  0xfe   : > { %2749 = vrot.lane.b32.xlu0 %v2748_v60, %s3025_s27 }
  0xff   : > { %v644_v7 = vsel %vm631_vm3, %v641_v58, %v643_v0  ;;  %v687_v12 = vsel %vm676_vm4, %v684_v5, %v686_v2  ;;  %v646_v13 = vsel %vm631_vm3, %v643_v0, %v645_v8  ;;  %v689_v20 = vsel %vm676_vm4, %v686_v2, %v688_v16 }
 0x100   : > { %v2763_v10 = vpack.i.bf16 %v644_v7, %v642_v6  ;;  %v2768_v18 = vpack.i.bf16 %v687_v12, %v685_v14  ;;  %v2773_v19 = vpack.i.bf16 %v648_v15, %v646_v13  ;;  %v2778_v22 = vpack.i.bf16 %v691_v21, %v689_v20 }
 0x102   : > { %2764 = vrot.lane.b32.xlu1 %v2763_v10, %s3025_s27  ;;  %2759 = vrot.lane.b32.xlu0 %v2758_v11, %s3024_s26 }
 0x106   : > { %2769 = vrot.lane.b32.xlu1 %v2768_v18, %s3024_s26  ;;  %2774 = vrot.lane.b32.xlu0 %v2773_v19, %s3025_s27 }
 0x10a   : > { %665 = vrot.lane.b32.xlu1 %v647_v9, %s3025_s27  ;;  %2779 = vrot.lane.b32.xlu0 %v2778_v22, %s3024_s26 }
 0x10e   : > { %708 = vrot.lane.b32.xlu1 %v690_v17, %s3024_s26 }
 0x16c   : > { %v2755_v23 = vpop.permute.xlu1 %2754  ;;  %v2745_v24 = vpop.permute.xlu0 %2744 }
 0x16d   : > { %v2747_v25 = vunpack.i.h.bf16 %v2745_v24  ;;  %v2746_v26 = vunpack.i.l.bf16 %v2745_v24  ;;  %v2757_v27 = vunpack.i.h.bf16 %v2755_v23  ;;  %v2756_v28 = vunpack.i.l.bf16 %v2755_v23 }
 0x16f   : > { %v720_v29 = vsel %vm483_vm2, %v3159_v31, %v2747_v25  ;;  %v719_v30 = vsel %vm483_vm2, %v3161_v32, %v2746_v26 }
 0x170   : > { %v2750_v33 = vpop.permute.xlu0 %2749  ;;  %v729_v36 = vsel %vm728_vm5, %v719_v30, %v2756_v28  ;;  %v730_v37 = vsel %vm728_vm5, %v720_v29, %v2757_v27 }
 0x171   : > { %v2752_v34 = vunpack.i.h.bf16 %v2750_v33  ;;  %v2751_v35 = vunpack.i.l.bf16 %v2750_v33  ;;  %v738_v46 = vpack.c.bf16 %v730_v37, %v729_v36 }
 0x173   : > { %v722_v31 = vsel %vm483_vm2, %v3170_v39, %v2752_v34  ;;  %v721_v32 = vsel %vm483_vm2, %v3172_v40, %v2751_v35  ;;  %v755_v57 = vrot.slane %v738_v46, 3 }
 0x174   : > { %v2765_v38 = vpop.permute.xlu1 %2764  ;;  %v2760_v42 = vpop.permute.xlu0 %2759 }
 0x175   : > { %v2767_v43 = vunpack.i.h.bf16 %v2765_v38  ;;  %v2762_v44 = vunpack.i.h.bf16 %v2760_v42  ;;  %v2761_v45 = vunpack.i.l.bf16 %v2760_v42  ;;  %v2766_v47 = vunpack.i.l.bf16 %v2765_v38 }
 0x177   : > { %v731_v48 = vsel %vm728_vm5, %v721_v32, %v2761_v45  ;;  %v732_v49 = vsel %vm728_vm5, %v722_v31, %v2762_v44  ;;  %v724_v54 = vsel %vm483_vm2, %v3188_v53, %v2767_v43  ;;  %v723_v39 = vsel %vm483_vm2, %v3174_v41, %v2766_v47 }
 0x178   : > { %v2770_v50 = vpop.permute.xlu1 %2769  ;;  %v2775_v51 = vpop.permute.xlu0 %2774  ;;  %v739_v52 = vpack.c.bf16 %v732_v49, %v731_v48 }
 0x179   : > { %v2772_v55 = vunpack.i.h.bf16 %v2770_v50  ;;  %v2771_v56 = vunpack.i.l.bf16 %v2770_v50  ;;  %v2777_v40 = vunpack.i.h.bf16 %v2775_v51  ;;  %v2776_v58 = vunpack.i.l.bf16 %v2775_v51 }
 0x17a   : > { %v756_v59 = vrot.slane %v739_v52, 3 }
 0x17b   : > { %v733_v60 = vsel %vm728_vm5, %v723_v39, %v2771_v56  ;;  %v734_v0 = vsel %vm728_vm5, %v724_v54, %v2772_v55  ;;  %v726_v41 = vsel %vm483_vm2, %v3202_v62, %v2777_v40  ;;  %v725_v7 = vsel %vm483_vm2, %v3200_v61, %v2776_v58 }
 0x17c   : > { %v740_v1 = vpack.c.bf16 %v734_v0, %v733_v60  ;;  %v666_v2 = vpop.permute.xlu1 %665  ;;  %v2780_v3 = vpop.permute.xlu0 %2779  ;;  %v757_v4 = vsel %vm754_vm6, %v755_v57, %v756_v59 }
 0x17d   : > { %v2782_v5 = vunpack.i.h.bf16 %v2780_v3  ;;  %v2781_v53 = vunpack.i.l.bf16 %v2780_v3  ;;  %2636 = vmatprep.mubr.msk.bf16.mxu1 %vm800_vm7, %v757_v4  ;;  %v727_v10 = vsel %vm483_vm2, %v3204_v63, %v666_v2  ;;  %v2469_v63 = vld [vmem:[%s3870_s4] ss:$0 sm:$0xff] }
 0x17e   : > { %v758_v6 = vrot.slane %v740_v1, 3 }
 0x17f   : > { %v735_v8 = vsel %vm728_vm5, %v725_v7, %v2781_v53  ;;  %v736_v9 = vsel %vm728_vm5, %v726_v41, %v2782_v5 }
 0x180   : > { %v741_v11 = vpack.c.bf16 %v736_v9, %v735_v8  ;;  %v709_v12 = vpop.permute.xlu1 %708  ;;  %v759_v13 = vsel %vm754_vm6, %v756_v59, %v758_v6 }
 0x181   : > { %v737_v14 = vsel %vm728_vm5, %v727_v10, %v709_v12  ;;  %2637 = vmatmul.mubr.msk.bf16.vlgmr.msra.gmra.mxu1 %vm800_vm7, %v759_v13 }
 0x182   : > { %v760_v15 = vrot.slane %v741_v11, 3  ;;  %v742_v62 = vpack.c.bf16 %v737_v14, %v737_v14 }
 0x184   : > { %v762_v16 = vrot.slane %v742_v62, 3  ;;  %v761_v61 = vsel %vm754_vm6, %v758_v6, %v760_v15 }
 0x185   : > { %2640 = vmatprep.mubr.msk.bf16.mxu1 %vm800_vm7, %v761_v61 }
 0x186   : > { %v763_v17 = vsel %vm754_vm6, %v760_v15, %v762_v16 }
 0x189   : > { %2641 = vmatmul.mubr.msk.bf16.gmra.mxu1 %vm800_vm7, %v763_v17 }
 0x241   : > { %v2638_v18 = vpop.f32.mrf.mxu1 }
 0x242   : > { %v856_v19 = vadd.f32 %v2638_v18, %v2469_v63  ;;  %v2909_v18 = vld [vmem:[%s3873_s7 + $0x28] sm:$0xff]  }
 0x243   : > { %v847_v20 = vpop.f32.mrf.mxu1  ;;  %2644 = vmatprep.subr.bf16.mxu0 %v2909_v18 }
 0x244   : > { %v848_v21 = vadd.f32 %v2469_v63, %v847_v20  ;;  %v884_v22 = vsel %vm483_vm2, %v856_v19, 0.0  ;;  %2645 = vmatpush3.bf16.msra.mxu0 %v2909_v18 }
 0x245   : > { %885 = vadd.xlane.f32.xlu0 %v884_v22  ;;  %v2639_v23 = vpop.f32.mrf.mxu1 }
 0x246   : > { %v859_v25 = vadd.f32 %v2639_v23, %v2469_v63  ;;  %v878_v27 = vsel %vm483_vm2, %v848_v21, 0.0 }
 0x247   : > { %v850_v24 = vpop.f32.mrf.mxu1 }
 0x248   : > { %v851_v26 = vadd.f32 %v2469_v63, %v850_v24  ;;  %v887_v34 = vsel %vm483_vm2, %v859_v25, 0.0 }
 0x249   : > { %v2642_v28 = vpop.f32.mrf.mxu1  ;;  %879 = vadd.xlane.f32.xlu0 %v878_v27 }
 0x24a   : > { %v881_v29 = vsel %vm483_vm2, %v851_v26, 0.0  ;;  %v872_v36 = vadd.f32 %v2642_v28, %v2469_v63 }
 0x24b   : > { %v863_v30 = vpop.f32.mrf.mxu1  ;;  %882 = vadd.xlane.f32.xlu1 %v881_v29 }
 0x24c   : > { %v864_v33 = vadd.f32 %v2469_v63, %v863_v30  ;;  %v896_v44 = vsel %vm483_vm2, %v872_v36, 0.0 }
 0x24d   : > { %v2643_v35 = vpop.f32.mrf.mxu1  ;;  %888 = vadd.xlane.f32.xlu0 %v887_v34 }
 0x24e   : > { %v890_v37 = vsel %vm483_vm2, %v864_v33, 0.0  ;;  %v875_v43 = vadd.f32 %v2643_v35, %v2469_v63 }
 0x24f   : > { %v866_v38 = vpop.f32.mrf.mxu1  ;;  %891 = vadd.xlane.f32.xlu1 %v890_v37 }
 0x250   : > { %v867_v42 = vadd.f32 %v2469_v63, %v866_v38  ;;  %v899_v46 = vsel %vm483_vm2, %v875_v43, 0.0 }
 0x252   : > { %v893_v45 = vsel %vm483_vm2, %v867_v42, 0.0 }
 0x253   : > { %897 = vadd.xlane.f32.xlu1 %v896_v44  ;;  %894 = vadd.xlane.f32.xlu0 %v893_v45  ;;  %v2480_v45 = vld [vmem:[%s3871_s5] ss:$0 sm:$0xff] }
 0x257   : > { %900 = vadd.xlane.f32.xlu0 %v899_v46 }
 0x2ce   : > { %v886_v31 = vpop.xlane.xlu0 %885 }
 0x2cf   : > { %v905_v32 = vmul.f32 0.03125, %v886_v31 }
 0x2d1   : > { %v3280_v47 = vsub.f32 %v856_v19, %v905_v32  ;;  %v2481_v32 = vld [vmem:[%s3872_s6] ss:$0 sm:$0xff] }
 0x2d2   : > { %v880_v48 = vpop.xlane.xlu0 %879 }
 0x2d3   : > { %v903_v49 = vmul.f32 0.03125, %v880_v48  ;;  %v921_v50 = vmul.f32 %v3280_v47, %v3280_v47 }
 0x2d4   : > { %v883_v51 = vpop.xlane.xlu1 %882 }
 0x2d5   : > { %v3284_v52 = vsub.f32 %v848_v21, %v903_v49  ;;  %v904_v54 = vmul.f32 0.03125, %v883_v51  ;;  %v933_v55 = vsel %vm483_vm2, %v921_v50, 0.0 }
 0x2d6   : > { %934 = vadd.xlane.f32.xlu1 %v933_v55  ;;  %v889_v56 = vpop.xlane.xlu0 %888 }
 0x2d7   : > { %v906_v57 = vmul.f32 0.03125, %v889_v56  ;;  %v919_v39 = vmul.f32 %v3284_v52, %v3284_v52  ;;  %v3289_v40 = vsub.f32 %v851_v26, %v904_v54 }
 0x2d8   : > { %v892_v58 = vpop.xlane.xlu1 %891 }
 0x2d9   : > { %v3291_v59 = vsub.f32 %v859_v25, %v906_v57  ;;  %v907_v60 = vmul.f32 0.03125, %v892_v58  ;;  %v927_v0 = vsel %vm483_vm2, %v919_v39, 0.0  ;;  %v920_v5 = vmul.f32 %v3289_v40, %v3289_v40 }
 0x2da   : > { %928 = vadd.xlane.f32.xlu1 %v927_v0 }
 0x2db   : > { %v3294_v1 = vsub.f32 %v864_v33, %v907_v60  ;;  %v922_v2 = vmul.f32 %v3291_v59, %v3291_v59  ;;  %v930_v13 = vsel %vm483_vm2, %v920_v5, 0.0 }
 0x2dc   : > { %v898_v3 = vpop.xlane.xlu1 %897  ;;  %v895_v4 = vpop.xlane.xlu0 %894 }
 0x2dd   : > { %v909_v53 = vmul.f32 0.03125, %v898_v3  ;;  %v908_v6 = vmul.f32 0.03125, %v895_v4  ;;  %v936_v41 = vsel %vm483_vm2, %v922_v2, 0.0  ;;  %v923_v7 = vmul.f32 %v3294_v1, %v3294_v1 }
 0x2de   : > { %937 = vadd.xlane.f32.xlu0 %v936_v41 }
 0x2df   : > { %v3303_v8 = vsub.f32 %v872_v36, %v909_v53  ;;  %v3305_v9 = vsub.f32 %v867_v42, %v908_v6  ;;  %v939_v10 = vsel %vm483_vm2, %v923_v7, 0.0 }
 0x2e0   : > { %940 = vadd.xlane.f32.xlu1 %v939_v10  ;;  %v901_v11 = vpop.xlane.xlu0 %900 }
 0x2e1   : > { %v910_v12 = vmul.f32 0.03125, %v901_v11  ;;  %v925_v14 = vmul.f32 %v3303_v8, %v3303_v8  ;;  %v924_v15 = vmul.f32 %v3305_v9, %v3305_v9 }
 0x2e2   : > { %931 = vadd.xlane.f32.xlu0 %v930_v13 }
 0x2e3   : > { %v3313_v62 = vsub.f32 %v875_v43, %v910_v12  ;;  %v945_v16 = vsel %vm483_vm2, %v925_v14, 0.0  ;;  %v942_v61 = vsel %vm483_vm2, %v924_v15, 0.0 }
 0x2e4   : > { %946 = vadd.xlane.f32.xlu1 %v945_v16 }
 0x2e5   : > { %v926_v17 = vmul.f32 %v3313_v62, %v3313_v62 }
 0x2e6   : > { %943 = vadd.xlane.f32.xlu0 %v942_v61 }
 0x2e7   : > { %v948_v63 = vsel %vm483_vm2, %v926_v17, 0.0 }
 0x2ea   : > { %949 = vadd.xlane.f32.xlu0 %v948_v63 }
 0x35f   : > { %v935_v19 = vpop.xlane.xlu1 %934 }
 0x360   : > { %v953_v20 = vmul.f32 0.03125, %v935_v19  ;;  %v2910_v19 = vld [vmem:[%s3873_s7 + $0x20] sm:$0xff]  }
 0x361   : > { %2646 = vmatprep.subr.bf16.mxu0 %v2910_v19 }
 0x362   : > { %v961_v21 = vadd.f32 1e-08, %v953_v20  ;;  %2647 = vmatpush3.bf16.msra.mxu0 %v2910_v19 }
 0x363   : > { %v929_v22 = vpop.xlane.xlu1 %928 }
 0x364   : > { %2929 = vrsqrt.f32 %v961_v21  ;;  %v951_v23 = vmul.f32 0.03125, %v929_v22  ;;  %v3346_v21 = vld [vmem:[#allocation3 + $0x8] sm:$0xff] }
 0x366   : > { %v959_v24 = vadd.f32 1e-08, %v951_v23 }
 0x367   : > { %v938_v25 = vpop.xlane.xlu0 %937 }
 0x368   : > { %2931 = vrsqrt.f32 %v959_v24  ;;  %v954_v26 = vmul.f32 0.03125, %v938_v25 }
 0x369   : > { %v941_v27 = vpop.xlane.xlu1 %940 }
 0x36a   : > { %v962_v28 = vadd.f32 1e-08, %v954_v26  ;;  %v955_v29 = vmul.f32 0.03125, %v941_v27  ;;  %v1060_v26 = vrot.slane %v3346_v21, 2 }
 0x36b   : > { %v932_v30 = vpop.xlane.xlu0 %931 }
 0x36c   : > { %2933 = vrsqrt.f32 %v962_v28  ;;  %v963_v33 = vadd.f32 1e-08, %v955_v29  ;;  %v952_v34 = vmul.f32 0.03125, %v932_v30 }
 0x36d   : > { %v947_v35 = vpop.xlane.xlu1 %946 }
 0x36e   : > { %2935 = vrsqrt.f32 %v963_v33  ;;  %v960_v36 = vadd.f32 1e-08, %v952_v34  ;;  %v957_v37 = vmul.f32 0.03125, %v947_v35 }
 0x36f   : > { %v944_v38 = vpop.xlane.xlu0 %943 }
 0x370   : > { %2937 = vrsqrt.f32 %v960_v36  ;;  %v965_v42 = vadd.f32 1e-08, %v957_v37  ;;  %v956_v43 = vmul.f32 0.03125, %v944_v38  ;;  %v2912_v36 = vld [vmem:[%s3873_s7 + $0x10] sm:$0xff]  }
 0x371   : > { %v2930_v44 = vpop.eup %2929 }
 0x372   : > { %v977_v46 = vmul.f32 %v2930_v44, %v3280_v47  ;;  %2939 = vrsqrt.f32 %v965_v42  ;;  %v964_v31 = vadd.f32 1e-08, %v956_v43 }
 0x373   : > { %v950_v48 = vpop.xlane.xlu0 %949 }
 0x374   : > { %v991_v49 = vmul.f32 %v2480_v45, %v977_v46  ;;  %2941 = vrsqrt.f32 %v964_v31  ;;  %v958_v50 = vmul.f32 0.03125, %v950_v48 }
 0x375   : > { %v2932_v51 = vpop.eup %2931 }
 0x376   : > { %v1005_v54 = vadd.f32 %v2481_v32, %v991_v49  ;;  %v975_v55 = vmul.f32 %v2932_v51, %v3284_v52  ;;  %v966_v56 = vadd.f32 1e-08, %v958_v50 }
 0x378   : > { %v1013_v57 = vmax.f32 %v1005_v54, 0.0  ;;  %v989_v39 = vmul.f32 %v2480_v45, %v975_v55  ;;  %2943 = vrsqrt.f32 %v966_v56  ;;  %v2913_v56 = vld [vmem:[%s3873_s7 + $0x8] sm:$0xff]  }
 0x379   : > { %v2934_v58 = vpop.eup %2933 }
 0x37a   : > { %1021 = vst.msk [vmem:[#allocation3 + $0x20] sm:$0xff] %vm483_vm2, %v1013_v57  ;;  %v1003_v47 = vadd.f32 %v2481_v32, %v989_v39  ;;  %v978_v60 = vmul.f32 %v2934_v58, %v3291_v59 }
 0x37b   : > { %v2936_v0 = vpop.eup %2935 }
 0x37c   : > { %v1011_v2 = vmax.f32 %v1003_v47, 0.0  ;;  %v992_v3 = vmul.f32 %v2480_v45, %v978_v60  ;;  %v979_v4 = vmul.f32 %v2936_v0, %v3294_v1 }
 0x37d   : > { %v2938_v5 = vpop.eup %2937 }
 0x37e   : > { %1019 = vst.msk [vmem:[#allocation3 + $0x10] sm:$0xff] %vm483_vm2, %v1011_v2  ;;  %v1006_v53 = vadd.f32 %v2481_v32, %v992_v3  ;;  %v993_v52 = vmul.f32 %v2480_v45, %v979_v4  ;;  %v976_v6 = vmul.f32 %v2938_v5, %v3289_v40 }
 0x37f   : > { %v2940_v41 = vpop.eup %2939 }
 0x380   : > { %v1014_v7 = vmax.f32 %v1006_v53, 0.0  ;;  %v1007_v10 = vadd.f32 %v2481_v32, %v993_v52  ;;  %v990_v11 = vmul.f32 %v2480_v45, %v976_v6  ;;  %v981_v12 = vmul.f32 %v2940_v41, %v3303_v8  ;;  %v2914_v53 = vld [vmem:[%s3873_s7] sm:$0xff]  }
 0x381   : > { %v2942_v13 = vpop.eup %2941  ;;  %v3356_v25 = vld [vmem:[#allocation3 + $0x20] sm:$0xff] }
 0x382   : > { %1022 = vst.msk [vmem:[#allocation3 + $0x28] sm:$0xff] %vm483_vm2, %v1014_v7  ;;  %v1015_v59 = vmax.f32 %v1007_v10, 0.0  ;;  %v1004_v14 = vadd.f32 %v2481_v32, %v990_v11  ;;  %v995_v15 = vmul.f32 %v2480_v45, %v981_v12  ;;  %v980_v1 = vmul.f32 %v2942_v13, %v3305_v9 }
 0x383   : > { %v1065_v34 = vrot.slane %v3356_v25, 2  ;;  %v1108_v38 = vrot.slane %v3356_v25, 4 }
 0x384   : > { %1023 = vst.msk [vmem:[#allocation3 + $0x30] sm:$0xff] %vm483_vm2, %v1015_v59  ;;  %v1012_v16 = vmax.f32 %v1004_v14, 0.0  ;;  %v1009_v61 = vadd.f32 %v2481_v32, %v995_v15  ;;  %v994_v17 = vmul.f32 %v2480_v45, %v980_v1 }
 0x385   : > { %v2944_v40 = vpop.eup %2943  ;;  %v3348_v22 = vld [vmem:[#allocation3 + $0x10] sm:$0xff] }
 0x386   : > { %1020 = vst.msk [vmem:[#allocation3 + $0x18] sm:$0xff] %vm483_vm2, %v1012_v16  ;;  %v1017_v63 = vmax.f32 %v1009_v61, 0.0  ;;  %v1008_v18 = vadd.f32 %v2481_v32, %v994_v17  ;;  %v982_v8 = vmul.f32 %v2944_v40, %v3313_v62  ;;  %v2911_v62 = vld [vmem:[%s3873_s7 + $0x18] sm:$0xff]   ;;  %v1061_v27 = vrot.slane %v3348_v22, 2 }
 0x387   : > { %2648 = vmatprep.subr.bf16.mxu0 %v2911_v62  ;;  %v1105_v42 = vrot.slane %v3348_v22, 4 }
 0x388   : > { %1025 = vst.msk [vmem:[#allocation3 + $0x40] sm:$0xff] %vm483_vm2, %v1017_v63  ;;  %v1016_v20 = vmax.f32 %v1008_v18, 0.0  ;;  %v996_v9 = vmul.f32 %v2480_v45, %v982_v8  ;;  %2649 = vmatpush3.bf16.msra.mxu0 %v2911_v62  ;;  %v1062_v37 = vsel %vm676_vm4, %v1060_v26, %v1061_v27 }
 0x389   : > { %v3350_v23 = vld [vmem:[#allocation3 + $0x28] sm:$0xff]  ;;  %2650 = vmatprep.subr.bf16.mxu0 %v2912_v36 }
 0x38a   : > { %1024 = vst.msk [vmem:[#allocation3 + $0x38] sm:$0xff] %vm483_vm2, %v1016_v20  ;;  %v1010_v24 = vadd.f32 %v2481_v32, %v996_v9  ;;  %v1067_v29 = vrot.slane %v3350_v23, 2  ;;  %v1110_v46 = vrot.slane %v3350_v23, 4 }
 0x38b   : > { %v3377_v48 = vld [vmem:[#allocation3 + $0x30] sm:$0xff] }
 0x38c   : > { %v1018_v28 = vmax.f32 %v1010_v24, 0.0  ;;  %v1068_v44 = vsel %vm676_vm4, %v1065_v34, %v1067_v29  ;;  %2651 = vmatpush3.bf16.msra.mxu0 %v2912_v36  ;;  %v1111_v57 = vsel %vm1104_vm8, %v1108_v38, %v1110_v46  ;;  %v1069_v39 = vrot.slane %v3377_v48, 2 }
 0x38d   : > { %v3361_v30 = vld [vmem:[#allocation3 + $0x18] sm:$0xff]  ;;  %2652 = vmatprep.subr.bf16.mxu0 %v2913_v56  ;;  %v1112_v52 = vrot.slane %v3377_v48, 4 }
 0x38e   : > { %1026 = vst.msk [vmem:[#allocation3 + $0x48] sm:$0xff] %vm483_vm2, %v1018_v28  ;;  %v1063_v33 = vrot.slane %v3361_v30, 2  ;;  %v1106_v35 = vrot.slane %v3361_v30, 4  ;;  %v1070_v6 = vsel %vm676_vm4, %v1067_v29, %v1069_v39 }
 0x38f   : > { %v3384_v55 = vld [vmem:[#allocation3 + $0x40] sm:$0xff]  ;;  %v1113_v14 = vsel %vm1104_vm8, %v1110_v46, %v1112_v52 }
 0x390   : > { %v1066_v43 = vsel %vm676_vm4, %v1063_v33, %v1065_v34  ;;  %v1064_v45 = vsel %vm676_vm4, %v1061_v27, %v1063_v33  ;;  %v1109_v50 = vsel %vm1104_vm8, %v1106_v35, %v1108_v38  ;;  %v1107_v51 = vsel %vm1104_vm8, %v1105_v42, %v1106_v35  ;;  %2653 = vmatpush3.bf16.msra.mxu0 %v2913_v56 }
 0x391   : > { %v2788_v31 = vpack.i.bf16 %v1068_v44, %v1066_v43  ;;  %v2783_v32 = vpack.i.bf16 %v1064_v45, %v1062_v37  ;;  %v3379_v49 = vld [vmem:[#allocation3 + $0x38] sm:$0xff]  ;;  %v2798_v58 = vpack.i.bf16 %v1111_v57, %v1109_v50  ;;  %v2793_v47 = vpack.i.bf16 %v1107_v51, %v1105_v42  ;;  %2654 = vmatprep.subr.bf16.mxu0 %v2914_v53 }
 0x392   : > { %v1071_v54 = vrot.slane %v3379_v49, 2  ;;  %v1073_v0 = vrot.slane %v3384_v55, 2  ;;  %v1114_v4 = vrot.slane %v3379_v49, 4  ;;  %v1116_v10 = vrot.slane %v3384_v55, 4 }
 0x393   : > { %2789 = vrot.lane.b32.xlu0 %v2788_v31, %s3025_s27  ;;  %2784 = vrot.lane.b32.xlu1 %v2783_v32, %s3025_s27 }
 0x394   : > { %v1072_v2 = vsel %vm676_vm4, %v1069_v39, %v1071_v54  ;;  %v1074_v41 = vsel %vm676_vm4, %v1071_v54, %v1073_v0  ;;  %2655 = vmatpush3.bf16.msra.mxu0 %v2914_v53  ;;  %v1115_v13 = vsel %vm1104_vm8, %v1112_v52, %v1114_v4  ;;  %v1117_v15 = vsel %vm1104_vm8, %v1114_v4, %v1116_v10 }
 0x395   : > { %v3393_v60 = vld [vmem:[#allocation3 + $0x48] sm:$0xff]  ;;  %v2803_v11 = vpack.i.bf16 %v1072_v2, %v1070_v6  ;;  %v2808_v1 = vpack.i.bf16 %v1115_v13, %v1113_v14 }
 0x396   : > { %v1075_v3 = vrot.slane %v3393_v60, 2  ;;  %v1118_v5 = vrot.slane %v3393_v60, 4 }
 0x397   : > { %2799 = vrot.lane.b32.xlu0 %v2798_v58, %s3024_s26  ;;  %2794 = vrot.lane.b32.xlu1 %v2793_v47, %s3024_s26 }
 0x398   : > { %v1076_v7 = vsel %vm676_vm4, %v1073_v0, %v1075_v3  ;;  %v1119_v59 = vsel %vm1104_vm8, %v1116_v10, %v1118_v5 }
 0x399   : > { %v2813_v12 = vpack.i.bf16 %v1076_v7, %v1074_v41  ;;  %v2818_v16 = vpack.i.bf16 %v1119_v59, %v1117_v15 }
 0x39b   : > { %2804 = vrot.lane.b32.xlu1 %v2803_v11, %s3025_s27  ;;  %2814 = vrot.lane.b32.xlu0 %v2813_v12, %s3025_s27 }
 0x39f   : > { %2809 = vrot.lane.b32.xlu1 %v2808_v1, %s3024_s26  ;;  %2819 = vrot.lane.b32.xlu0 %v2818_v16, %s3024_s26 }
 0x3a3   : > { %1093 = vrot.lane.b32.xlu1 %v1075_v3, %s3025_s27 }
 0x3a7   : > { %1136 = vrot.lane.b32.xlu1 %v1118_v5, %s3024_s26 }
 0x405   : > { %v2785_v61 = vpop.permute.xlu1 %2784  ;;  %v2790_v17 = vpop.permute.xlu0 %2789 }
 0x406   : > { %v2787_v40 = vunpack.i.h.bf16 %v2785_v61  ;;  %v2786_v63 = vunpack.i.l.bf16 %v2785_v61  ;;  %v2792_v18 = vunpack.i.h.bf16 %v2790_v17  ;;  %v2791_v8 = vunpack.i.l.bf16 %v2790_v17 }
 0x408   : > { %v1148_v27 = vsel %vm483_vm2, %v3348_v22, %v2787_v40  ;;  %v1147_v28 = vsel %vm483_vm2, %v3346_v21, %v2786_v63  ;;  %v1150_v29 = vsel %vm483_vm2, %v3356_v25, %v2792_v18  ;;  %v1149_v33 = vsel %vm483_vm2, %v3361_v30, %v2791_v8 }
 0x409   : > { %v2795_v19 = vpop.permute.xlu1 %2794  ;;  %v2800_v20 = vpop.permute.xlu0 %2799 }
 0x40a   : > { %v2797_v9 = vunpack.i.h.bf16 %v2795_v19  ;;  %v2796_v24 = vunpack.i.l.bf16 %v2795_v19  ;;  %v2802_v62 = vunpack.i.h.bf16 %v2800_v20  ;;  %v2801_v26 = vunpack.i.l.bf16 %v2800_v20 }
 0x40c   : > { %v1156_v34 = vsel %vm728_vm5, %v1147_v28, %v2796_v24  ;;  %v1157_v35 = vsel %vm728_vm5, %v1148_v27, %v2797_v9  ;;  %v1158_v36 = vsel %vm728_vm5, %v1149_v33, %v2801_v26  ;;  %v1159_v37 = vsel %vm728_vm5, %v1150_v29, %v2802_v62 }
 0x40d   : > { %v1165_v38 = vpack.c.bf16 %v1157_v35, %v1156_v34  ;;  %v1166_v42 = vpack.c.bf16 %v1159_v37, %v1158_v36  ;;  %v2805_v22 = vpop.permute.xlu1 %2804  ;;  %v2815_v43 = vpop.permute.xlu0 %2814 }
 0x40e   : > { %v2807_v44 = vunpack.i.h.bf16 %v2805_v22  ;;  %v2806_v21 = vunpack.i.l.bf16 %v2805_v22  ;;  %v2817_v25 = vunpack.i.h.bf16 %v2815_v43  ;;  %v2816_v31 = vunpack.i.l.bf16 %v2815_v43 }
 0x40f   : > { %v1182_v45 = vrot.slane %v1165_v38, 2  ;;  %v1183_v46 = vrot.slane %v1166_v42, 2 }
 0x410   : > { %v1152_v39 = vsel %vm483_vm2, %v3377_v48, %v2807_v44  ;;  %v1151_v58 = vsel %vm483_vm2, %v3350_v23, %v2806_v21  ;;  %v1154_v47 = vsel %vm483_vm2, %v3384_v55, %v2817_v25  ;;  %v1153_v0 = vsel %vm483_vm2, %v3379_v49, %v2816_v31 }
 0x411   : > { %v2810_v32 = vpop.permute.xlu1 %2809  ;;  %v2820_v30 = vpop.permute.xlu0 %2819  ;;  %v1184_v50 = vsel %vm676_vm4, %v1182_v45, %v1183_v46 }
 0x412   : > { %v2812_v51 = vunpack.i.h.bf16 %v2810_v32  ;;  %v2811_v54 = vunpack.i.l.bf16 %v2810_v32  ;;  %v2822_v56 = vunpack.i.h.bf16 %v2820_v30  ;;  %v2821_v57 = vunpack.i.l.bf16 %v2820_v30  ;;  %2656 = vmatprep.mubr.msk.bf16.mxu0 %vm800_vm7, %v1184_v50 }
 0x414   : > { %v1160_v2 = vsel %vm728_vm5, %v1151_v58, %v2811_v54  ;;  %v1161_v3 = vsel %vm728_vm5, %v1152_v39, %v2812_v51  ;;  %v1162_v4 = vsel %vm728_vm5, %v1153_v0, %v2821_v57  ;;  %v1163_v5 = vsel %vm728_vm5, %v1154_v47, %v2822_v56 }
 0x415   : > { %v1167_v53 = vpack.c.bf16 %v1161_v3, %v1160_v2  ;;  %v1168_v52 = vpack.c.bf16 %v1163_v5, %v1162_v4  ;;  %v1094_v48 = vpop.permute.xlu1 %1093 }
 0x416   : > { %v1155_v23 = vsel %vm483_vm2, %v3393_v60, %v1094_v48  ;;  %v2482_v60 = vld [vmem:[%s3874_s8] ss:$0 sm:$0xff] }
 0x417   : > { %v1185_v6 = vrot.slane %v1167_v53, 2  ;;  %v1187_v41 = vrot.slane %v1168_v52, 2 }
 0x419   : > { %v1137_v55 = vpop.permute.xlu1 %1136  ;;  %v1186_v7 = vsel %vm676_vm4, %v1183_v46, %v1185_v6  ;;  %v1188_v49 = vsel %vm676_vm4, %v1185_v6, %v1187_v41 }
 0x41a   : > { %v1164_v10 = vsel %vm728_vm5, %v1155_v23, %v1137_v55  ;;  %2657 = vmatmul.mubr.msk.bf16.vlgmr.msra.gmra.mxu0 %vm800_vm7, %v1186_v7 }
 0x41b   : > { %v1169_v11 = vpack.c.bf16 %v1164_v10, %v1164_v10  ;;  %2660 = vmatprep.mubr.msk.bf16.mxu0 %vm800_vm7, %v1188_v49 }
 0x41d   : > { %v1189_v12 = vrot.slane %v1169_v11, 2 }
 0x41f   : > { %v1190_v13 = vsel %vm676_vm4, %v1187_v41, %v1189_v12 }
 0x422   : > { %2661 = vmatmul.mubr.msk.bf16.gmra.mxu0 %vm800_vm7, %v1190_v13 }
 0x4da   : > { %v2658_v59 = vpop.f32.mrf.mxu0 }
 0x4db   : > { %v1282_v16 = vadd.f32 %v2658_v59, %v2482_v60 }
 0x4dc   : > { %v1273_v14 = vpop.f32.mrf.mxu0 }
 0x4dd   : > { %v1274_v15 = vadd.f32 %v2482_v60, %v1273_v14  ;;  %v1310_v19 = vsel %vm483_vm2, %v1282_v16, 0.0  ;;  %v2916_v14 = vld [vmem:[%s3869_s3 + $0x50] sm:$0xff]  }
 0x4de   : > { %v2659_v1 = vpop.f32.mrf.mxu0 }
 0x4df   : > { %v1304_v61 = vsel %vm483_vm2, %v1274_v15, 0.0  ;;  %v1285_v18 = vadd.f32 %v2659_v1, %v2482_v60 }
 0x4e0   : > { %v1276_v17 = vpop.f32.mrf.mxu0  ;;  %1305 = vadd.xlane.f32.xlu0 %v1304_v61 }
 0x4e1   : > { %v1277_v40 = vadd.f32 %v2482_v60, %v1276_v17  ;;  %v1313_v27 = vsel %vm483_vm2, %v1285_v18, 0.0 }
 0x4e2   : > { %v2662_v63 = vpop.f32.mrf.mxu0 }
 0x4e3   : > { %v1307_v8 = vsel %vm483_vm2, %v1277_v40, 0.0  ;;  %v1298_v62 = vadd.f32 %v2662_v63, %v2482_v60 }
 0x4e4   : > { %v1289_v20 = vpop.f32.mrf.mxu0  ;;  %1308 = vadd.xlane.f32.xlu1 %v1307_v8  ;;  %1311 = vadd.xlane.f32.xlu0 %v1310_v19 }
 0x4e5   : > { %v1290_v9 = vadd.f32 %v2482_v60, %v1289_v20  ;;  %v1322_v34 = vsel %vm483_vm2, %v1298_v62, 0.0 }
 0x4e6   : > { %v2663_v24 = vpop.f32.mrf.mxu0 }
 0x4e7   : > { %v1316_v26 = vsel %vm483_vm2, %v1290_v9, 0.0  ;;  %v1301_v33 = vadd.f32 %v2663_v24, %v2482_v60 }
 0x4e8   : > { %v1292_v28 = vpop.f32.mrf.mxu0  ;;  %1317 = vadd.xlane.f32.xlu1 %v1316_v26  ;;  %1314 = vadd.xlane.f32.xlu0 %v1313_v27 }
 0x4e9   : > { %v1293_v29 = vadd.f32 %v2482_v60, %v1292_v28  ;;  %v1325_v36 = vsel %vm483_vm2, %v1301_v33, 0.0  ;;  %v2915_v60 = vld [vmem:[%s3869_s3 + $0x58] sm:$0xff]  }
 0x4ea   : > { %2664 = vmatprep.subr.bf16.mxu1 %v2915_v60 }
 0x4eb   : > { %v1319_v35 = vsel %vm483_vm2, %v1293_v29, 0.0  ;;  %2665 = vmatpush3.bf16.msra.mxu1 %v2915_v60 }
 0x4ec   : > { %1323 = vadd.xlane.f32.xlu1 %v1322_v34  ;;  %1320 = vadd.xlane.f32.xlu0 %v1319_v35 }
 0x4ed   : > { %2666 = vmatprep.subr.bf16.mxu1 %v2916_v14 }
 0x4ef   : > { %2667 = vmatpush3.bf16.msra.mxu1 %v2916_v14 }
 0x4f0   : > { %1326 = vadd.xlane.f32.xlu0 %v1325_v36 }
 0x569   : > { %v1306_v37 = vpop.xlane.xlu0 %1305 }
 0x56a   : > { %v1328_v38 = vmul.f32 0.03125, %v1306_v37 }
 0x56c   : > { %v3466_v42 = vsub.f32 %v1274_v15, %v1328_v38  ;;  %v2917_v15 = vld [vmem:[%s3869_s3 + $0x48] sm:$0xff]  }
 0x56d   : > { %v1309_v22 = vpop.xlane.xlu1 %1308  ;;  %v1312_v43 = vpop.xlane.xlu0 %1311  ;;  %2668 = vmatprep.subr.bf16.mxu1 %v2917_v15 }
 0x56e   : > { %v1329_v44 = vmul.f32 0.03125, %v1309_v22  ;;  %v1330_v21 = vmul.f32 0.03125, %v1312_v43  ;;  %v1344_v45 = vmul.f32 %v3466_v42, %v3466_v42  ;;  %2669 = vmatpush3.bf16.msra.mxu1 %v2917_v15  ;;  %v2493_v43 = vld [vmem:[%s3875_s9] ss:$0 sm:$0xff] }
 0x570   : > { %v3470_v46 = vsub.f32 %v1277_v40, %v1329_v44  ;;  %v3472_v25 = vsub.f32 %v1282_v16, %v1330_v21  ;;  %v1352_v31 = vsel %vm483_vm2, %v1344_v45, 0.0  ;;  %v3522_v45 = vld [vmem:[%s3876_s10] ss:$0 sm:$0xff] }
 0x571   : > { %v1318_v32 = vpop.xlane.xlu1 %1317  ;;  %1353 = vadd.xlane.f32.xlu1 %v1352_v31  ;;  %v1315_v30 = vpop.xlane.xlu0 %1314 }
 0x572   : > { %v1332_v50 = vmul.f32 0.03125, %v1318_v32  ;;  %v1331_v51 = vmul.f32 0.03125, %v1315_v30  ;;  %v1345_v54 = vmul.f32 %v3470_v46, %v3470_v46  ;;  %v1346_v56 = vmul.f32 %v3472_v25, %v3472_v25 }
 0x574   : > { %v3479_v57 = vsub.f32 %v1290_v9, %v1332_v50  ;;  %v3481_v39 = vsub.f32 %v1285_v18, %v1331_v51  ;;  %v1355_v58 = vsel %vm483_vm2, %v1345_v54, 0.0  ;;  %v1358_v47 = vsel %vm483_vm2, %v1346_v56, 0.0 }
 0x575   : > { %v1324_v0 = vpop.xlane.xlu1 %1323  ;;  %1356 = vadd.xlane.f32.xlu0 %v1355_v58  ;;  %1359 = vadd.xlane.f32.xlu1 %v1358_v47  ;;  %v1321_v2 = vpop.xlane.xlu0 %1320  ;;  %v3526_v54 = vstv %s1444_s20  ;;  %s2551_s20 = sld [smem:[#allocation4 + $0x80]] }
 0x576   : > { %v1334_v3 = vmul.f32 0.03125, %v1324_v0  ;;  %v1333_v4 = vmul.f32 0.03125, %v1321_v2  ;;  %v1348_v5 = vmul.f32 %v3479_v57, %v3479_v57  ;;  %v1347_v53 = vmul.f32 %v3481_v39, %v3481_v39 }
 0x578   : > { %v3489_v52 = vsub.f32 %v1298_v62, %v1334_v3  ;;  %v3491_v48 = vsub.f32 %v1293_v29, %v1333_v4  ;;  %v1364_v6 = vsel %vm483_vm2, %v1348_v5, 0.0  ;;  %v1361_v41 = vsel %vm483_vm2, %v1347_v53, 0.0  ;;  %v1454_v53 = vld [vmem:[#allocation2 + $0x10] sm:$0xff] }
 0x579   : > { %1365 = vadd.xlane.f32.xlu1 %v1364_v6  ;;  %1362 = vadd.xlane.f32.xlu0 %v1361_v41  ;;  %v1327_v23 = vpop.xlane.xlu0 %1326 }
 0x57a   : > { %v1335_v55 = vmul.f32 0.03125, %v1327_v23  ;;  %v1350_v7 = vmul.f32 %v3489_v52, %v3489_v52  ;;  %v1349_v49 = vmul.f32 %v3491_v48, %v3491_v48 }
 0x57c   : > { %v3499_v10 = vsub.f32 %v1301_v33, %v1335_v55  ;;  %v1370_v11 = vsel %vm483_vm2, %v1350_v7, 0.0  ;;  %v1367_v12 = vsel %vm483_vm2, %v1349_v49, 0.0 }
 0x57d   : > { %1371 = vadd.xlane.f32.xlu1 %v1370_v11  ;;  %1368 = vadd.xlane.f32.xlu0 %v1367_v12 }
 0x57e   : > { %v1351_v13 = vmul.f32 %v3499_v10, %v3499_v10 }
 0x580   : > { %v1373_v59 = vsel %vm483_vm2, %v1351_v13, 0.0 }
 0x581   : > { %1374 = vadd.xlane.f32.xlu0 %v1373_v59  ;;  %v1456_v59 = vld [vmem:[#allocation2 + $0x20] sm:$0xff] }
 0x5fa   : > { %v1354_v1 = vpop.xlane.xlu1 %1353 }
 0x5fb   : > { %v1376_v16 = vmul.f32 0.03125, %v1354_v1  ;;  %v1455_v1 = vld [vmem:[#allocation2 + $0x18] sm:$0xff] }
 0x5fd   : > { %v1384_v61 = vadd.f32 1e-08, %v1376_v16 }
 0x5fe   : > { %v1360_v17 = vpop.xlane.xlu1 %1359  ;;  %v1357_v40 = vpop.xlane.xlu0 %1356 }
 0x5ff   : > { %2945 = vrsqrt.f32 %v1384_v61  ;;  %v1378_v63 = vmul.f32 0.03125, %v1360_v17  ;;  %v1377_v18 = vmul.f32 0.03125, %v1357_v40  ;;  %v2918_v17 = vld [vmem:[%s3869_s3 + $0x40] sm:$0xff]  }
 0x600   : > { %2670 = vmatprep.subr.bf16.mxu1 %v2918_v17 }
 0x601   : > { %v1386_v8 = vadd.f32 1e-08, %v1378_v63  ;;  %v1385_v19 = vadd.f32 1e-08, %v1377_v18  ;;  %2671 = vmatpush3.bf16.msra.mxu1 %v2918_v17 }
 0x602   : > { %v1366_v20 = vpop.xlane.xlu1 %1365  ;;  %v1363_v9 = vpop.xlane.xlu0 %1362 }
 0x603   : > { %2947 = vrsqrt.f32 %v1386_v8  ;;  %v1380_v24 = vmul.f32 0.03125, %v1366_v20  ;;  %v1379_v62 = vmul.f32 0.03125, %v1363_v9  ;;  %v1458_v20 = vld [vmem:[#allocation2 + $0x30] sm:$0xff] }
 0x604   : > { %2949 = vrsqrt.f32 %v1385_v19 }
 0x605   : > { %v1388_v26 = vadd.f32 1e-08, %v1380_v24  ;;  %v1387_v27 = vadd.f32 1e-08, %v1379_v62 }
 0x606   : > { %v1372_v28 = vpop.xlane.xlu1 %1371  ;;  %v1369_v29 = vpop.xlane.xlu0 %1368 }
 0x607   : > { %2951 = vrsqrt.f32 %v1388_v26  ;;  %v1382_v33 = vmul.f32 0.03125, %v1372_v28  ;;  %v1381_v34 = vmul.f32 0.03125, %v1369_v29  ;;  %v1457_v26 = vld [vmem:[#allocation2 + $0x28] sm:$0xff]  ;;  %v2919_v29 = vld [vmem:[%s3869_s3 + $0x38] sm:$0xff]  }
 0x608   : > { %2953 = vrsqrt.f32 %v1387_v27  ;;  %2672 = vmatprep.subr.bf16.mxu1 %v2919_v29 }
 0x609   : > { %v1390_v35 = vadd.f32 1e-08, %v1382_v33  ;;  %v1389_v36 = vadd.f32 1e-08, %v1381_v34  ;;  %2673 = vmatpush3.bf16.msra.mxu1 %v2919_v29 }
 0x60a   : > { %v1375_v37 = vpop.xlane.xlu0 %1374 }
 0x60b   : > { %2955 = vrsqrt.f32 %v1390_v35  ;;  %v1383_v38 = vmul.f32 0.03125, %v1375_v37  ;;  %v3559_v37 = vld [vmem:[#allocation2 + $0x8] sm:$0xff] }
 0x60c   : > { %v2946_v22 = vpop.eup %2945  ;;  %2957 = vrsqrt.f32 %v1389_v36 }
 0x60d   : > { %v1400_v44 = vmul.f32 %v2946_v22, %v3466_v42  ;;  %v1391_v21 = vadd.f32 1e-08, %v1383_v38  ;;  %v1460_v38 = vld [vmem:[#allocation2 + $0x40] sm:$0xff] }
 0x60f   : > { %v1414_v31 = vmul.f32 %v2493_v43, %v1400_v44  ;;  %2959 = vrsqrt.f32 %v1391_v21  ;;  %v1459_v44 = vld [vmem:[#allocation2 + $0x38] sm:$0xff] }
 0x610   : > { %v2948_v32 = vpop.eup %2947 }
 0x611   : > { %v2950_v30 = vpop.eup %2949  ;;  %v1428_v50 = vadd.f32 %v3522_v45, %v1414_v31  ;;  %v1402_v51 = vmul.f32 %v2948_v32, %v3472_v25  ;;  %v2920_v31 = vld [vmem:[%s3869_s3 + $0x30] sm:$0xff]  }
 0x612   : > { %v1401_v56 = vmul.f32 %v2950_v30, %v3470_v46  ;;  %2674 = vmatprep.subr.bf16.mxu1 %v2920_v31 }
 0x613   : > { %v1436_v58 = vmax.f32 %v1428_v50, 0.0  ;;  %v1416_v42 = vmul.f32 %v2493_v43, %v1402_v51  ;;  %2675 = vmatpush3.bf16.msra.mxu1 %v2920_v31 }
 0x614   : > { %v2952_v47 = vpop.eup %2951  ;;  %v1415_v0 = vmul.f32 %v2493_v43, %v1401_v56 }
 0x615   : > { %v2954_v2 = vpop.eup %2953  ;;  %v1446_v3 = vmul.f32 %v3526_v54, %v1436_v58  ;;  %v1430_v4 = vadd.f32 %v3522_v45, %v1416_v42  ;;  %v1404_v5 = vmul.f32 %v2952_v47, %v3479_v57  ;;  %v1461_v58 = vld [vmem:[#allocation2 + $0x48] sm:$0xff] }
 0x616   : > { %v1429_v6 = vadd.f32 %v3522_v45, %v1415_v0  ;;  %v1403_v25 = vmul.f32 %v2954_v2, %v3481_v39 }
 0x617   : > { %v1462_v41 = vadd.f32 %v1454_v53, %v1446_v3  ;;  %v1438_v23 = vmax.f32 %v1430_v4, 0.0  ;;  %v1418_v55 = vmul.f32 %v2493_v43, %v1404_v5 }
 0x618   : > { %v2956_v46 = vpop.eup %2955  ;;  %v1437_v7 = vmax.f32 %v1429_v6, 0.0  ;;  %v1417_v49 = vmul.f32 %v2493_v43, %v1403_v25 }
 0x619   : > { %v2958_v11 = vpop.eup %2957  ;;  %1470 = vst.msk [vmem:[#allocation2 + $0x10] sm:$0xff] %vm483_vm2, %v1462_v41  ;;  %v1448_v12 = vmul.f32 %v3526_v54, %v1438_v23  ;;  %v1432_v13 = vadd.f32 %v3522_v45, %v1418_v55  ;;  %v1406_v57 = vmul.f32 %v2956_v46, %v3489_v52 }
 0x61a   : > { %v1447_v60 = vmul.f32 %v3526_v54, %v1437_v7  ;;  %v1431_v39 = vadd.f32 %v3522_v45, %v1417_v49  ;;  %v1405_v14 = vmul.f32 %v2958_v11, %v3491_v48 }
 0x61b   : > { %v1464_v15 = vadd.f32 %v1456_v59, %v1448_v12  ;;  %v1440_v16 = vmax.f32 %v1432_v13, 0.0  ;;  %v1420_v61 = vmul.f32 %v2493_v43, %v1406_v57 }
 0x61c   : > { %v2960_v40 = vpop.eup %2959  ;;  %v1463_v63 = vadd.f32 %v1455_v1, %v1447_v60  ;;  %v1439_v18 = vmax.f32 %v1431_v39, 0.0  ;;  %v1419_v8 = vmul.f32 %v2493_v43, %v1405_v14 }
 0x61d   : > { %1472 = vst.msk [vmem:[#allocation2 + $0x20] sm:$0xff] %vm483_vm2, %v1464_v15  ;;  %v1450_v52 = vmul.f32 %v3526_v54, %v1440_v16  ;;  %v1434_v19 = vadd.f32 %v3522_v45, %v1420_v61  ;;  %v1407_v48 = vmul.f32 %v2960_v40, %v3499_v10 }
 0x61e   : > { %1471 = vst.msk [vmem:[#allocation2 + $0x18] sm:$0xff] %vm483_vm2, %v1463_v63  ;;  %v1449_v9 = vmul.f32 %v3526_v54, %v1439_v18  ;;  %v1433_v24 = vadd.f32 %v3522_v45, %v1419_v8 }
 0x61f   : > { %v1466_v62 = vadd.f32 %v1458_v20, %v1450_v52  ;;  %v1442_v27 = vmax.f32 %v1434_v19, 0.0  ;;  %v1421_v28 = vmul.f32 %v2493_v43, %v1407_v48 }
 0x620   : > { %v1465_v33 = vadd.f32 %v1457_v26, %v1449_v9  ;;  %v1441_v34 = vmax.f32 %v1433_v24, 0.0  ;;  %v3557_v36 = vld [vmem:[#allocation2 + $0x10] sm:$0xff] }
 0x621   : > { %1474 = vst.msk [vmem:[#allocation2 + $0x30] sm:$0xff] %vm483_vm2, %v1466_v62  ;;  %v1452_v10 = vmul.f32 %v3526_v54, %v1442_v27  ;;  %v1435_v35 = vadd.f32 %v3522_v45, %v1421_v28  ;;  %v1515_v45 = vrot.slane %v3559_v37, 4  ;;  %v1516_v30 = vrot.slane %v3557_v36, 4 }
 0x622   : > { %1473 = vst.msk [vmem:[#allocation2 + $0x28] sm:$0xff] %vm483_vm2, %v1465_v33  ;;  %v1451_v22 = vmul.f32 %v3526_v54, %v1441_v34 }
 0x623   : > { %v1468_v43 = vadd.f32 %v1460_v38, %v1452_v10  ;;  %v1443_v21 = vmax.f32 %v1435_v35, 0.0  ;;  %v1517_v2 = vsel %vm1104_vm8, %v1515_v45, %v1516_v30 }
 0x624   : > { %v1467_v32 = vadd.f32 %v1459_v44, %v1451_v22  ;;  %v3572_v56 = vld [vmem:[#allocation2 + $0x20] sm:$0xff] }
 0x625   : > { %1476 = vst.msk [vmem:[#allocation2 + $0x40] sm:$0xff] %vm483_vm2, %v1468_v43  ;;  %v1453_v50 = vmul.f32 %v3526_v54, %v1443_v21  ;;  %v3570_v51 = vld [vmem:[#allocation2 + $0x18] sm:$0xff]  ;;  %v1520_v3 = vrot.slane %v3572_v56, 4 }
 0x626   : > { %1475 = vst.msk [vmem:[#allocation2 + $0x38] sm:$0xff] %vm483_vm2, %v1467_v32  ;;  %v2823_v42 = vpack.i.bf16 %v3570_v51, %v3557_v36  ;;  %v1518_v47 = vrot.slane %v3570_v51, 4 }
 0x627   : > { %v1469_v0 = vadd.f32 %v1461_v58, %v1453_v50 }
 0x628   : > { %2824 = vrot.lane.b32.xlu1 %v2823_v42, %s3024_s26  ;;  %v1519_v54 = vsel %vm1104_vm8, %v1516_v30, %v1518_v47  ;;  %v3585_v53 = vld [vmem:[#allocation2 + $0x30] sm:$0xff]  ;;  %v1521_v25 = vsel %vm1104_vm8, %v1518_v47, %v1520_v3 }
 0x629   : > { %1477 = vst.msk [vmem:[#allocation2 + $0x48] sm:$0xff] %vm483_vm2, %v1469_v0  ;;  %v2828_v4 = vpack.i.bf16 %v1519_v54, %v1517_v2  ;;  %v3583_v5 = vld [vmem:[#allocation2 + $0x28] sm:$0xff]  ;;  %v1524_v23 = vrot.slane %v3585_v53, 4 }
 0x62a   : > { %v1522_v6 = vrot.slane %v3583_v5, 4  ;;  %v2833_v49 = vpack.i.bf16 %v3583_v5, %v3572_v56 }
 0x62c   : > { %2829 = vrot.lane.b32.xlu1 %v2828_v4, %s3025_s27  ;;  %v1523_v41 = vsel %vm1104_vm8, %v1520_v3, %v1522_v6  ;;  %v3592_v55 = vld [vmem:[#allocation2 + $0x40] sm:$0xff]  ;;  %v1525_v13 = vsel %vm1104_vm8, %v1522_v6, %v1524_v23 }
 0x62d   : > { %v2838_v46 = vpack.i.bf16 %v1523_v41, %v1521_v25  ;;  %v3594_v7 = vld [vmem:[#allocation2 + $0x38] sm:$0xff]  ;;  %v1528_v12 = vrot.slane %v3592_v55, 4 }
 0x62e   : > { %v1526_v11 = vrot.slane %v3594_v7, 4  ;;  %v2848_v16 = vpack.i.bf16 %v3594_v7, %v3585_v53 }
 0x62f   : > { %2839 = vrot.lane.b32.xlu0 %v2838_v46, %s3025_s27 }
 0x630   : > { %2834 = vrot.lane.b32.xlu1 %v2833_v49, %s3024_s26  ;;  %v1527_v57 = vsel %vm1104_vm8, %v1524_v23, %v1526_v11  ;;  %v1505_v59 = vld [vmem:[#allocation2 + $0x48] sm:$0xff]  ;;  %v1529_v14 = vsel %vm1104_vm8, %v1526_v11, %v1528_v12  ;;  %v2510_v23 = vld [vmem:[%s3870_s4 + $0x1] ss:$0 sm:$0xff] }
 0x631   : > { %v2843_v60 = vpack.i.bf16 %v1527_v57, %v1525_v13  ;;  %v1530_v39 = vrot.slane %v1505_v59, 4  ;;  %v2858_v61 = vpack.i.bf16 %v1505_v59, %v3592_v55 }
 0x633   : > { %2844 = vrot.lane.b32.xlu0 %v2843_v60, %s3025_s27  ;;  %v1531_v15 = vsel %vm1104_vm8, %v1528_v12, %v1530_v39 }
 0x634   : > { %v2853_v1 = vpack.i.bf16 %v1531_v15, %v1529_v14 }
 0x636   : > { %2854 = vrot.lane.b32.xlu1 %v2853_v1, %s3025_s27 }
 0x637   : > { %2849 = vrot.lane.b32.xlu0 %v2848_v16, %s3024_s26 }
 0x63a   : > { %2859 = vrot.lane.b32.xlu1 %v2858_v61, %s3024_s26 }
 0x69a   : > { %v2825_v17 = vpop.permute.xlu1 %2824 }
 0x69b   : > { %v2827_v8 = vunpack.i.h.bf16 %v2825_v17  ;;  %v2826_v52 = vunpack.i.l.bf16 %v2825_v17 }
 0x69e   : > { %v2830_v40 = vpop.permute.xlu1 %2829 }
 0x69f   : > { %v2832_v63 = vunpack.i.h.bf16 %v2830_v40  ;;  %v2831_v18 = vunpack.i.l.bf16 %v2830_v40 }
 0x6a1   : > { %v1581_v19 = vsel %vm483_vm2, %v3557_v36, %v2832_v63  ;;  %v1580_v48 = vsel %vm483_vm2, %v3559_v37, %v2831_v18  ;;  %v2840_v20 = vpop.permute.xlu0 %2839 }
 0x6a2   : > { %v2842_v9 = vunpack.i.h.bf16 %v2840_v20  ;;  %v2841_v24 = vunpack.i.l.bf16 %v2840_v20  ;;  %v2835_v62 = vpop.permute.xlu1 %2834  ;;  %v1588_v26 = vsel %vm728_vm5, %v1580_v48, %v2826_v52  ;;  %v1589_v27 = vsel %vm728_vm5, %v1581_v19, %v2827_v8 }
 0x6a3   : > { %v2837_v28 = vunpack.i.h.bf16 %v2835_v62  ;;  %v2836_v29 = vunpack.i.l.bf16 %v2835_v62  ;;  %v1596_v33 = vpack.c.bf16 %v1589_v27, %v1588_v26 }
 0x6a4   : > { %v1583_v34 = vsel %vm483_vm2, %v3572_v56, %v2842_v9  ;;  %v1582_v10 = vsel %vm483_vm2, %v3570_v51, %v2841_v24 }
 0x6a5   : > { %v1590_v35 = vsel %vm728_vm5, %v1582_v10, %v2836_v29  ;;  %v1591_v36 = vsel %vm728_vm5, %v1583_v34, %v2837_v28  ;;  %2676 = vmatprep.mubr.msk.bf16.mxu1 %vm800_vm7, %v1596_v33  ;;  %v2845_v37 = vpop.permute.xlu0 %2844 }
 0x6a6   : > { %v1597_v38 = vpack.c.bf16 %v1591_v36, %v1590_v35  ;;  %v2847_v22 = vunpack.i.h.bf16 %v2845_v37  ;;  %v2846_v43 = vunpack.i.l.bf16 %v2845_v37 }
 0x6a8   : > { %2677 = vmatmul.mubr.msk.bf16.vlgmr.msra.gmra.mxu1 %vm800_vm7, %v1597_v38  ;;  %v2855_v44 = vpop.permute.xlu1 %2854  ;;  %v1585_v50 = vsel %vm483_vm2, %v3585_v53, %v2847_v22  ;;  %v1584_v51 = vsel %vm483_vm2, %v3583_v5, %v2846_v43 }
 0x6a9   : > { %v2850_v21 = vpop.permute.xlu0 %2849  ;;  %v2857_v31 = vunpack.i.h.bf16 %v2855_v44  ;;  %v2856_v32 = vunpack.i.l.bf16 %v2855_v44 }
 0x6aa   : > { %v2852_v45 = vunpack.i.h.bf16 %v2850_v21  ;;  %v2851_v30 = vunpack.i.l.bf16 %v2850_v21 }
 0x6ab   : > { %v1587_v3 = vsel %vm483_vm2, %v3592_v55, %v2857_v31  ;;  %v1586_v4 = vsel %vm483_vm2, %v3594_v7, %v2856_v32 }
 0x6ac   : > { %v1592_v58 = vsel %vm728_vm5, %v1584_v51, %v2851_v30  ;;  %v1593_v42 = vsel %vm728_vm5, %v1585_v50, %v2852_v45  ;;  %v2860_v47 = vpop.permute.xlu1 %2859 }
 0x6ad   : > { %v1598_v0 = vpack.c.bf16 %v1593_v42, %v1592_v58  ;;  %v2862_v2 = vunpack.i.h.bf16 %v2860_v47  ;;  %v2861_v54 = vunpack.i.l.bf16 %v2860_v47 }
 0x6af   : > { %v1594_v6 = vsel %vm728_vm5, %v1586_v4, %v2861_v54  ;;  %v1595_v25 = vsel %vm728_vm5, %v1587_v3, %v2862_v2  ;;  %2680 = vmatprep.mubr.msk.bf16.mxu1 %vm800_vm7, %v1598_v0 }
 0x6b0   : > { %v1599_v41 = vpack.c.bf16 %v1595_v25, %v1594_v6 }
 0x6b2   : > { %2681 = vmatmul.mubr.msk.bf16.gmra.mxu1 %vm800_vm7, %v1599_v41 }
 0x768   : > { %v2678_v46 = vpop.f32.mrf.mxu1 }
 0x769   : > { %v1697_v49 = vadd.f32 %v2678_v46, %v2510_v23 }
 0x76a   : > { %v1688_v11 = vpop.f32.mrf.mxu1 }
 0x76b   : > { %v1689_v12 = vadd.f32 %v2510_v23, %v1688_v11  ;;  %v1725_v13 = vsel %vm483_vm2, %v1697_v49, 0.0 }
 0x76c   : > { %1726 = vadd.xlane.f32.xlu0 %v1725_v13  ;;  %v2679_v7 = vpop.f32.mrf.mxu1  ;;  %v2921_v13 = vld [vmem:[%s3873_s7 + $0x58] sm:$0xff]  }
 0x76d   : > { %v1700_v59 = vadd.f32 %v2679_v7, %v2510_v23  ;;  %v1719_v39 = vsel %vm483_vm2, %v1689_v12, 0.0  ;;  %v2922_v7 = vld [vmem:[%s3873_s7 + $0x50] sm:$0xff]   ;;  %2684 = vmatprep.subr.bf16.mxu0 %v2921_v13 }
 0x76e   : > { %v1691_v57 = vpop.f32.mrf.mxu1  ;;  %2685 = vmatpush3.bf16.msra.mxu0 %v2921_v13 }
 0x76f   : > { %v1692_v60 = vadd.f32 %v2510_v23, %v1691_v57  ;;  %v1728_v1 = vsel %vm483_vm2, %v1700_v59, 0.0  ;;  %2686 = vmatprep.subr.bf16.mxu0 %v2922_v7  ;;  %v2923_v57 = vld [vmem:[%s3873_s7 + $0x48] sm:$0xff]  }
 0x770   : > { %1720 = vadd.xlane.f32.xlu0 %v1719_v39 }
 0x771   : > { %v1722_v14 = vsel %vm483_vm2, %v1692_v60, 0.0 }
 0x772   : > { %1723 = vadd.xlane.f32.xlu1 %v1722_v14  ;;  %v2682_v15 = vpop.f32.mrf.mxu1  ;;  %2687 = vmatpush3.bf16.msra.mxu0 %v2922_v7 }
 0x773   : > { %v1713_v40 = vadd.f32 %v2682_v15, %v2510_v23  ;;  %2688 = vmatprep.subr.bf16.mxu0 %v2923_v57 }
 0x774   : > { %1729 = vadd.xlane.f32.xlu0 %v1728_v1  ;;  %v1704_v16 = vpop.f32.mrf.mxu1 }
 0x775   : > { %v1705_v61 = vadd.f32 %v2510_v23, %v1704_v16  ;;  %v1737_v19 = vsel %vm483_vm2, %v1713_v40, 0.0 }
 0x776   : > { %v2683_v17 = vpop.f32.mrf.mxu1  ;;  %2689 = vmatpush3.bf16.msra.mxu0 %v2923_v57  ;;  %v1887_v57 = vld [vmem:[#allocation3 + $0x8] sm:$0xff] }
 0x777   : > { %v1731_v63 = vsel %vm483_vm2, %v1705_v61, 0.0  ;;  %v1716_v52 = vadd.f32 %v2683_v17, %v2510_v23 }
 0x778   : > { %v1707_v18 = vpop.f32.mrf.mxu1  ;;  %1732 = vadd.xlane.f32.xlu1 %v1731_v63 }
 0x779   : > { %v1708_v8 = vadd.f32 %v2510_v23, %v1707_v18  ;;  %v1740_v20 = vsel %vm483_vm2, %v1716_v52, 0.0 }
 0x77b   : > { %v1734_v48 = vsel %vm483_vm2, %v1708_v8, 0.0 }
 0x77c   : > { %1738 = vadd.xlane.f32.xlu1 %v1737_v19  ;;  %1735 = vadd.xlane.f32.xlu0 %v1734_v48 }
 0x780   : > { %1741 = vadd.xlane.f32.xlu0 %v1740_v20 }
 0x7f5   : > { %v1727_v9 = vpop.xlane.xlu0 %1726 }
 0x7f6   : > { %v1745_v24 = vmul.f32 0.03125, %v1727_v9 }
 0x7f8   : > { %v3652_v28 = vsub.f32 %v1697_v49, %v1745_v24 }
 0x7f9   : > { %v1721_v62 = vpop.xlane.xlu0 %1720 }
 0x7fa   : > { %v1743_v26 = vmul.f32 0.03125, %v1721_v62  ;;  %v1761_v43 = vmul.f32 %v3652_v28, %v3652_v28 }
 0x7fb   : > { %v1724_v27 = vpop.xlane.xlu1 %1723 }
 0x7fc   : > { %v3654_v29 = vsub.f32 %v1689_v12, %v1743_v26  ;;  %v1744_v33 = vmul.f32 0.03125, %v1724_v27  ;;  %v1773_v30 = vsel %vm483_vm2, %v1761_v43, 0.0  ;;  %v2522_v43 = vld [vmem:[%s3872_s6 + $0x1] ss:$0 sm:$0xff] }
 0x7fd   : > { %v1730_v34 = vpop.xlane.xlu0 %1729 }
 0x7fe   : > { %v3656_v10 = vsub.f32 %v1692_v60, %v1744_v33  ;;  %v1746_v35 = vmul.f32 0.03125, %v1730_v34  ;;  %v1759_v36 = vmul.f32 %v3654_v29, %v3654_v29 }
 0x800   : > { %v3660_v37 = vsub.f32 %v1700_v59, %v1746_v35  ;;  %v1767_v38 = vsel %vm483_vm2, %v1759_v36, 0.0  ;;  %v1760_v22 = vmul.f32 %v3656_v10, %v3656_v10  ;;  %v2521_v35 = vld [vmem:[%s3871_s5 + $0x1] ss:$0 sm:$0xff] }
 0x801   : > { %1768 = vadd.xlane.f32.xlu1 %v1767_v38  ;;  %v1733_v44 = vpop.xlane.xlu1 %1732 }
 0x802   : > { %v1747_v21 = vmul.f32 0.03125, %v1733_v44  ;;  %v1770_v31 = vsel %vm483_vm2, %v1760_v22, 0.0  ;;  %v1762_v32 = vmul.f32 %v3660_v37, %v3660_v37 }
 0x803   : > { %1771 = vadd.xlane.f32.xlu0 %v1770_v31 }
 0x804   : > { %v3670_v45 = vsub.f32 %v1705_v61, %v1747_v21  ;;  %v1776_v47 = vsel %vm483_vm2, %v1762_v32, 0.0 }
 0x805   : > { %1774 = vadd.xlane.f32.xlu1 %v1773_v30  ;;  %v1739_v50 = vpop.xlane.xlu1 %1738  ;;  %v1736_v51 = vpop.xlane.xlu0 %1735 }
 0x806   : > { %v1749_v58 = vmul.f32 0.03125, %v1739_v50  ;;  %v1748_v42 = vmul.f32 0.03125, %v1736_v51  ;;  %v1763_v0 = vmul.f32 %v3670_v45, %v3670_v45 }
 0x807   : > { %1777 = vadd.xlane.f32.xlu0 %v1776_v47 }
 0x808   : > { %v3676_v2 = vsub.f32 %v1713_v40, %v1749_v58  ;;  %v3678_v54 = vsub.f32 %v1708_v8, %v1748_v42  ;;  %v1779_v3 = vsel %vm483_vm2, %v1763_v0, 0.0 }
 0x809   : > { %1780 = vadd.xlane.f32.xlu1 %v1779_v3  ;;  %v1742_v4 = vpop.xlane.xlu0 %1741 }
 0x80a   : > { %v1750_v6 = vmul.f32 0.03125, %v1742_v4  ;;  %v1765_v25 = vmul.f32 %v3676_v2, %v3676_v2  ;;  %v1764_v41 = vmul.f32 %v3678_v54, %v3678_v54 }
 0x80c   : > { %v3685_v23 = vsub.f32 %v1716_v52, %v1750_v6  ;;  %v1785_v46 = vsel %vm483_vm2, %v1765_v25, 0.0  ;;  %v1782_v49 = vsel %vm483_vm2, %v1764_v41, 0.0 }
 0x80d   : > { %1786 = vadd.xlane.f32.xlu1 %v1785_v46  ;;  %1783 = vadd.xlane.f32.xlu0 %v1782_v49 }
 0x80e   : > { %v1766_v11 = vmul.f32 %v3685_v23, %v3685_v23 }
 0x810   : > { %v1788_v12 = vsel %vm483_vm2, %v1766_v11, 0.0 }
 0x811   : > { %1789 = vadd.xlane.f32.xlu0 %v1788_v12 }
 0x88a   : > { %v1769_v59 = vpop.xlane.xlu1 %1768 }
 0x88b   : > { %v1791_v60 = vmul.f32 0.03125, %v1769_v59  ;;  %v2926_v59 = vld [vmem:[%s3873_s7 + $0x30] sm:$0xff]  }
 0x88c   : > { %v1772_v39 = vpop.xlane.xlu0 %1771 }
 0x88d   : > { %v1799_v14 = vadd.f32 1e-08, %v1791_v60  ;;  %v1792_v15 = vmul.f32 0.03125, %v1772_v39 }
 0x88e   : > { %v1775_v1 = vpop.xlane.xlu1 %1774 }
 0x88f   : > { %2961 = vrsqrt.f32 %v1799_v14  ;;  %v1800_v16 = vadd.f32 1e-08, %v1792_v15  ;;  %v1793_v61 = vmul.f32 0.03125, %v1775_v1 }
 0x890   : > { %v1778_v17 = vpop.xlane.xlu0 %1777 }
 0x891   : > { %2963 = vrsqrt.f32 %v1800_v16  ;;  %v1801_v40 = vadd.f32 1e-08, %v1793_v61  ;;  %v1794_v63 = vmul.f32 0.03125, %v1778_v17 }
 0x892   : > { %v1781_v18 = vpop.xlane.xlu1 %1780 }
 0x893   : > { %2965 = vrsqrt.f32 %v1801_v40  ;;  %v1802_v8 = vadd.f32 1e-08, %v1794_v63  ;;  %v1795_v52 = vmul.f32 0.03125, %v1781_v18 }
 0x895   : > { %2967 = vrsqrt.f32 %v1802_v8  ;;  %v1803_v19 = vadd.f32 1e-08, %v1795_v52 }
 0x896   : > { %v1787_v48 = vpop.xlane.xlu1 %1786  ;;  %v1784_v20 = vpop.xlane.xlu0 %1783 }
 0x897   : > { %2969 = vrsqrt.f32 %v1803_v19  ;;  %v1797_v9 = vmul.f32 0.03125, %v1787_v48  ;;  %v1796_v24 = vmul.f32 0.03125, %v1784_v20 }
 0x899   : > { %v1805_v62 = vadd.f32 1e-08, %v1797_v9  ;;  %v1804_v26 = vadd.f32 1e-08, %v1796_v24 }
 0x89a   : > { %v1790_v27 = vpop.xlane.xlu0 %1789 }
 0x89b   : > { %2971 = vrsqrt.f32 %v1805_v62  ;;  %v1798_v33 = vmul.f32 0.03125, %v1790_v27 }
 0x89c   : > { %v2962_v34 = vpop.eup %2961  ;;  %2973 = vrsqrt.f32 %v1804_v26 }
 0x89d   : > { %v1815_v36 = vmul.f32 %v2962_v34, %v3654_v29  ;;  %v1806_v38 = vadd.f32 1e-08, %v1798_v33  ;;  %v2924_v29 = vld [vmem:[%s3873_s7 + $0x40] sm:$0xff]  }
 0x89e   : > { %v2964_v22 = vpop.eup %2963  ;;  %2690 = vmatprep.subr.bf16.mxu0 %v2924_v29 }
 0x89f   : > { %v1829_v44 = vmul.f32 %v2521_v35, %v1815_v36  ;;  %v1816_v21 = vmul.f32 %v2964_v22, %v3656_v10  ;;  %2975 = vrsqrt.f32 %v1806_v38  ;;  %2691 = vmatpush3.bf16.msra.mxu0 %v2924_v29 }
 0x8a0   : > { %v2966_v31 = vpop.eup %2965 }
 0x8a1   : > { %v1843_v32 = vadd.f32 %v2522_v43, %v1829_v44  ;;  %v1830_v30 = vmul.f32 %v2521_v35, %v1816_v21  ;;  %v1817_v50 = vmul.f32 %v2966_v31, %v3652_v28  ;;  %v2925_v28 = vld [vmem:[%s3873_s7 + $0x38] sm:$0xff]   ;;  %v1886_v44 = vld [vmem:[#allocation3] sm:$0xff] }
 0x8a2   : > { %v2968_v51 = vpop.eup %2967  ;;  %2692 = vmatprep.subr.bf16.mxu0 %v2925_v28 }
 0x8a3   : > { %v1851_v58 = vmax.f32 %v1843_v32, 0.0  ;;  %v1844_v42 = vadd.f32 %v2522_v43, %v1830_v30  ;;  %v1831_v47 = vmul.f32 %v2521_v35, %v1817_v50  ;;  %v1818_v0 = vmul.f32 %v2968_v51, %v3660_v37  ;;  %2693 = vmatpush3.bf16.msra.mxu0 %v2925_v28 }
 0x8a4   : > { %v2970_v3 = vpop.eup %2969  ;;  %2694 = vmatprep.subr.bf16.mxu0 %v2926_v59 }
 0x8a5   : > { %1859 = vst.msk [vmem:[#allocation3 + $0x10] sm:$0xff] %vm483_vm2, %v1851_v58  ;;  %v1852_v10 = vmax.f32 %v1844_v42, 0.0  ;;  %v1845_v4 = vadd.f32 %v2522_v43, %v1831_v47  ;;  %v1832_v6 = vmul.f32 %v2521_v35, %v1818_v0  ;;  %v1819_v25 = vmul.f32 %v2970_v3, %v3670_v45 }
 0x8a7   : > { %1860 = vst.msk [vmem:[#allocation3 + $0x18] sm:$0xff] %vm483_vm2, %v1852_v10  ;;  %v1853_v41 = vmax.f32 %v1845_v4, 0.0  ;;  %v1846_v46 = vadd.f32 %v2522_v43, %v1832_v6  ;;  %v1833_v49 = vmul.f32 %v2521_v35, %v1819_v25  ;;  %2695 = vmatpush3.bf16.msra.mxu0 %v2926_v59 }
 0x8a8   : > { %v2972_v37 = vpop.eup %2971 }
 0x8a9   : > { %v2974_v11 = vpop.eup %2973  ;;  %1861 = vst.msk [vmem:[#allocation3 + $0x20] sm:$0xff] %vm483_vm2, %v1853_v41  ;;  %v1854_v12 = vmax.f32 %v1846_v46, 0.0  ;;  %v1847_v13 = vadd.f32 %v2522_v43, %v1833_v49  ;;  %v1821_v7 = vmul.f32 %v2972_v37, %v3676_v2 }
 0x8aa   : > { %v1820_v45 = vmul.f32 %v2974_v11, %v3678_v54 }
 0x8ab   : > { %1862 = vst.msk [vmem:[#allocation3 + $0x28] sm:$0xff] %vm483_vm2, %v1854_v12  ;;  %v1855_v60 = vmax.f32 %v1847_v13, 0.0  ;;  %v1835_v39 = vmul.f32 %v2521_v35, %v1821_v7 }
 0x8ac   : > { %v2976_v14 = vpop.eup %2975  ;;  %v1834_v15 = vmul.f32 %v2521_v35, %v1820_v45  ;;  %v1888_v1 = vld [vmem:[#allocation3 + $0x10] sm:$0xff] }
 0x8ad   : > { %1863 = vst.msk [vmem:[#allocation3 + $0x30] sm:$0xff] %vm483_vm2, %v1855_v60  ;;  %v1849_v16 = vadd.f32 %v2522_v43, %v1835_v39  ;;  %v1822_v2 = vmul.f32 %v2976_v14, %v3685_v23  ;;  %v2863_v61 = vpack.i.bf16 %v1888_v1, %v1887_v57 }
 0x8ae   : > { %v1848_v54 = vadd.f32 %v2522_v43, %v1834_v15  ;;  %v1889_v17 = vld [vmem:[#allocation3 + $0x18] sm:$0xff] }
 0x8af   : > { %v1857_v40 = vmax.f32 %v1849_v16, 0.0  ;;  %v1836_v63 = vmul.f32 %v2521_v35, %v1822_v2  ;;  %2864 = vrot.lane.b32.xlu1 %v2863_v61, %s3025_s27  ;;  %v2873_v19 = vpack.i.bf16 %v1889_v17, %v1888_v1 }
 0x8b0   : > { %v1856_v18 = vmax.f32 %v1848_v54, 0.0  ;;  %v1890_v8 = vld [vmem:[#allocation3 + $0x20] sm:$0xff] }
 0x8b1   : > { %1865 = vst.msk [vmem:[#allocation3 + $0x40] sm:$0xff] %vm483_vm2, %v1857_v40  ;;  %v1850_v52 = vadd.f32 %v2522_v43, %v1836_v63  ;;  %v2868_v48 = vpack.i.bf16 %v1890_v8, %v1889_v17 }
 0x8b2   : > { %1864 = vst.msk [vmem:[#allocation3 + $0x38] sm:$0xff] %vm483_vm2, %v1856_v18  ;;  %v1891_v20 = vld [vmem:[#allocation3 + $0x28] sm:$0xff] }
 0x8b3   : > { %v1858_v9 = vmax.f32 %v1850_v52, 0.0  ;;  %2874 = vrot.lane.b32.xlu1 %v2873_v19, %s3024_s26  ;;  %2869 = vrot.lane.b32.xlu0 %v2868_v48, %s3025_s27  ;;  %v2878_v24 = vpack.i.bf16 %v1891_v20, %v1890_v8 }
 0x8b4   : > { %v1892_v23 = vld [vmem:[#allocation3 + $0x30] sm:$0xff] }
 0x8b5   : > { %1866 = vst.msk [vmem:[#allocation3 + $0x48] sm:$0xff] %vm483_vm2, %v1858_v9  ;;  %v2883_v62 = vpack.i.bf16 %v1892_v23, %v1891_v20 }
 0x8b7   : > { %2879 = vrot.lane.b32.xlu1 %v2878_v24, %s3024_s26  ;;  %2884 = vrot.lane.b32.xlu0 %v2883_v62, %s3025_s27 }
 0x8b8   : > { %v1894_v26 = vld [vmem:[#allocation3 + $0x40] sm:$0xff] }
 0x8b9   : > { %v1893_v27 = vld [vmem:[#allocation3 + $0x38] sm:$0xff] }
 0x8ba   : > { %v2893_v33 = vpack.i.bf16 %v1893_v27, %v1892_v23  ;;  %v2888_v34 = vpack.i.bf16 %v1894_v26, %v1893_v27 }
 0x8bc   : > { %2894 = vrot.lane.b32.xlu0 %v2893_v33, %s3024_s26  ;;  %2889 = vrot.lane.b32.xlu1 %v2888_v34, %s3025_s27  ;;  %v1895_v35 = vld [vmem:[#allocation3 + $0x48] sm:$0xff] }
 0x8bd   : > { %v2898_v36 = vpack.i.bf16 %v1895_v35, %v1894_v26 }
 0x8c0   : > { %2899 = vrot.lane.b32.xlu1 %v2898_v36, %s3024_s26 }
 0x921   : > { %v2865_v38 = vpop.permute.xlu1 %2864 }
 0x922   : > { %v2867_v22 = vunpack.i.h.bf16 %v2865_v38  ;;  %v2866_v43 = vunpack.i.l.bf16 %v2865_v38 }
 0x924   : > { %v1954_v50 = vsel %vm483_vm2, %v1887_v57, %v2867_v22  ;;  %v1953_v51 = vsel %vm483_vm2, %v1886_v44, %v2866_v43 }
 0x925   : > { %v2875_v21 = vpop.permute.xlu1 %2874  ;;  %v2870_v31 = vpop.permute.xlu0 %2869 }
 0x926   : > { %v2877_v32 = vunpack.i.h.bf16 %v2875_v21  ;;  %v2876_v30 = vunpack.i.l.bf16 %v2875_v21  ;;  %v2872_v29 = vunpack.i.h.bf16 %v2870_v31  ;;  %v2871_v58 = vunpack.i.l.bf16 %v2870_v31 }
 0x928   : > { %v1962_v42 = vsel %vm728_vm5, %v1954_v50, %v2877_v32  ;;  %v1961_v47 = vsel %vm728_vm5, %v1953_v51, %v2876_v30  ;;  %v1956_v25 = vsel %vm483_vm2, %v1889_v17, %v2872_v29  ;;  %v1955_v28 = vsel %vm483_vm2, %v1888_v1, %v2871_v58 }
 0x929   : > { %v1969_v0 = vpack.c.bf16 %v1962_v42, %v1961_v47  ;;  %v2880_v3 = vpop.permute.xlu1 %2879  ;;  %v2885_v10 = vpop.permute.xlu0 %2884 }
 0x92a   : > { %v2882_v4 = vunpack.i.h.bf16 %v2880_v3  ;;  %v2881_v6 = vunpack.i.l.bf16 %v2880_v3  ;;  %v2887_v49 = vunpack.i.h.bf16 %v2885_v10  ;;  %v2886_v37 = vunpack.i.l.bf16 %v2885_v10 }
 0x92b   : > { %2696 = vmatprep.mubr.msk.bf16.mxu0 %vm800_vm7, %v1969_v0 }
 0x92c   : > { %v1963_v41 = vsel %vm728_vm5, %v1955_v28, %v2881_v6  ;;  %v1964_v46 = vsel %vm728_vm5, %v1956_v25, %v2882_v4  ;;  %v1958_v57 = vsel %vm483_vm2, %v1891_v20, %v2887_v49  ;;  %v1957_v59 = vsel %vm483_vm2, %v1890_v8, %v2886_v37  ;;  %v2538_v8 = vld [vmem:[%s3874_s8 + $0x1] ss:$0 sm:$0xff] }
 0x92d   : > { %v1970_v11 = vpack.c.bf16 %v1964_v46, %v1963_v41 }
 0x92e   : > { %v2890_v12 = vpop.permute.xlu1 %2889  ;;  %v2895_v13 = vpop.permute.xlu0 %2894 }
 0x92f   : > { %v2897_v7 = vunpack.i.h.bf16 %v2895_v13  ;;  %v2896_v45 = vunpack.i.l.bf16 %v2895_v13  ;;  %2697 = vmatmul.mubr.msk.bf16.vlgmr.msra.gmra.mxu0 %vm800_vm7, %v1970_v11  ;;  %v2892_v60 = vunpack.i.h.bf16 %v2890_v12  ;;  %v2891_v39 = vunpack.i.l.bf16 %v2890_v12 }
 0x931   : > { %v1965_v14 = vsel %vm728_vm5, %v1957_v59, %v2896_v45  ;;  %v1966_v15 = vsel %vm728_vm5, %v1958_v57, %v2897_v7  ;;  %v1960_v54 = vsel %vm483_vm2, %v1893_v27, %v2892_v60  ;;  %v1959_v17 = vsel %vm483_vm2, %v1892_v23, %v2891_v39 }
 0x932   : > { %v1971_v1 = vpack.c.bf16 %v1966_v15, %v1965_v14  ;;  %v2900_v16 = vpop.permute.xlu1 %2899 }
 0x933   : > { %v2902_v2 = vunpack.i.h.bf16 %v2900_v16  ;;  %v2901_v61 = vunpack.i.l.bf16 %v2900_v16 }
 0x934   : > { %2700 = vmatprep.mubr.msk.bf16.mxu0 %vm800_vm7, %v1971_v1 }
 0x935   : > { %v1968_v40 = vsel %vm728_vm5, %v1960_v54, %v2902_v2  ;;  %v1967_v63 = vsel %vm728_vm5, %v1959_v17, %v2901_v61 }
 0x936   : > { %v1972_v18 = vpack.c.bf16 %v1968_v40, %v1967_v63 }
 0x938   : > { %2701 = vmatmul.mubr.msk.bf16.gmra.mxu0 %vm800_vm7, %v1972_v18 }
 0x9ef   : > { %v2698_v52 = vpop.f32.mrf.mxu0 }
 0x9f0   : > { %v2070_v19 = vadd.f32 %v2698_v52, %v2538_v8 }
 0x9f1   : > { %v2061_v48 = vpop.f32.mrf.mxu0 }
 0x9f2   : > { %v2062_v20 = vadd.f32 %v2538_v8, %v2061_v48  ;;  %v2098_v9 = vsel %vm483_vm2, %v2070_v19, 0.0 }
 0x9f3   : > { %2099 = vadd.xlane.f32.xlu1 %v2098_v9  ;;  %v2699_v23 = vpop.f32.mrf.mxu0  ;;  %v2927_v9 = vld [vmem:[%s3878_s12 + $0x8] sm:$0xff]  }
 0x9f4   : > { %v2073_v24 = vadd.f32 %v2699_v23, %v2538_v8  ;;  %v2092_v62 = vsel %vm483_vm2, %v2062_v20, 0.0  ;;  %2704 = vmatprep.subr.bf16.mxu0 %v2927_v9  ;;  %2716 = vmatprep.subr.bf16.mxu1 %v2927_v9  ;;  %v2928_v23 = vld [vmem:[%s3878_s12] sm:$0xff]  }
 0x9f5   : > { %v2064_v26 = vpop.f32.mrf.mxu0  ;;  %2093 = vadd.xlane.f32.xlu0 %v2092_v62  ;;  %2705 = vmatpush3.bf16.msra.mxu0 %v2927_v9 }
 0x9f6   : > { %v2065_v27 = vadd.f32 %v2538_v8, %v2064_v26  ;;  %v2101_v35 = vsel %vm483_vm2, %v2073_v24, 0.0  ;;  %2718 = vmatpush3.bf16.msra.mxu1 %v2927_v9  ;;  %2706 = vmatprep.subr.bf16.mxu0 %v2928_v23 }
 0x9f7   : > { %2717 = vmatprep.subr.bf16.mxu1 %v2928_v23 }
 0x9f8   : > { %v2702_v33 = vpop.f32.mrf.mxu0  ;;  %v2095_v34 = vsel %vm483_vm2, %v2065_v27, 0.0 }
 0x9f9   : > { %v2086_v36 = vadd.f32 %v2702_v33, %v2538_v8  ;;  %2096 = vadd.xlane.f32.xlu1 %v2095_v34  ;;  %2102 = vadd.xlane.f32.xlu0 %v2101_v35 }
 0x9fa   : > { %v2077_v38 = vpop.f32.mrf.mxu0  ;;  %2707 = vmatpush3.bf16.msra.mxu0 %v2928_v23  ;;  %2719 = vmatpush3.bf16.msra.mxu1 %v2928_v23 }
 0x9fb   : > { %v2078_v22 = vadd.f32 %v2538_v8, %v2077_v38  ;;  %v2110_v43 = vsel %vm483_vm2, %v2086_v36, 0.0 }
 0x9fc   : > { %v2703_v44 = vpop.f32.mrf.mxu0 }
 0x9fd   : > { %2111 = vadd.xlane.f32.xlu1 %v2110_v43  ;;  %v2104_v21 = vsel %vm483_vm2, %v2078_v22, 0.0  ;;  %v2089_v30 = vadd.f32 %v2703_v44, %v2538_v8 }
 0x9fe   : > { %v2080_v31 = vpop.f32.mrf.mxu0  ;;  %2105 = vadd.xlane.f32.xlu0 %v2104_v21 }
 0x9ff   : > { %v2081_v32 = vadd.f32 %v2538_v8, %v2080_v31  ;;  %v2113_v51 = vsel %vm483_vm2, %v2089_v30, 0.0 }
 0xa01   : > { %v2107_v50 = vsel %vm483_vm2, %v2081_v32, 0.0 }
 0xa02   : > { %2108 = vadd.xlane.f32.xlu0 %v2107_v50 }
 0xa06   : > { %2114 = vadd.xlane.f32.xlu0 %v2113_v51 }
 0xa7c   : > { %v2100_v29 = vpop.xlane.xlu1 %2099 }
 0xa7d   : > { %v2118_v58 = vmul.f32 0.03125, %v2100_v29 }
 0xa7e   : > { %v2094_v42 = vpop.xlane.xlu0 %2093 }
 0xa7f   : > { %v3771_v47 = vsub.f32 %v2070_v19, %v2118_v58  ;;  %v2116_v0 = vmul.f32 0.03125, %v2094_v42  ;;  %v2549_v42 = vld [vmem:[%s3875_s9 + $0x1] ss:$0 sm:$0xff] }
 0xa81   : > { %v3773_v3 = vsub.f32 %v2062_v20, %v2116_v0  ;;  %v2134_v10 = vmul.f32 %v3771_v47, %v3771_v47 }
 0xa82   : > { %v2097_v4 = vpop.xlane.xlu1 %2096  ;;  %v2103_v6 = vpop.xlane.xlu0 %2102 }
 0xa83   : > { %v2117_v25 = vmul.f32 0.03125, %v2097_v4  ;;  %v2119_v28 = vmul.f32 0.03125, %v2103_v6  ;;  %v2146_v41 = vsel %vm483_vm2, %v2134_v10, 0.0  ;;  %v2132_v46 = vmul.f32 %v3773_v3, %v3773_v3 }
 0xa84   : > { %2147 = vadd.xlane.f32.xlu1 %v2146_v41 }
 0xa85   : > { %v3780_v49 = vsub.f32 %v2065_v27, %v2117_v25  ;;  %v3782_v37 = vsub.f32 %v2073_v24, %v2119_v28  ;;  %v2140_v7 = vsel %vm483_vm2, %v2132_v46, 0.0  ;;  %v2550_v25 = vld [vmem:[%s3876_s10 + $0x1] ss:$0 sm:$0xff] }
 0xa86   : > { %v2112_v11 = vpop.xlane.xlu1 %2111 }
 0xa87   : > { %v2122_v12 = vmul.f32 0.03125, %v2112_v11  ;;  %v2106_v13 = vpop.xlane.xlu0 %2105  ;;  %v2135_v45 = vmul.f32 %v3782_v37, %v3782_v37  ;;  %v2133_v60 = vmul.f32 %v3780_v49, %v3780_v49 }
 0xa88   : > { %v2120_v57 = vmul.f32 0.03125, %v2106_v13  ;;  %2141 = vadd.xlane.f32.xlu1 %v2140_v7 }
 0xa89   : > { %v2149_v59 = vsel %vm483_vm2, %v2135_v45, 0.0  ;;  %v3790_v39 = vsub.f32 %v2086_v36, %v2122_v12  ;;  %v2143_v2 = vsel %vm483_vm2, %v2133_v60, 0.0  ;;  %v2233_v45 = vstv %s2551_s20 }
 0xa8a   : > { %v3792_v14 = vsub.f32 %v2078_v22, %v2120_v57  ;;  %2150 = vadd.xlane.f32.xlu0 %v2149_v59 }
 0xa8b   : > { %v2109_v15 = vpop.xlane.xlu0 %2108  ;;  %v2138_v17 = vmul.f32 %v3790_v39, %v3790_v39 }
 0xa8c   : > { %v2121_v1 = vmul.f32 0.03125, %v2109_v15  ;;  %v2136_v16 = vmul.f32 %v3792_v14, %v3792_v14 }
 0xa8d   : > { %v2158_v52 = vsel %vm483_vm2, %v2138_v17, 0.0 }
 0xa8e   : > { %v3797_v61 = vsub.f32 %v2081_v32, %v2121_v1  ;;  %2144 = vadd.xlane.f32.xlu0 %v2143_v2  ;;  %v2152_v54 = vsel %vm483_vm2, %v2136_v16, 0.0 }
 0xa8f   : > { %2153 = vadd.xlane.f32.xlu1 %v2152_v54  ;;  %v2115_v40 = vpop.xlane.xlu0 %2114 }
 0xa90   : > { %v2123_v63 = vmul.f32 0.03125, %v2115_v40  ;;  %v2137_v18 = vmul.f32 %v3797_v61, %v3797_v61 }
 0xa92   : > { %v3804_v8 = vsub.f32 %v2089_v30, %v2123_v63  ;;  %v2155_v19 = vsel %vm483_vm2, %v2137_v18, 0.0 }
 0xa93   : > { %2159 = vadd.xlane.f32.xlu1 %v2158_v52  ;;  %2156 = vadd.xlane.f32.xlu0 %v2155_v19 }
 0xa94   : > { %v2139_v48 = vmul.f32 %v3804_v8, %v3804_v8 }
 0xa96   : > { %v2161_v20 = vsel %vm483_vm2, %v2139_v48, 0.0 }
 0xa97   : > { %2162 = vadd.xlane.f32.xlu0 %v2161_v20  ;;  %v2993_v20 = vld [vmem:[#allocation2 + $0x10] sm:$0xff] }
 0xb0d   : > { %v2148_v24 = vpop.xlane.xlu1 %2147 }
 0xb0e   : > { %v2166_v62 = vmul.f32 0.03125, %v2148_v24 }
 0xb10   : > { %v2174_v26 = vadd.f32 1e-08, %v2166_v62 }
 0xb11   : > { %v2142_v27 = vpop.xlane.xlu1 %2141 }
 0xb12   : > { %2977 = vrsqrt.f32 %v2174_v26  ;;  %v2164_v33 = vmul.f32 0.03125, %v2142_v27 }
 0xb13   : > { %v2151_v34 = vpop.xlane.xlu0 %2150 }
 0xb14   : > { %v2172_v35 = vadd.f32 1e-08, %v2164_v33  ;;  %v2167_v36 = vmul.f32 0.03125, %v2151_v34 }
 0xb16   : > { %2979 = vrsqrt.f32 %v2172_v35  ;;  %v2175_v38 = vadd.f32 1e-08, %v2167_v36 }
 0xb17   : > { %v2145_v22 = vpop.xlane.xlu0 %2144 }
 0xb18   : > { %2981 = vrsqrt.f32 %v2175_v38  ;;  %v2165_v43 = vmul.f32 0.03125, %v2145_v22  ;;  %v2154_v44 = vpop.xlane.xlu1 %2153 }
 0xb19   : > { %v2168_v21 = vmul.f32 0.03125, %v2154_v44 }
 0xb1a   : > { %v2173_v31 = vadd.f32 1e-08, %v2165_v43 }
 0xb1b   : > { %v2176_v32 = vadd.f32 1e-08, %v2168_v21  ;;  %v2994_v21 = vld [vmem:[#allocation2 + $0x18] sm:$0xff] }
 0xb1c   : > { %2983 = vrsqrt.f32 %v2173_v31  ;;  %v2160_v30 = vpop.xlane.xlu1 %2159  ;;  %v2157_v50 = vpop.xlane.xlu0 %2156 }
 0xb1d   : > { %2985 = vrsqrt.f32 %v2176_v32  ;;  %v2170_v51 = vmul.f32 0.03125, %v2160_v30  ;;  %v2169_v29 = vmul.f32 0.03125, %v2157_v50 }
 0xb1f   : > { %v2978_v58 = vpop.eup %2977  ;;  %v2178_v0 = vadd.f32 1e-08, %v2170_v51  ;;  %v2177_v10 = vadd.f32 1e-08, %v2169_v29 }
 0xb20   : > { %v2190_v4 = vmul.f32 %v2978_v58, %v3771_v47  ;;  %v2163_v6 = vpop.xlane.xlu0 %2162 }
 0xb21   : > { %2987 = vrsqrt.f32 %v2178_v0  ;;  %v2171_v28 = vmul.f32 0.03125, %v2163_v6  ;;  %v2247_v0 = vld [vmem:[#allocation2 + $0x38] sm:$0xff] }
 0xb22   : > { %v2204_v41 = vmul.f32 %v2549_v42, %v2190_v4  ;;  %2989 = vrsqrt.f32 %v2177_v10 }
 0xb23   : > { %v2980_v46 = vpop.eup %2979  ;;  %v2179_v11 = vadd.f32 1e-08, %v2171_v28 }
 0xb24   : > { %v2218_v12 = vadd.f32 %v2550_v25, %v2204_v41  ;;  %v2188_v13 = vmul.f32 %v2980_v46, %v3773_v3 }
 0xb25   : > { %v2982_v7 = vpop.eup %2981  ;;  %2991 = vrsqrt.f32 %v2179_v11 }
 0xb26   : > { %v2226_v57 = vmax.f32 %v2218_v12, 0.0  ;;  %v2202_v59 = vmul.f32 %v2549_v42, %v2188_v13  ;;  %v2191_v47 = vmul.f32 %v2982_v7, %v3782_v37 }
 0xb28   : > { %v2236_v60 = vmul.f32 %v2233_v45, %v2226_v57  ;;  %v2216_v15 = vadd.f32 %v2550_v25, %v2202_v59  ;;  %v2205_v1 = vmul.f32 %v2549_v42, %v2191_v47  ;;  %v2552_v59 = vld [vmem:[%s3879_s13] ss:$0 sm:$0xff] }
 0xb29   : > { %v2984_v16 = vpop.eup %2983 }
 0xb2a   : > { %v2986_v2 = vpop.eup %2985  ;;  %v2252_v54 = vadd.f32 %v2236_v60, %v3572_v56  ;;  %v2224_v17 = vmax.f32 %v2216_v15, 0.0  ;;  %v2219_v40 = vadd.f32 %v2550_v25, %v2205_v1  ;;  %v2189_v63 = vmul.f32 %v2984_v16, %v3780_v49 }
 0xb2b   : > { %v2192_v3 = vmul.f32 %v2986_v2, %v3792_v14 }
 0xb2c   : > { %2260 = vst.msk [vmem:[#allocation2 + $0x20] sm:$0xff] %vm483_vm2, %v2252_v54  ;;  %v2234_v18 = vmul.f32 %v2233_v45, %v2224_v17  ;;  %v2227_v52 = vmax.f32 %v2219_v40, 0.0  ;;  %v2203_v19 = vmul.f32 %v2549_v42, %v2189_v63 }
 0xb2d   : > { %v2206_v48 = vmul.f32 %v2549_v42, %v2192_v3 }
 0xb2e   : > { %v2988_v37 = vpop.eup %2987  ;;  %v2250_v9 = vadd.f32 %v2993_v20, %v2234_v18  ;;  %v2237_v23 = vmul.f32 %v2233_v45, %v2227_v52  ;;  %v2217_v24 = vadd.f32 %v2550_v25, %v2203_v19 }
 0xb2f   : > { %v2990_v62 = vpop.eup %2989  ;;  %v2220_v26 = vadd.f32 %v2550_v25, %v2206_v48  ;;  %v2194_v56 = vmul.f32 %v2988_v37, %v3790_v39 }
 0xb30   : > { %2258 = vst.msk [vmem:[#allocation2 + $0x10] sm:$0xff] %vm483_vm2, %v2250_v9  ;;  %v2253_v49 = vadd.f32 %v2237_v23, %v3583_v5  ;;  %v2225_v14 = vmax.f32 %v2217_v24, 0.0  ;;  %v2193_v27 = vmul.f32 %v2990_v62, %v3797_v61 }
 0xb31   : > { %v2228_v33 = vmax.f32 %v2220_v26, 0.0  ;;  %v2208_v34 = vmul.f32 %v2549_v42, %v2194_v56 }
 0xb32   : > { %v2992_v35 = vpop.eup %2991  ;;  %2261 = vst.msk [vmem:[#allocation2 + $0x28] sm:$0xff] %vm483_vm2, %v2253_v49  ;;  %v2235_v36 = vmul.f32 %v2233_v45, %v2225_v14  ;;  %v2207_v38 = vmul.f32 %v2549_v42, %v2193_v27 }
 0xb33   : > { %v2238_v22 = vmul.f32 %v2233_v45, %v2228_v33  ;;  %v2222_v43 = vadd.f32 %v2550_v25, %v2208_v34  ;;  %v2195_v44 = vmul.f32 %v2992_v35, %v3804_v8  ;;  %v2268_v11 = vld [vmem:[#allocation2 + $0x20] sm:$0xff] }
 0xb34   : > { %v2251_v39 = vadd.f32 %v2994_v21, %v2235_v36  ;;  %v2221_v31 = vadd.f32 %v2550_v25, %v2207_v38 }
 0xb35   : > { %v2254_v32 = vadd.f32 %v2238_v22, %v3585_v53  ;;  %v2230_v5 = vmax.f32 %v2222_v43, 0.0  ;;  %v2209_v30 = vmul.f32 %v2549_v42, %v2195_v44  ;;  %v2249_v53 = vld [vmem:[#allocation2 + $0x48] sm:$0xff] }
 0xb36   : > { %2259 = vst.msk [vmem:[#allocation2 + $0x18] sm:$0xff] %vm483_vm2, %v2251_v39  ;;  %v2229_v61 = vmax.f32 %v2221_v31, 0.0 }
 0xb37   : > { %2262 = vst.msk [vmem:[#allocation2 + $0x30] sm:$0xff] %vm483_vm2, %v2254_v32  ;;  %v2240_v50 = vmul.f32 %v2233_v45, %v2230_v5  ;;  %v2223_v51 = vadd.f32 %v2550_v25, %v2209_v30  ;;  %v2266_v28 = vld [vmem:[#allocation2 + $0x10] sm:$0xff] }
 0xb38   : > { %v2239_v29 = vmul.f32 %v2233_v45, %v2229_v61 }
 0xb39   : > { %v2256_v58 = vadd.f32 %v2240_v50, %v3592_v55  ;;  %v2231_v10 = vmax.f32 %v2223_v51, 0.0  ;;  %v2269_v42 = vld [vmem:[#allocation2 + $0x28] sm:$0xff] }
 0xb3a   : > { %v2255_v8 = vadd.f32 %v2247_v0, %v2239_v29  ;;  %v2275_v25 = vpack.c.bf16 %v2269_v42, %v2268_v11 }
 0xb3b   : > { %2264 = vst.msk [vmem:[#allocation2 + $0x40] sm:$0xff] %vm483_vm2, %v2256_v58  ;;  %v2241_v4 = vmul.f32 %v2233_v45, %v2231_v10 }
 0xb3c   : > { %2263 = vst.msk [vmem:[#allocation2 + $0x38] sm:$0xff] %vm483_vm2, %v2255_v8 }
 0xb3d   : > { %v2257_v6 = vadd.f32 %v2249_v53, %v2241_v4  ;;  %v2267_v41 = vld [vmem:[#allocation2 + $0x18] sm:$0xff] }
 0xb3e   : > { %v2274_v46 = vpack.c.bf16 %v2267_v41, %v2266_v28  ;;  %v2270_v55 = vld [vmem:[#allocation2 + $0x30] sm:$0xff] }
 0xb3f   : > { %2265 = vst.msk [vmem:[#allocation2 + $0x48] sm:$0xff] %vm483_vm2, %v2257_v6 }
 0xb40   : > { %2708 = vmatprep.mubr.msk.bf16.mxu0 %vm483_vm2, %v2274_v46 }
 0xb41   : > { %2709 = vmatmul.mubr.msk.bf16.vlgmr.msra.gmra.mxu0 %vm483_vm2, %v2275_v25 }
 0xb42   : > { %v2272_v7 = vld [vmem:[#allocation2 + $0x40] sm:$0xff] }
 0xb43   : > { %v2271_v12 = vld [vmem:[#allocation2 + $0x38] sm:$0xff] }
 0xb44   : > { %v2276_v13 = vpack.c.bf16 %v2271_v12, %v2270_v55 }
 0xb46   : > { %2712 = vmatprep.mubr.msk.bf16.mxu1 %vm483_vm2, %v2276_v13  ;;  %v2273_v45 = vld [vmem:[#allocation2 + $0x48] sm:$0xff] }
 0xb47   : > { %v2277_v57 = vpack.c.bf16 %v2273_v45, %v2272_v7 }
 0xb49   : > { %2713 = vmatmul.mubr.msk.bf16.vlgmr.msra.gmra.mxu1 %vm483_vm2, %v2277_v57 }
 0xc01   : > { %v2710_v47 = vpop.f32.mrf.mxu0 }
 0xc02   : > { %v2356_v60 = vadd.f32 %v2710_v47, %v2552_v59 }
 0xc03   : > { %v2347_v15 = vpop.f32.mrf.mxu0 }
 0xc04   : > { %2380 = vst.msk [vmem:[%s481_s16 + $0x10] sm:$0xff] %vm483_vm2, %v2356_v60  ;;  %v2348_v1 = vadd.f32 %v2552_v59, %v2347_v15 }
 0xc05   : > { %v2711_v16 = vpop.f32.mrf.mxu0 }
 0xc06   : > { %2378 = vst.msk [vmem:[%s481_s16] sm:$0xff] %vm483_vm2, %v2348_v1  ;;  %v2359_v2 = vadd.f32 %v2711_v16, %v2552_v59 }
 0xc07   : > { %v2350_v54 = vpop.f32.mrf.mxu0 }
 0xc08   : > { %2381 = vst.msk [vmem:[%s481_s16 + $0x18] sm:$0xff] %vm483_vm2, %v2359_v2  ;;  %v2351_v17 = vadd.f32 %v2552_v59, %v2350_v54 }
 0xc09   : > { %v2714_v40 = vpop.f32.mrf.mxu1 }
 0xc0a   : > { %2379 = vst.msk [vmem:[%s481_s16 + $0x8] sm:$0xff] %vm483_vm2, %v2351_v17  ;;  %v2372_v63 = vadd.f32 %v2714_v40, %v2552_v59 }
 0xc0b   : > { %v2363_v3 = vpop.f32.mrf.mxu1 }
 0xc0c   : > { %2384 = vst.msk [vmem:[%s481_s16 + $0x30] sm:$0xff] %vm483_vm2, %v2372_v63  ;;  %v2364_v18 = vadd.f32 %v2552_v59, %v2363_v3 }
 0xc0d   : > { %v2715_v52 = vpop.f32.mrf.mxu1 }
 0xc0e   : > { %2382 = vst.msk [vmem:[%s481_s16 + $0x20] sm:$0xff] %vm483_vm2, %v2364_v18  ;;  %v2375_v19 = vadd.f32 %v2715_v52, %v2552_v59 }
 0xc0f   : > { %v2366_v48 = vpop.f32.mrf.mxu1 }
 0xc10   : > { %2385 = vst.msk [vmem:[%s481_s16 + $0x38] sm:$0xff] %vm483_vm2, %v2375_v19  ;;  %v2367_v37 = vadd.f32 %v2552_v59, %v2366_v48 }
 0xc12   : > { %2383 = vst.msk [vmem:[%s481_s16 + $0x28] sm:$0xff] %vm483_vm2, %v2367_v37 }
 0xc13 PF: > { %s25_s29 = sadd.s32 1, %s3020_s29  }
 0xc14   : > { %p22_p1 = scmp.ge.s32.totalorder %s25_s29, 4  }
 0xc16   :  { %24 = sbr.rel (!%p22_p1) target bundleno = 1 (0x1), region = 119 }
 0xc1b   :  { %2407 = vsyncpa [#allocation5], 1 }
 0xc1c   :  { %2409 = vsyncpa [#allocation5 + $0x1], 1 }

// kernel: vqvae_forward.5
= control target key start
LH: loop header
LB: loop body
LE: loop exit
PB: predicated region body
PF: predicated region fallthrough
CT: control target
= control target key end

     0   :  { %19 = vsyncpa [#allocation5], 0  ;;  %s3112_s29 = smov 0   ;;  %s3886_s0 = inlined_call_operand.vmem [shape: f32[2,64,32], index: 0, kind: input, shape index: {}]   ;;  %s3887_s1 = inlined_call_operand.vmem [shape: bf16[2,96,32], index: 1, kind: input, shape index: {}]   ;;  %s3888_s2 = inlined_call_operand.vmem [shape: f32[2,1,32], index: 2, kind: input, shape index: {}]   ;;  %s3889_s3 = inlined_call_operand.vmem [shape: f32[2,1,32], index: 3, kind: input, shape index: {}]   ;;  %s3890_s4 = inlined_call_operand.vmem [shape: f32[2,1,32], index: 4, kind: input, shape index: {}]   ;;  %s3891_s5 = inlined_call_operand.vmem [shape: bf16[2,96,32], index: 5, kind: input, shape index: {}]   ;;  %s3892_s6 = inlined_call_operand.vmem [shape: f32[2,1,32], index: 6, kind: input, shape index: {}]   ;;  %s3893_s7 = inlined_call_operand.vmem [shape: f32[2,1,32], index: 7, kind: input, shape index: {}]   ;;  %s3894_s8 = inlined_call_operand.vmem [shape: f32[2,1,32], index: 8, kind: input, shape index: {}]   ;;  %s3895_s9 = inlined_call_operand.vmem [shape: f32[2,1], index: 9, kind: input, shape index: {}]   ;;  %s3896_s10 = inlined_call_operand.vmem [shape: bf16[32,32], index: 10, kind: input, shape index: {}]   ;;  %s3897_s11 = inlined_call_operand.vmem [shape: f32[1,32], index: 11, kind: input, shape index: {}]   ;;  %s3898_s12 = inlined_call_operand.vmem [shape: bf16[32,4], index: 12, kind: input, shape index: {}]   ;;  %s3899_s13 = inlined_call_operand.vmem [shape: f32[1,4], index: 13, kind: input, shape index: {}]   ;;  %s3900_s14 = inlined_call_operand.vmem [shape: f32[2,64,4], index: 14, kind: output, shape index: {}]  }
   0x1 LB: > { %s3118_s30 = sadd.s32 4294967295, %s3031_s29   ;;  %p2466_p0 = scmp.ge.s32.totalorder %s3031_s29, 1  ;;  %s3031_s29 = sphi %s3112_s29, %s25_s29  }
   0x2   : > { %p355_p1 = scmp.lt.s32.totalorder %s3031_s29, 3  ;;  %s392_s17 = sshll.u32 %s3895_s9, 4  ;;  %s393_s17 = int_to_ptr.vmem [resolvable:$true] %s392_s17 }
   0x3   : > { %p2740_p3 = scmp.eq.s32.totalorder %s3118_s30, 0  ;;  %s3006_s19 = scalar_lea.vmem %s393_s17, 32 }
   0x4   : > { %p3125_p2 = pnand %p2466_p0, %p355_p1  ;;  %p3007_p6 = scmp.ne.s32.totalorder %s393_s17, %s3006_s19 }
   0x5   : > { %p3014_p10 = scmp.lt.s32.totalorder %s393_s17, %s393_s17  ;;  %p3015_p11 = scmp.lt.s32.totalorder %s3006_s19, %s3006_s19 }
   0x6   : > { %p2736_p4 = pneg %p3125_p2 }
   0x7   : > { %p3016_p12 = por %p3015_p11, %p3014_p10 }
   0x8   : > { %p2737_p5 = pnand %p2740_p3, %p2736_p4 }
   0xa   : > { %p3008_p7 = pneg %p2737_p5 }
   0xc   : > { %p3009_p8 = pnand %p3008_p7, %p3007_p6 }
   0xe   : > { %p3010_p9 = pneg %p3009_p8 }
  0x10   : > { %p3017_p13 = pnand %p3016_p12, %p3010_p9 }
  0x12   : > { %3020 = shalt.err (!%p3017_p13)
}
  0x13   : > { %s3033_s20 = smov [#allocation4]   ;;  %425 = sbr.rel (%p3125_p2) target bundleno = 3090 (0xc12), region = 76 }
  0x14   : > { %2739 = dma.vmem_to_smem (!%p2737_p5), %s393_s17, 32, %s3033_s20, [#allocation5]  }
  0x18   : > { %3026 = dma.done.wait (%p2740_p3), [#allocation5], 32  }
  0x19   : > { %3028 = vsyncadd (%p2740_p3), [#allocation5], 4294967264 }
  0x1a   : > { %431 = sfence }
  0x1b   : > { %p472_p0 = scmp.lt.s32.totalorder %s3118_s30, 1  ;;  %vm483_vm0 = vcmask 261120   ;;  %v3034_v0 = vmov 0.0   ;;  %v2914_v1 = vld [vmem:[%s3887_s1 + $0x28] sm:$0xff]   ;;  %v2915_v2 = vld [vmem:[%s3887_s1 + $0x20] sm:$0xff]   ;;  %v2916_v11 = vld [vmem:[%s3887_s1 + $0x18] sm:$0xff]  }
  0x1c   : > { %485 = vst.msk [vmem:[#allocation2 + $0x8] sm:$0xff] %vm483_vm0, %v3034_v0  ;;  %486 = vst.msk [vmem:[#allocation3] sm:$0xff] %vm483_vm0, %v3034_v0  ;;  %2628 = vmatprep.subr.bf16.mxu0 %v2914_v1  ;;  %v2917_v13 = vld [vmem:[%s3887_s1 + $0x10] sm:$0xff]   ;;  %vm537_vm1 = vcmask 1046528   ;;  %vm582_vm2 = vcmask 1045504   ;;  %v2918_v34 = vld [vmem:[%s3887_s1 + $0x8] sm:$0xff]  }
  0x1d   : > { %487 = vst.msk [vmem:[#allocation3 + $0x8] sm:$0xff] %vm483_vm0, %v3034_v0  ;;  %s3903_s30 = smov (!%p472_p0, %s3118_s30), 1  ;;  %2629 = vmatpush3.bf16.msra.mxu0 %v2914_v1  ;;  %v2919_v42 = vld [vmem:[%s3887_s1] sm:$0xff]   ;;  %s3035_s23 = smov 32   ;;  %vm634_vm3 = vcmask 523264   ;;  %vm660_vm4 = vcmask 1044480  }
  0x1e   : > { %s2574_s25 = sshll.u32 %s3903_s30, 6  ;;  %2630 = vmatprep.subr.bf16.mxu0 %v2915_v2  ;;  %s3036_s24 = smov 64   ;;  %vm706_vm5 = vcmask 785408   ;;  %vm1010_vm6 = vcmask 1043456   ;;  %vm2388_vm7 = vcmask 31744  }
  0x1f   : > { %s476_s28 = scalar_lea.vmem %s3886_s0, %s2574_s25  ;;  %s1350_s16 = sld [smem:[#allocation4]] }
  0x20   : > { %v491_v3 = vld [vmem:[%s476_s28 + $0x18] sm:$0xff]  ;;  %v492_v4 = vld [vmem:[%s476_s28 + $0x20] sm:$0xff]  ;;  %v493_v5 = vld [vmem:[%s476_s28 + $0x28] sm:$0xff]  ;;  %s2557_s18 = sld [smem:[#allocation4 + $0x80]] }
  0x21   : > { %499 = vst.msk [vmem:[#allocation2 + $0x28] sm:$0xff] %vm483_vm0, %v491_v3  ;;  %500 = vst.msk [vmem:[#allocation2 + $0x30] sm:$0xff] %vm483_vm0, %v492_v4  ;;  %v488_v6 = vld [vmem:[%s476_s28] sm:$0xff]  ;;  %v489_v7 = vld [vmem:[%s476_s28 + $0x8] sm:$0xff]  ;;  %2631 = vmatpush3.bf16.msra.mxu0 %v2915_v2 }
  0x22   : > { %501 = vst.msk [vmem:[#allocation2 + $0x38] sm:$0xff] %vm483_vm0, %v493_v5  ;;  %v490_v8 = vld [vmem:[%s476_s28 + $0x10] sm:$0xff]  ;;  %496 = vst.msk [vmem:[#allocation2 + $0x10] sm:$0xff] %vm483_vm0, %v488_v6  ;;  %v495_v10 = vld [vmem:[%s476_s28 + $0x38] sm:$0xff]  ;;  %2632 = vmatprep.subr.bf16.mxu0 %v2916_v11 }
  0x23   : > { %497 = vst.msk [vmem:[#allocation2 + $0x18] sm:$0xff] %vm483_vm0, %v489_v7  ;;  %498 = vst.msk [vmem:[#allocation2 + $0x20] sm:$0xff] %vm483_vm0, %v490_v8  ;;  %v494_v9 = vld [vmem:[%s476_s28 + $0x30] sm:$0xff]  ;;  %v3170_v12 = vld [vmem:[#allocation2 + $0x8] sm:$0xff] }
  0x24   : > { %502 = vst.msk [vmem:[#allocation2 + $0x40] sm:$0xff] %vm483_vm0, %v494_v9  ;;  %503 = vst.msk [vmem:[#allocation2 + $0x48] sm:$0xff] %vm483_vm0, %v495_v10  ;;  %v538_v17 = vrot.slane %v3170_v12, 1 }
  0x25   : > { %2633 = vmatpush3.bf16.msra.mxu0 %v2916_v11 }
  0x26   : > { %2634 = vmatprep.subr.bf16.mxu0 %v2917_v13 }
  0x28   : > { %v3175_v14 = vld [vmem:[#allocation2 + $0x28] sm:$0xff]  ;;  %v3177_v15 = vld [vmem:[#allocation2 + $0x30] sm:$0xff] }
  0x29   : > { %v3179_v16 = vld [vmem:[#allocation2 + $0x38] sm:$0xff]  ;;  %v545_v18 = vrot.slane %v3175_v14, 1  ;;  %v547_v19 = vrot.slane %v3177_v15, 1  ;;  %v3185_v21 = vld [vmem:[#allocation2 + $0x10] sm:$0xff]  ;;  %2635 = vmatpush3.bf16.msra.mxu0 %v2917_v13  ;;  %v588_v32 = vrot.slane %v3175_v14, 2  ;;  %v590_v44 = vrot.slane %v3177_v15, 2 }
  0x2a   : > { %v549_v20 = vrot.slane %v3179_v16, 1  ;;  %v3187_v22 = vld [vmem:[#allocation2 + $0x18] sm:$0xff]  ;;  %v3189_v23 = vld [vmem:[#allocation2 + $0x20] sm:$0xff]  ;;  %v539_v24 = vrot.slane %v3185_v21, 1  ;;  %v583_v26 = vrot.slane %v3185_v21, 2  ;;  %2636 = vmatprep.subr.bf16.mxu0 %v2918_v34  ;;  %v592_v45 = vrot.slane %v3179_v16, 2 }
  0x2b   : > { %v541_v25 = vrot.slane %v3187_v22, 1  ;;  %v584_v27 = vrot.slane %v3187_v22, 2  ;;  %v3195_v28 = vld [vmem:[#allocation2 + $0x40] sm:$0xff]  ;;  %v548_v29 = vsel %vm537_vm1, %v545_v18, %v547_v19  ;;  %v543_v31 = vrot.slane %v3189_v23, 1  ;;  %v3201_v33 = vld [vmem:[#allocation2 + $0x48] sm:$0xff] }
  0x2c   : > { %v550_v30 = vsel %vm537_vm1, %v547_v19, %v549_v20  ;;  %v540_v36 = vsel %vm537_vm1, %v538_v17, %v539_v24  ;;  %v586_v46 = vrot.slane %v3189_v23, 2  ;;  %v551_v48 = vrot.slane %v3195_v28, 1 }
  0x2d   : > { %v2764_v35 = vpack.i.bf16 %v550_v30, %v548_v29  ;;  %v542_v37 = vsel %vm537_vm1, %v539_v24, %v541_v25  ;;  %v585_v38 = vsel %vm582_vm2, %v583_v26, %v584_v27  ;;  %v544_v40 = vsel %vm537_vm1, %v541_v25, %v543_v31  ;;  %2637 = vmatpush3.bf16.msra.mxu0 %v2918_v34 }
  0x2e   : > { %v2754_v39 = vpack.i.bf16 %v542_v37, %v540_v36  ;;  %v546_v41 = vsel %vm537_vm1, %v543_v31, %v545_v18  ;;  %v2769_v43 = vpack.i.bf16 %v585_v38, %v583_v26  ;;  %v553_v49 = vrot.slane %v3201_v33, 1  ;;  %2638 = vmatprep.subr.bf16.mxu0 %v2919_v42 }
  0x2f   : > { %2765 = vrot.lane.b32.xlu1 %v2764_v35, %s3035_s23  ;;  %v2759_v47 = vpack.i.bf16 %v546_v41, %v544_v40  ;;  %v591_v50 = vsel %vm582_vm2, %v588_v32, %v590_v44  ;;  %v593_v51 = vsel %vm582_vm2, %v590_v44, %v592_v45  ;;  %v587_v52 = vsel %vm582_vm2, %v584_v27, %v586_v46 }
  0x30   : > { %2755 = vrot.lane.b32.xlu0 %v2754_v39, %s3035_s23  ;;  %v589_v53 = vsel %vm582_vm2, %v586_v46, %v588_v32  ;;  %v2779_v54 = vpack.i.bf16 %v593_v51, %v591_v50  ;;  %v594_v56 = vrot.slane %v3195_v28, 2  ;;  %v596_v57 = vrot.slane %v3201_v33, 2 }
  0x31   : > { %2639 = vmatpush3.bf16.msra.mxu0 %v2919_v42  ;;  %v2774_v55 = vpack.i.bf16 %v589_v53, %v587_v52  ;;  %v552_v58 = vsel %vm537_vm1, %v549_v20, %v551_v48  ;;  %v554_v59 = vsel %vm537_vm1, %v551_v48, %v553_v49 }
  0x32   : > { %v2784_v60 = vpack.i.bf16 %v554_v59, %v552_v58  ;;  %v595_v61 = vsel %vm582_vm2, %v592_v45, %v594_v56  ;;  %v597_v62 = vsel %vm582_vm2, %v594_v56, %v596_v57  ;;  %v2475_v58 = vld [vmem:[%s3888_s2] ss:$0 sm:$0xff] }
  0x33   : > { %2770 = vrot.lane.b32.xlu1 %v2769_v43, %s3036_s24  ;;  %v2789_v63 = vpack.i.bf16 %v597_v62, %v595_v61 }
  0x34   : > { %2760 = vrot.lane.b32.xlu0 %v2759_v47, %s3035_s23 }
  0x37   : > { %2780 = vrot.lane.b32.xlu1 %v2779_v54, %s3036_s24 }
  0x38   : > { %2775 = vrot.lane.b32.xlu0 %v2774_v55, %s3036_s24 }
  0x3b   : > { %571 = vrot.lane.b32.xlu1 %v553_v49, %s3035_s23 }
  0x3c   : > { %2785 = vrot.lane.b32.xlu0 %v2784_v60, %s3035_s23 }
  0x3f   : > { %614 = vrot.lane.b32.xlu1 %v596_v57, %s3036_s24 }
  0x40   : > { %2790 = vrot.lane.b32.xlu0 %v2789_v63, %s3036_s24 }
  0xa1   : > { %v2766_v0 = vpop.permute.xlu1 %2765 }
  0xa2   : > { %v2756_v1 = vpop.permute.xlu0 %2755  ;;  %v2768_v5 = vunpack.i.h.bf16 %v2766_v0  ;;  %v2767_v9 = vunpack.i.l.bf16 %v2766_v0 }
  0xa3   : > { %v2758_v2 = vunpack.i.h.bf16 %v2756_v1  ;;  %v2757_v3 = vunpack.i.l.bf16 %v2756_v1 }
  0xa4   : > { %v630_v24 = vsel %vm483_vm0, %v3177_v15, %v2768_v5  ;;  %v629_v29 = vsel %vm483_vm0, %v3175_v14, %v2767_v9 }
  0xa5   : > { %v2771_v4 = vpop.permute.xlu1 %2770  ;;  %v626_v11 = vsel %vm483_vm0, %v3185_v21, %v2758_v2  ;;  %v625_v13 = vsel %vm483_vm0, %v3170_v12, %v2757_v3 }
  0xa6   : > { %v2773_v6 = vunpack.i.h.bf16 %v2771_v4  ;;  %v2772_v7 = vunpack.i.l.bf16 %v2771_v4  ;;  %v2761_v8 = vpop.permute.xlu0 %2760 }
  0xa7   : > { %v2763_v10 = vunpack.i.h.bf16 %v2761_v8  ;;  %v2762_v17 = vunpack.i.l.bf16 %v2761_v8 }
  0xa8   : > { %v635_v18 = vsel %vm634_vm3, %v625_v13, %v2772_v7  ;;  %v636_v19 = vsel %vm634_vm3, %v626_v11, %v2773_v6 }
  0xa9   : > { %v2781_v20 = vpop.permute.xlu1 %2780  ;;  %v628_v21 = vsel %vm483_vm0, %v3189_v23, %v2763_v10  ;;  %v627_v31 = vsel %vm483_vm0, %v3187_v22, %v2762_v17  ;;  %v644_v35 = vpack.c.bf16 %v636_v19, %v635_v18 }
  0xaa   : > { %v2783_v25 = vunpack.i.h.bf16 %v2781_v20  ;;  %v2782_v26 = vunpack.i.l.bf16 %v2781_v20  ;;  %v2776_v27 = vpop.permute.xlu0 %2775 }
  0xab   : > { %v2778_v30 = vunpack.i.h.bf16 %v2776_v27  ;;  %v2777_v12 = vunpack.i.l.bf16 %v2776_v27  ;;  %v661_v42 = vrot.slane %v644_v35, 3 }
  0xac   : > { %v640_v32 = vsel %vm634_vm3, %v630_v24, %v2783_v25  ;;  %v639_v34 = vsel %vm634_vm3, %v629_v29, %v2782_v26 }
  0xad   : > { %v646_v15 = vpack.c.bf16 %v640_v32, %v639_v34  ;;  %v637_v36 = vsel %vm634_vm3, %v627_v31, %v2777_v12  ;;  %v638_v37 = vsel %vm634_vm3, %v628_v21, %v2778_v30  ;;  %v572_v38 = vpop.permute.xlu1 %571 }
  0xae   : > { %v2786_v14 = vpop.permute.xlu0 %2785  ;;  %v645_v39 = vpack.c.bf16 %v638_v37, %v637_v36  ;;  %v633_v22 = vsel %vm483_vm0, %v3201_v33, %v572_v38 }
  0xaf   : > { %v664_v23 = vrot.slane %v646_v15, 3  ;;  %v2788_v40 = vunpack.i.h.bf16 %v2786_v14  ;;  %v2787_v41 = vunpack.i.l.bf16 %v2786_v14 }
  0xb0   : > { %v662_v43 = vrot.slane %v645_v39, 3 }
  0xb1   : > { %v632_v44 = vsel %vm483_vm0, %v3195_v28, %v2788_v40  ;;  %v615_v45 = vpop.permute.xlu1 %614  ;;  %v631_v46 = vsel %vm483_vm0, %v3179_v16, %v2787_v41 }
  0xb2   : > { %v2791_v47 = vpop.permute.xlu0 %2790  ;;  %v663_v48 = vsel %vm660_vm4, %v661_v42, %v662_v43  ;;  %v665_v49 = vsel %vm660_vm4, %v662_v43, %v664_v23  ;;  %v643_v50 = vsel %vm634_vm3, %v633_v22, %v615_v45 }
  0xb3   : > { %v2793_v51 = vunpack.i.h.bf16 %v2791_v47  ;;  %v2792_v52 = vunpack.i.l.bf16 %v2791_v47  ;;  %2640 = vmatprep.mubr.msk.bf16.mxu0 %vm706_vm5, %v663_v48  ;;  %v648_v33 = vpack.c.bf16 %v643_v50, %v643_v50 }
  0xb4   : > { %2641 = vmatmul.mubr.msk.bf16.vlgmr.msra.gmra.mxu0 %vm706_vm5, %v665_v49 }
  0xb5   : > { %v641_v28 = vsel %vm634_vm3, %v631_v46, %v2792_v52  ;;  %v642_v53 = vsel %vm634_vm3, %v632_v44, %v2793_v51  ;;  %v668_v16 = vrot.slane %v648_v33, 3 }
  0xb6   : > { %v647_v54 = vpack.c.bf16 %v642_v53, %v641_v28 }
  0xb8   : > { %v666_v55 = vrot.slane %v647_v54, 3 }
  0xba   : > { %v667_v56 = vsel %vm660_vm4, %v664_v23, %v666_v55  ;;  %v669_v57 = vsel %vm660_vm4, %v666_v55, %v668_v16 }
  0xbb   : > { %2644 = vmatprep.mubr.msk.bf16.mxu0 %vm706_vm5, %v667_v56 }
  0xbc   : > { %2645 = vmatmul.mubr.msk.bf16.gmra.mxu0 %vm706_vm5, %v669_v57 }
 0x174   : > { %v2642_v59 = vpop.f32.mrf.mxu0 }
 0x175   : > { %v762_v60 = vadd.f32 %v2642_v59, %v2475_v58  ;;  %v2920_v59 = vld [vmem:[%s3891_s5 + $0x28] sm:$0xff]  }
 0x176   : > { %v753_v61 = vpop.f32.mrf.mxu0  ;;  %2648 = vmatprep.subr.bf16.mxu1 %v2920_v59 }
 0x177   : > { %v754_v62 = vadd.f32 %v2475_v58, %v753_v61  ;;  %v790_v63 = vsel %vm483_vm0, %v762_v60, 0.0  ;;  %2649 = vmatpush3.bf16.msra.mxu1 %v2920_v59 }
 0x178   : > { %791 = vadd.xlane.f32.xlu0 %v790_v63  ;;  %v2643_v0 = vpop.f32.mrf.mxu0 }
 0x179   : > { %v765_v2 = vadd.f32 %v2643_v0, %v2475_v58  ;;  %v784_v4 = vsel %vm483_vm0, %v754_v62, 0.0 }
 0x17a   : > { %v756_v1 = vpop.f32.mrf.mxu0 }
 0x17b   : > { %v757_v3 = vadd.f32 %v2475_v58, %v756_v1  ;;  %v793_v9 = vsel %vm483_vm0, %v765_v2, 0.0 }
 0x17c   : > { %v2646_v5 = vpop.f32.mrf.mxu0  ;;  %785 = vadd.xlane.f32.xlu0 %v784_v4 }
 0x17d   : > { %v787_v6 = vsel %vm483_vm0, %v757_v3, 0.0  ;;  %v778_v11 = vadd.f32 %v2646_v5, %v2475_v58 }
 0x17e   : > { %v769_v7 = vpop.f32.mrf.mxu0  ;;  %788 = vadd.xlane.f32.xlu1 %v787_v6 }
 0x17f   : > { %v770_v8 = vadd.f32 %v2475_v58, %v769_v7  ;;  %v802_v20 = vsel %vm483_vm0, %v778_v11, 0.0 }
 0x180   : > { %v2647_v10 = vpop.f32.mrf.mxu0  ;;  %794 = vadd.xlane.f32.xlu0 %v793_v9 }
 0x181   : > { %v796_v13 = vsel %vm483_vm0, %v770_v8, 0.0  ;;  %v781_v19 = vadd.f32 %v2647_v10, %v2475_v58 }
 0x182   : > { %v772_v17 = vpop.f32.mrf.mxu0  ;;  %797 = vadd.xlane.f32.xlu1 %v796_v13 }
 0x183   : > { %v773_v18 = vadd.f32 %v2475_v58, %v772_v17  ;;  %v805_v25 = vsel %vm483_vm0, %v781_v19, 0.0 }
 0x185   : > { %v799_v24 = vsel %vm483_vm0, %v773_v18, 0.0 }
 0x186   : > { %803 = vadd.xlane.f32.xlu1 %v802_v20  ;;  %800 = vadd.xlane.f32.xlu0 %v799_v24  ;;  %v2486_v24 = vld [vmem:[%s3889_s3] ss:$0 sm:$0xff] }
 0x18a   : > { %806 = vadd.xlane.f32.xlu0 %v805_v25 }
 0x201   : > { %v792_v26 = vpop.xlane.xlu0 %791 }
 0x202   : > { %v811_v27 = vmul.f32 0.03125, %v792_v26 }
 0x204   : > { %v3285_v29 = vsub.f32 %v762_v60, %v811_v27  ;;  %v2487_v27 = vld [vmem:[%s3890_s4] ss:$0 sm:$0xff] }
 0x205   : > { %v786_v21 = vpop.xlane.xlu0 %785 }
 0x206   : > { %v809_v30 = vmul.f32 0.03125, %v786_v21  ;;  %v827_v12 = vmul.f32 %v3285_v29, %v3285_v29 }
 0x207   : > { %v789_v31 = vpop.xlane.xlu1 %788 }
 0x208   : > { %v3289_v32 = vsub.f32 %v754_v62, %v809_v30  ;;  %v810_v34 = vmul.f32 0.03125, %v789_v31  ;;  %v839_v35 = vsel %vm483_vm0, %v827_v12, 0.0 }
 0x209   : > { %840 = vadd.xlane.f32.xlu1 %v839_v35  ;;  %v795_v15 = vpop.xlane.xlu0 %794 }
 0x20a   : > { %v812_v36 = vmul.f32 0.03125, %v795_v15  ;;  %v825_v37 = vmul.f32 %v3289_v32, %v3289_v32  ;;  %v3294_v38 = vsub.f32 %v757_v3, %v810_v34 }
 0x20b   : > { %v798_v14 = vpop.xlane.xlu1 %797 }
 0x20c   : > { %v3296_v39 = vsub.f32 %v765_v2, %v812_v36  ;;  %v813_v23 = vmul.f32 0.03125, %v798_v14  ;;  %v833_v40 = vsel %vm483_vm0, %v825_v37, 0.0  ;;  %v826_v44 = vmul.f32 %v3294_v38, %v3294_v38 }
 0x20d   : > { %834 = vadd.xlane.f32.xlu1 %v833_v40 }
 0x20e   : > { %v3299_v41 = vsub.f32 %v770_v8, %v813_v23  ;;  %v828_v22 = vmul.f32 %v3296_v39, %v3296_v39  ;;  %v836_v28 = vsel %vm483_vm0, %v826_v44, 0.0 }
 0x20f   : > { %v804_v42 = vpop.xlane.xlu1 %803  ;;  %v801_v43 = vpop.xlane.xlu0 %800 }
 0x210   : > { %v815_v45 = vmul.f32 0.03125, %v804_v42  ;;  %v814_v46 = vmul.f32 0.03125, %v801_v43  ;;  %v842_v47 = vsel %vm483_vm0, %v828_v22, 0.0  ;;  %v829_v48 = vmul.f32 %v3299_v41, %v3299_v41 }
 0x211   : > { %843 = vadd.xlane.f32.xlu0 %v842_v47 }
 0x212   : > { %v3308_v49 = vsub.f32 %v778_v11, %v815_v45  ;;  %v3310_v50 = vsub.f32 %v773_v18, %v814_v46  ;;  %v845_v51 = vsel %vm483_vm0, %v829_v48, 0.0 }
 0x213   : > { %846 = vadd.xlane.f32.xlu1 %v845_v51  ;;  %v807_v52 = vpop.xlane.xlu0 %806 }
 0x214   : > { %v816_v33 = vmul.f32 0.03125, %v807_v52  ;;  %v831_v53 = vmul.f32 %v3308_v49, %v3308_v49  ;;  %v830_v54 = vmul.f32 %v3310_v50, %v3310_v50 }
 0x215   : > { %837 = vadd.xlane.f32.xlu0 %v836_v28 }
 0x216   : > { %v3318_v16 = vsub.f32 %v781_v19, %v816_v33  ;;  %v851_v55 = vsel %vm483_vm0, %v831_v53, 0.0  ;;  %v848_v56 = vsel %vm483_vm0, %v830_v54, 0.0 }
 0x217   : > { %852 = vadd.xlane.f32.xlu1 %v851_v55 }
 0x218   : > { %v832_v57 = vmul.f32 %v3318_v16, %v3318_v16 }
 0x219   : > { %849 = vadd.xlane.f32.xlu0 %v848_v56 }
 0x21a   : > { %v854_v58 = vsel %vm483_vm0, %v832_v57, 0.0 }
 0x21d   : > { %855 = vadd.xlane.f32.xlu0 %v854_v58 }
 0x292   : > { %v841_v60 = vpop.xlane.xlu1 %840 }
 0x293   : > { %v859_v61 = vmul.f32 0.03125, %v841_v60  ;;  %v2921_v60 = vld [vmem:[%s3891_s5 + $0x20] sm:$0xff]  }
 0x294   : > { %2650 = vmatprep.subr.bf16.mxu1 %v2921_v60 }
 0x295   : > { %v867_v62 = vadd.f32 1e-08, %v859_v61  ;;  %2651 = vmatpush3.bf16.msra.mxu1 %v2921_v60 }
 0x296   : > { %v835_v63 = vpop.xlane.xlu1 %834 }
 0x297   : > { %2942 = vrsqrt.f32 %v867_v62  ;;  %v857_v0 = vmul.f32 0.03125, %v835_v63  ;;  %v3351_v62 = vld [vmem:[#allocation3 + $0x8] sm:$0xff] }
 0x299   : > { %v865_v1 = vadd.f32 1e-08, %v857_v0 }
 0x29a   : > { %v844_v2 = vpop.xlane.xlu0 %843 }
 0x29b   : > { %2944 = vrsqrt.f32 %v865_v1  ;;  %v860_v3 = vmul.f32 0.03125, %v844_v2 }
 0x29c   : > { %v847_v4 = vpop.xlane.xlu1 %846 }
 0x29d   : > { %v868_v5 = vadd.f32 1e-08, %v860_v3  ;;  %v861_v6 = vmul.f32 0.03125, %v847_v4  ;;  %v966_v3 = vrot.slane %v3351_v62, 2 }
 0x29e   : > { %v838_v7 = vpop.xlane.xlu0 %837 }
 0x29f   : > { %2946 = vrsqrt.f32 %v868_v5  ;;  %v869_v8 = vadd.f32 1e-08, %v861_v6  ;;  %v858_v9 = vmul.f32 0.03125, %v838_v7 }
 0x2a0   : > { %v853_v10 = vpop.xlane.xlu1 %852 }
 0x2a1   : > { %2948 = vrsqrt.f32 %v869_v8  ;;  %v866_v11 = vadd.f32 1e-08, %v858_v9  ;;  %v863_v13 = vmul.f32 0.03125, %v853_v10 }
 0x2a2   : > { %v850_v17 = vpop.xlane.xlu0 %849 }
 0x2a3   : > { %2950 = vrsqrt.f32 %v866_v11  ;;  %v871_v18 = vadd.f32 1e-08, %v863_v13  ;;  %v862_v19 = vmul.f32 0.03125, %v850_v17  ;;  %v2923_v11 = vld [vmem:[%s3891_s5 + $0x10] sm:$0xff]  }
 0x2a4   : > { %v2943_v20 = vpop.eup %2942 }
 0x2a5   : > { %v883_v25 = vmul.f32 %v2943_v20, %v3285_v29  ;;  %2952 = vrsqrt.f32 %v871_v18  ;;  %v870_v26 = vadd.f32 1e-08, %v862_v19 }
 0x2a6   : > { %v856_v21 = vpop.xlane.xlu0 %855 }
 0x2a7   : > { %v897_v30 = vmul.f32 %v2486_v24, %v883_v25  ;;  %2954 = vrsqrt.f32 %v870_v26  ;;  %v864_v12 = vmul.f32 0.03125, %v856_v21 }
 0x2a8   : > { %v2945_v31 = vpop.eup %2944 }
 0x2a9   : > { %v911_v34 = vadd.f32 %v2487_v27, %v897_v30  ;;  %v881_v35 = vmul.f32 %v2945_v31, %v3289_v32  ;;  %v872_v15 = vadd.f32 1e-08, %v864_v12 }
 0x2ab   : > { %v919_v36 = vmax.f32 %v911_v34, 0.0  ;;  %v895_v37 = vmul.f32 %v2486_v24, %v881_v35  ;;  %2956 = vrsqrt.f32 %v872_v15  ;;  %v2924_v15 = vld [vmem:[%s3891_s5 + $0x8] sm:$0xff]  }
 0x2ac   : > { %v2947_v14 = vpop.eup %2946 }
 0x2ad   : > { %927 = vst.msk [vmem:[#allocation3 + $0x20] sm:$0xff] %vm483_vm0, %v919_v36  ;;  %v909_v29 = vadd.f32 %v2487_v27, %v895_v37  ;;  %v884_v23 = vmul.f32 %v2947_v14, %v3296_v39 }
 0x2ae   : > { %v2949_v40 = vpop.eup %2948 }
 0x2af   : > { %v917_v22 = vmax.f32 %v909_v29, 0.0  ;;  %v898_v42 = vmul.f32 %v2486_v24, %v884_v23  ;;  %v885_v43 = vmul.f32 %v2949_v40, %v3299_v41 }
 0x2b0   : > { %v2951_v44 = vpop.eup %2950 }
 0x2b1   : > { %925 = vst.msk [vmem:[#allocation3 + $0x10] sm:$0xff] %vm483_vm0, %v917_v22  ;;  %v912_v45 = vadd.f32 %v2487_v27, %v898_v42  ;;  %v899_v32 = vmul.f32 %v2486_v24, %v885_v43  ;;  %v882_v46 = vmul.f32 %v2951_v44, %v3294_v38 }
 0x2b2   : > { %v2953_v47 = vpop.eup %2952 }
 0x2b3   : > { %v920_v48 = vmax.f32 %v912_v45, 0.0  ;;  %v913_v51 = vadd.f32 %v2487_v27, %v899_v32  ;;  %v896_v52 = vmul.f32 %v2486_v24, %v882_v46  ;;  %v887_v33 = vmul.f32 %v2953_v47, %v3308_v49  ;;  %v2925_v45 = vld [vmem:[%s3891_s5] sm:$0xff]  }
 0x2b4   : > { %v2955_v28 = vpop.eup %2954  ;;  %v3361_v2 = vld [vmem:[#allocation3 + $0x20] sm:$0xff] }
 0x2b5   : > { %928 = vst.msk [vmem:[#allocation3 + $0x28] sm:$0xff] %vm483_vm0, %v920_v48  ;;  %v921_v39 = vmax.f32 %v913_v51, 0.0  ;;  %v910_v53 = vadd.f32 %v2487_v27, %v896_v52  ;;  %v901_v54 = vmul.f32 %v2486_v24, %v887_v33  ;;  %v886_v41 = vmul.f32 %v2955_v28, %v3310_v50 }
 0x2b6   : > { %v971_v9 = vrot.slane %v3361_v2, 2  ;;  %v1014_v17 = vrot.slane %v3361_v2, 4 }
 0x2b7   : > { %929 = vst.msk [vmem:[#allocation3 + $0x30] sm:$0xff] %vm483_vm0, %v921_v39  ;;  %v918_v55 = vmax.f32 %v910_v53, 0.0  ;;  %v915_v56 = vadd.f32 %v2487_v27, %v901_v54  ;;  %v900_v57 = vmul.f32 %v2486_v24, %v886_v41 }
 0x2b8   : > { %v2957_v38 = vpop.eup %2956  ;;  %v3353_v63 = vld [vmem:[#allocation3 + $0x10] sm:$0xff] }
 0x2b9   : > { %926 = vst.msk [vmem:[#allocation3 + $0x18] sm:$0xff] %vm483_vm0, %v918_v55  ;;  %v923_v58 = vmax.f32 %v915_v56, 0.0  ;;  %v914_v59 = vadd.f32 %v2487_v27, %v900_v57  ;;  %v888_v49 = vmul.f32 %v2957_v38, %v3318_v16  ;;  %v2922_v16 = vld [vmem:[%s3891_s5 + $0x18] sm:$0xff]   ;;  %v967_v4 = vrot.slane %v3353_v63, 2 }
 0x2ba   : > { %2652 = vmatprep.subr.bf16.mxu1 %v2922_v16  ;;  %v1011_v18 = vrot.slane %v3353_v63, 4 }
 0x2bb   : > { %931 = vst.msk [vmem:[#allocation3 + $0x40] sm:$0xff] %vm483_vm0, %v923_v58  ;;  %v922_v61 = vmax.f32 %v914_v59, 0.0  ;;  %v902_v50 = vmul.f32 %v2486_v24, %v888_v49  ;;  %2653 = vmatpush3.bf16.msra.mxu1 %v2922_v16  ;;  %v968_v13 = vsel %vm582_vm2, %v966_v3, %v967_v4 }
 0x2bc   : > { %v3355_v0 = vld [vmem:[#allocation3 + $0x28] sm:$0xff]  ;;  %2654 = vmatprep.subr.bf16.mxu1 %v2923_v11 }
 0x2bd   : > { %930 = vst.msk [vmem:[#allocation3 + $0x38] sm:$0xff] %vm483_vm0, %v922_v61  ;;  %v916_v1 = vadd.f32 %v2487_v27, %v902_v50  ;;  %v973_v6 = vrot.slane %v3355_v0, 2  ;;  %v1016_v25 = vrot.slane %v3355_v0, 4 }
 0x2be   : > { %v3382_v21 = vld [vmem:[#allocation3 + $0x30] sm:$0xff] }
 0x2bf   : > { %v924_v5 = vmax.f32 %v916_v1, 0.0  ;;  %v974_v20 = vsel %vm582_vm2, %v971_v9, %v973_v6  ;;  %2655 = vmatpush3.bf16.msra.mxu1 %v2923_v11  ;;  %v1017_v36 = vsel %vm1010_vm6, %v1014_v17, %v1016_v25  ;;  %v975_v37 = vrot.slane %v3382_v21, 2 }
 0x2c0   : > { %v3366_v7 = vld [vmem:[#allocation3 + $0x18] sm:$0xff]  ;;  %2656 = vmatprep.subr.bf16.mxu1 %v2924_v15  ;;  %v1018_v32 = vrot.slane %v3382_v21, 4 }
 0x2c1   : > { %932 = vst.msk [vmem:[#allocation3 + $0x48] sm:$0xff] %vm483_vm0, %v924_v5  ;;  %v969_v8 = vrot.slane %v3366_v7, 2  ;;  %v1012_v10 = vrot.slane %v3366_v7, 4  ;;  %v976_v46 = vsel %vm582_vm2, %v973_v6, %v975_v37 }
 0x2c2   : > { %v3389_v35 = vld [vmem:[#allocation3 + $0x40] sm:$0xff]  ;;  %v1019_v53 = vsel %vm1010_vm6, %v1016_v25, %v1018_v32 }
 0x2c3   : > { %v972_v19 = vsel %vm582_vm2, %v969_v8, %v971_v9  ;;  %v970_v24 = vsel %vm582_vm2, %v967_v4, %v969_v8  ;;  %v1015_v12 = vsel %vm1010_vm6, %v1012_v10, %v1014_v17  ;;  %v1013_v31 = vsel %vm1010_vm6, %v1011_v18, %v1012_v10  ;;  %2657 = vmatpush3.bf16.msra.mxu1 %v2924_v15 }
 0x2c4   : > { %v2799_v26 = vpack.i.bf16 %v974_v20, %v972_v19  ;;  %v2794_v27 = vpack.i.bf16 %v970_v24, %v968_v13  ;;  %v3384_v30 = vld [vmem:[#allocation3 + $0x38] sm:$0xff]  ;;  %v2809_v14 = vpack.i.bf16 %v1017_v36, %v1015_v12  ;;  %v2804_v29 = vpack.i.bf16 %v1013_v31, %v1011_v18  ;;  %2658 = vmatprep.subr.bf16.mxu1 %v2925_v45 }
 0x2c5   : > { %v977_v34 = vrot.slane %v3384_v30, 2  ;;  %v979_v40 = vrot.slane %v3389_v35, 2  ;;  %v1020_v43 = vrot.slane %v3384_v30, 4  ;;  %v1022_v51 = vrot.slane %v3389_v35, 4 }
 0x2c6   : > { %2800 = vrot.lane.b32.xlu0 %v2799_v26, %s3035_s23  ;;  %2795 = vrot.lane.b32.xlu1 %v2794_v27, %s3035_s23 }
 0x2c7   : > { %v978_v22 = vsel %vm582_vm2, %v975_v37, %v977_v34  ;;  %v980_v47 = vsel %vm582_vm2, %v977_v34, %v979_v40  ;;  %2659 = vmatpush3.bf16.msra.mxu1 %v2925_v45  ;;  %v1021_v28 = vsel %vm1010_vm6, %v1018_v32, %v1020_v43  ;;  %v1023_v54 = vsel %vm1010_vm6, %v1020_v43, %v1022_v51 }
 0x2c8   : > { %v3398_v23 = vld [vmem:[#allocation3 + $0x48] sm:$0xff]  ;;  %v2814_v52 = vpack.i.bf16 %v978_v22, %v976_v46  ;;  %v2819_v41 = vpack.i.bf16 %v1021_v28, %v1019_v53 }
 0x2c9   : > { %v981_v42 = vrot.slane %v3398_v23, 2  ;;  %v1024_v44 = vrot.slane %v3398_v23, 4 }
 0x2ca   : > { %2810 = vrot.lane.b32.xlu0 %v2809_v14, %s3036_s24  ;;  %2805 = vrot.lane.b32.xlu1 %v2804_v29, %s3036_s24 }
 0x2cb   : > { %v982_v48 = vsel %vm582_vm2, %v979_v40, %v981_v42  ;;  %v1025_v39 = vsel %vm1010_vm6, %v1022_v51, %v1024_v44 }
 0x2cc   : > { %v2824_v33 = vpack.i.bf16 %v982_v48, %v980_v47  ;;  %v2829_v55 = vpack.i.bf16 %v1025_v39, %v1023_v54 }
 0x2ce   : > { %2815 = vrot.lane.b32.xlu1 %v2814_v52, %s3035_s23  ;;  %2825 = vrot.lane.b32.xlu0 %v2824_v33, %s3035_s23 }
 0x2d2   : > { %2820 = vrot.lane.b32.xlu1 %v2819_v41, %s3036_s24  ;;  %2830 = vrot.lane.b32.xlu0 %v2829_v55, %s3036_s24 }
 0x2d6   : > { %999 = vrot.lane.b32.xlu1 %v981_v42, %s3035_s23 }
 0x2da   : > { %1042 = vrot.lane.b32.xlu1 %v1024_v44, %s3036_s24 }
 0x338   : > { %v2796_v56 = vpop.permute.xlu1 %2795  ;;  %v2801_v57 = vpop.permute.xlu0 %2800 }
 0x339   : > { %v2798_v38 = vunpack.i.h.bf16 %v2796_v56  ;;  %v2797_v58 = vunpack.i.l.bf16 %v2796_v56  ;;  %v2803_v59 = vunpack.i.h.bf16 %v2801_v57  ;;  %v2802_v49 = vunpack.i.l.bf16 %v2801_v57 }
 0x33b   : > { %v1054_v4 = vsel %vm483_vm0, %v3353_v63, %v2798_v38  ;;  %v1053_v5 = vsel %vm483_vm0, %v3351_v62, %v2797_v58  ;;  %v1056_v6 = vsel %vm483_vm0, %v3361_v2, %v2803_v59  ;;  %v1055_v8 = vsel %vm483_vm0, %v3366_v7, %v2802_v49 }
 0x33c   : > { %v2806_v60 = vpop.permute.xlu1 %2805  ;;  %v2811_v61 = vpop.permute.xlu0 %2810 }
 0x33d   : > { %v2808_v50 = vunpack.i.h.bf16 %v2806_v60  ;;  %v2807_v1 = vunpack.i.l.bf16 %v2806_v60  ;;  %v2813_v16 = vunpack.i.h.bf16 %v2811_v61  ;;  %v2812_v3 = vunpack.i.l.bf16 %v2811_v61 }
 0x33f   : > { %v1062_v9 = vsel %vm634_vm3, %v1053_v5, %v2807_v1  ;;  %v1063_v10 = vsel %vm634_vm3, %v1054_v4, %v2808_v50  ;;  %v1064_v11 = vsel %vm634_vm3, %v1055_v8, %v2812_v3  ;;  %v1065_v13 = vsel %vm634_vm3, %v1056_v6, %v2813_v16 }
 0x340   : > { %v2816_v17 = vpop.permute.xlu1 %2815  ;;  %v2826_v18 = vpop.permute.xlu0 %2825  ;;  %v1071_v63 = vpack.c.bf16 %v1063_v10, %v1062_v9  ;;  %v1072_v19 = vpack.c.bf16 %v1065_v13, %v1064_v11 }
 0x341   : > { %v2818_v20 = vunpack.i.h.bf16 %v2816_v17  ;;  %v2817_v62 = vunpack.i.l.bf16 %v2816_v17  ;;  %v2828_v24 = vunpack.i.h.bf16 %v2826_v18  ;;  %v2827_v25 = vunpack.i.l.bf16 %v2826_v18 }
 0x342   : > { %v1088_v2 = vrot.slane %v1071_v63, 2  ;;  %v1089_v26 = vrot.slane %v1072_v19, 2 }
 0x343   : > { %v1058_v37 = vsel %vm483_vm0, %v3382_v21, %v2818_v20  ;;  %v1057_v14 = vsel %vm483_vm0, %v3355_v0, %v2817_v62  ;;  %v1060_v29 = vsel %vm483_vm0, %v3389_v35, %v2828_v24  ;;  %v1059_v40 = vsel %vm483_vm0, %v3384_v30, %v2827_v25 }
 0x344   : > { %v2821_v27 = vpop.permute.xlu1 %2820  ;;  %v2831_v7 = vpop.permute.xlu0 %2830  ;;  %v1090_v12 = vsel %vm582_vm2, %v1088_v2, %v1089_v26 }
 0x345   : > { %v2823_v31 = vunpack.i.h.bf16 %v2821_v27  ;;  %v2822_v34 = vunpack.i.l.bf16 %v2821_v27  ;;  %v2833_v15 = vunpack.i.h.bf16 %v2831_v7  ;;  %v2832_v36 = vunpack.i.l.bf16 %v2831_v7  ;;  %2660 = vmatprep.mubr.msk.bf16.mxu1 %vm706_vm5, %v1090_v12 }
 0x347   : > { %v1066_v22 = vsel %vm634_vm3, %v1057_v14, %v2822_v34  ;;  %v1067_v42 = vsel %vm634_vm3, %v1058_v37, %v2823_v31  ;;  %v1068_v43 = vsel %vm634_vm3, %v1059_v40, %v2832_v36  ;;  %v1069_v44 = vsel %vm634_vm3, %v1060_v29, %v2833_v15 }
 0x348   : > { %v1073_v45 = vpack.c.bf16 %v1067_v42, %v1066_v22  ;;  %v1074_v32 = vpack.c.bf16 %v1069_v44, %v1068_v43  ;;  %v1000_v21 = vpop.permute.xlu1 %999 }
 0x349   : > { %v1061_v0 = vsel %vm483_vm0, %v3398_v23, %v1000_v21  ;;  %v2488_v23 = vld [vmem:[%s3892_s6] ss:$0 sm:$0xff] }
 0x34a   : > { %v1091_v46 = vrot.slane %v1073_v45, 2  ;;  %v1093_v47 = vrot.slane %v1074_v32, 2 }
 0x34c   : > { %v1043_v35 = vpop.permute.xlu1 %1042  ;;  %v1092_v48 = vsel %vm582_vm2, %v1089_v26, %v1091_v46  ;;  %v1094_v30 = vsel %vm582_vm2, %v1091_v46, %v1093_v47 }
 0x34d   : > { %v1070_v51 = vsel %vm634_vm3, %v1061_v0, %v1043_v35  ;;  %2661 = vmatmul.mubr.msk.bf16.vlgmr.msra.gmra.mxu1 %vm706_vm5, %v1092_v48 }
 0x34e   : > { %v1075_v52 = vpack.c.bf16 %v1070_v51, %v1070_v51  ;;  %2664 = vmatprep.mubr.msk.bf16.mxu1 %vm706_vm5, %v1094_v30 }
 0x350   : > { %v1095_v33 = vrot.slane %v1075_v52, 2 }
 0x352   : > { %v1096_v28 = vsel %vm582_vm2, %v1093_v47, %v1095_v33 }
 0x355   : > { %2665 = vmatmul.mubr.msk.bf16.gmra.mxu1 %vm706_vm5, %v1096_v28 }
 0x40d   : > { %v2662_v39 = vpop.f32.mrf.mxu1 }
 0x40e   : > { %v1188_v55 = vadd.f32 %v2662_v39, %v2488_v23 }
 0x40f   : > { %v1179_v53 = vpop.f32.mrf.mxu1 }
 0x410   : > { %v1180_v54 = vadd.f32 %v2488_v23, %v1179_v53  ;;  %v1216_v60 = vsel %vm483_vm0, %v1188_v55, 0.0  ;;  %v2927_v53 = vld [vmem:[%s3887_s1 + $0x50] sm:$0xff]  }
 0x411   : > { %v2663_v41 = vpop.f32.mrf.mxu1 }
 0x412   : > { %v1210_v56 = vsel %vm483_vm0, %v1180_v54, 0.0  ;;  %v1191_v59 = vadd.f32 %v2663_v41, %v2488_v23 }
 0x413   : > { %v1182_v57 = vpop.f32.mrf.mxu1  ;;  %1211 = vadd.xlane.f32.xlu0 %v1210_v56 }
 0x414   : > { %v1183_v38 = vadd.f32 %v2488_v23, %v1182_v57  ;;  %v1219_v4 = vsel %vm483_vm0, %v1191_v59, 0.0 }
 0x415   : > { %v2666_v58 = vpop.f32.mrf.mxu1 }
 0x416   : > { %v1213_v49 = vsel %vm483_vm0, %v1183_v38, 0.0  ;;  %v1204_v16 = vadd.f32 %v2666_v58, %v2488_v23 }
 0x417   : > { %v1195_v61 = vpop.f32.mrf.mxu1  ;;  %1214 = vadd.xlane.f32.xlu1 %v1213_v49  ;;  %1217 = vadd.xlane.f32.xlu0 %v1216_v60 }
 0x418   : > { %v1196_v50 = vadd.f32 %v2488_v23, %v1195_v61  ;;  %v1228_v9 = vsel %vm483_vm0, %v1204_v16, 0.0 }
 0x419   : > { %v2667_v1 = vpop.f32.mrf.mxu1 }
 0x41a   : > { %v1222_v3 = vsel %vm483_vm0, %v1196_v50, 0.0  ;;  %v1207_v8 = vadd.f32 %v2667_v1, %v2488_v23 }
 0x41b   : > { %v1198_v5 = vpop.f32.mrf.mxu1  ;;  %1223 = vadd.xlane.f32.xlu1 %v1222_v3  ;;  %1220 = vadd.xlane.f32.xlu0 %v1219_v4 }
 0x41c   : > { %v1199_v6 = vadd.f32 %v2488_v23, %v1198_v5  ;;  %v1231_v11 = vsel %vm483_vm0, %v1207_v8, 0.0  ;;  %v2926_v23 = vld [vmem:[%s3887_s1 + $0x58] sm:$0xff]  }
 0x41d   : > { %2668 = vmatprep.subr.bf16.mxu0 %v2926_v23 }
 0x41e   : > { %v1225_v10 = vsel %vm483_vm0, %v1199_v6, 0.0  ;;  %2669 = vmatpush3.bf16.msra.mxu0 %v2926_v23 }
 0x41f   : > { %1229 = vadd.xlane.f32.xlu1 %v1228_v9  ;;  %1226 = vadd.xlane.f32.xlu0 %v1225_v10 }
 0x420   : > { %2670 = vmatprep.subr.bf16.mxu0 %v2927_v53 }
 0x422   : > { %2671 = vmatpush3.bf16.msra.mxu0 %v2927_v53 }
 0x423   : > { %1232 = vadd.xlane.f32.xlu0 %v1231_v11 }
 0x49c   : > { %v1212_v13 = vpop.xlane.xlu0 %1211 }
 0x49d   : > { %v1234_v17 = vmul.f32 0.03125, %v1212_v13 }
 0x49f   : > { %v3471_v18 = vsub.f32 %v1180_v54, %v1234_v17  ;;  %v2928_v54 = vld [vmem:[%s3887_s1 + $0x48] sm:$0xff]  }
 0x4a0   : > { %v1215_v63 = vpop.xlane.xlu1 %1214  ;;  %v1218_v19 = vpop.xlane.xlu0 %1217  ;;  %2672 = vmatprep.subr.bf16.mxu0 %v2928_v54 }
 0x4a1   : > { %v1235_v20 = vmul.f32 0.03125, %v1215_v63  ;;  %v1236_v62 = vmul.f32 0.03125, %v1218_v19  ;;  %v1250_v24 = vmul.f32 %v3471_v18, %v3471_v18  ;;  %2673 = vmatpush3.bf16.msra.mxu0 %v2928_v54  ;;  %v2499_v19 = vld [vmem:[%s3893_s7] ss:$0 sm:$0xff] }
 0x4a3   : > { %v3475_v25 = vsub.f32 %v1183_v38, %v1235_v20  ;;  %v3477_v2 = vsub.f32 %v1188_v55, %v1236_v62  ;;  %v1258_v26 = vsel %vm483_vm0, %v1250_v24, 0.0  ;;  %v3527_v24 = vld [vmem:[%s3894_s8] ss:$0 sm:$0xff] }
 0x4a4   : > { %v1224_v27 = vpop.xlane.xlu1 %1223  ;;  %1259 = vadd.xlane.f32.xlu1 %v1258_v26  ;;  %v1221_v7 = vpop.xlane.xlu0 %1220 }
 0x4a5   : > { %v1238_v12 = vmul.f32 0.03125, %v1224_v27  ;;  %v1237_v31 = vmul.f32 0.03125, %v1221_v7  ;;  %v1251_v34 = vmul.f32 %v3475_v25, %v3475_v25  ;;  %v1252_v15 = vmul.f32 %v3477_v2, %v3477_v2 }
 0x4a7   : > { %v3484_v36 = vsub.f32 %v1196_v50, %v1238_v12  ;;  %v3486_v37 = vsub.f32 %v1191_v59, %v1237_v31  ;;  %v1261_v14 = vsel %vm483_vm0, %v1251_v34, 0.0  ;;  %v1264_v29 = vsel %vm483_vm0, %v1252_v15, 0.0 }
 0x4a8   : > { %v1230_v40 = vpop.xlane.xlu1 %1229  ;;  %1262 = vadd.xlane.f32.xlu0 %v1261_v14  ;;  %1265 = vadd.xlane.f32.xlu1 %v1264_v29  ;;  %v1227_v22 = vpop.xlane.xlu0 %1226  ;;  %v3531_v34 = vstv %s1350_s16 }
 0x4a9   : > { %v1240_v42 = vmul.f32 0.03125, %v1230_v40  ;;  %v1239_v43 = vmul.f32 0.03125, %v1227_v22  ;;  %v1254_v44 = vmul.f32 %v3484_v36, %v3484_v36  ;;  %v1253_v45 = vmul.f32 %v3486_v37, %v3486_v37  ;;  %v1360_v40 = vld [vmem:[#allocation2 + $0x10] sm:$0xff] }
 0x4ab   : > { %v3494_v32 = vsub.f32 %v1204_v16, %v1240_v42  ;;  %v3496_v21 = vsub.f32 %v1199_v6, %v1239_v43  ;;  %v1270_v46 = vsel %vm483_vm0, %v1254_v44, 0.0  ;;  %v1267_v47 = vsel %vm483_vm0, %v1253_v45, 0.0 }
 0x4ac   : > { %1271 = vadd.xlane.f32.xlu1 %v1270_v46  ;;  %1268 = vadd.xlane.f32.xlu0 %v1267_v47  ;;  %v1233_v0 = vpop.xlane.xlu0 %1232 }
 0x4ad   : > { %v1241_v35 = vmul.f32 0.03125, %v1233_v0  ;;  %v1256_v48 = vmul.f32 %v3494_v32, %v3494_v32  ;;  %v1255_v30 = vmul.f32 %v3496_v21, %v3496_v21 }
 0x4af   : > { %v3504_v51 = vsub.f32 %v1207_v8, %v1241_v35  ;;  %v1276_v52 = vsel %vm483_vm0, %v1256_v48, 0.0  ;;  %v1273_v33 = vsel %vm483_vm0, %v1255_v30, 0.0  ;;  %v1362_v48 = vld [vmem:[#allocation2 + $0x20] sm:$0xff] }
 0x4b0   : > { %1277 = vadd.xlane.f32.xlu1 %v1276_v52  ;;  %1274 = vadd.xlane.f32.xlu0 %v1273_v33 }
 0x4b1   : > { %v1257_v28 = vmul.f32 %v3504_v51, %v3504_v51 }
 0x4b3   : > { %v1279_v39 = vsel %vm483_vm0, %v1257_v28, 0.0 }
 0x4b4   : > { %1280 = vadd.xlane.f32.xlu0 %v1279_v39  ;;  %v1361_v39 = vld [vmem:[#allocation2 + $0x18] sm:$0xff] }
 0x52d   : > { %v1260_v41 = vpop.xlane.xlu1 %1259 }
 0x52e   : > { %v1282_v55 = vmul.f32 0.03125, %v1260_v41 }
 0x530   : > { %v1290_v56 = vadd.f32 1e-08, %v1282_v55 }
 0x531   : > { %v1266_v57 = vpop.xlane.xlu1 %1265  ;;  %v1263_v38 = vpop.xlane.xlu0 %1262 }
 0x532   : > { %2958 = vrsqrt.f32 %v1290_v56  ;;  %v1284_v58 = vmul.f32 0.03125, %v1266_v57  ;;  %v1283_v59 = vmul.f32 0.03125, %v1263_v38  ;;  %v2929_v57 = vld [vmem:[%s3887_s1 + $0x40] sm:$0xff]  }
 0x533   : > { %2674 = vmatprep.subr.bf16.mxu0 %v2929_v57 }
 0x534   : > { %v1292_v49 = vadd.f32 1e-08, %v1284_v58  ;;  %v1291_v60 = vadd.f32 1e-08, %v1283_v59  ;;  %v1364_v59 = vld [vmem:[#allocation2 + $0x30] sm:$0xff]  ;;  %2675 = vmatpush3.bf16.msra.mxu0 %v2929_v57 }
 0x535   : > { %v1272_v61 = vpop.xlane.xlu1 %1271  ;;  %v1269_v50 = vpop.xlane.xlu0 %1268 }
 0x536   : > { %2960 = vrsqrt.f32 %v1292_v49  ;;  %v1286_v1 = vmul.f32 0.03125, %v1272_v61  ;;  %v1285_v16 = vmul.f32 0.03125, %v1269_v50  ;;  %v1363_v61 = vld [vmem:[#allocation2 + $0x28] sm:$0xff] }
 0x537   : > { %2962 = vrsqrt.f32 %v1291_v60 }
 0x538   : > { %v1294_v3 = vadd.f32 1e-08, %v1286_v1  ;;  %v1293_v4 = vadd.f32 1e-08, %v1285_v16 }
 0x539   : > { %v1278_v5 = vpop.xlane.xlu1 %1277  ;;  %v1275_v6 = vpop.xlane.xlu0 %1274 }
 0x53a   : > { %2964 = vrsqrt.f32 %v1294_v3  ;;  %v1288_v8 = vmul.f32 0.03125, %v1278_v5  ;;  %v1287_v9 = vmul.f32 0.03125, %v1275_v6  ;;  %v2930_v6 = vld [vmem:[%s3887_s1 + $0x38] sm:$0xff]  }
 0x53b   : > { %2966 = vrsqrt.f32 %v1293_v4  ;;  %2676 = vmatprep.subr.bf16.mxu0 %v2930_v6 }
 0x53c   : > { %v1296_v10 = vadd.f32 1e-08, %v1288_v8  ;;  %v1295_v11 = vadd.f32 1e-08, %v1287_v9  ;;  %v1366_v9 = vld [vmem:[#allocation2 + $0x40] sm:$0xff]  ;;  %2677 = vmatpush3.bf16.msra.mxu0 %v2930_v6 }
 0x53d   : > { %v1281_v13 = vpop.xlane.xlu0 %1280 }
 0x53e   : > { %2968 = vrsqrt.f32 %v1296_v10  ;;  %v1289_v17 = vmul.f32 0.03125, %v1281_v13 }
 0x53f   : > { %v2959_v63 = vpop.eup %2958  ;;  %2970 = vrsqrt.f32 %v1295_v11  ;;  %v1365_v11 = vld [vmem:[#allocation2 + $0x38] sm:$0xff] }
 0x540   : > { %v1306_v20 = vmul.f32 %v2959_v63, %v3471_v18  ;;  %v1297_v62 = vadd.f32 1e-08, %v1289_v17  ;;  %v3564_v63 = vld [vmem:[#allocation2 + $0x8] sm:$0xff] }
 0x542   : > { %v1320_v26 = vmul.f32 %v2499_v19, %v1306_v20  ;;  %2972 = vrsqrt.f32 %v1297_v62 }
 0x543   : > { %v2961_v27 = vpop.eup %2960 }
 0x544   : > { %v2963_v7 = vpop.eup %2962  ;;  %v1334_v12 = vadd.f32 %v3527_v24, %v1320_v26  ;;  %v1308_v31 = vmul.f32 %v2961_v27, %v3477_v2  ;;  %v2931_v26 = vld [vmem:[%s3887_s1 + $0x30] sm:$0xff]  }
 0x545   : > { %v1307_v15 = vmul.f32 %v2963_v7, %v3475_v25  ;;  %v1367_v7 = vld [vmem:[#allocation2 + $0x48] sm:$0xff]  ;;  %2678 = vmatprep.subr.bf16.mxu0 %v2931_v26 }
 0x546   : > { %v1342_v14 = vmax.f32 %v1334_v12, 0.0  ;;  %v1322_v18 = vmul.f32 %v2499_v19, %v1308_v31  ;;  %2679 = vmatpush3.bf16.msra.mxu0 %v2931_v26 }
 0x547   : > { %v2965_v29 = vpop.eup %2964  ;;  %v1321_v22 = vmul.f32 %v2499_v19, %v1307_v15 }
 0x548   : > { %v2967_v42 = vpop.eup %2966  ;;  %v1352_v43 = vmul.f32 %v3531_v34, %v1342_v14  ;;  %v1336_v44 = vadd.f32 %v3527_v24, %v1322_v18  ;;  %v1310_v45 = vmul.f32 %v2965_v29, %v3484_v36 }
 0x549   : > { %v1335_v46 = vadd.f32 %v3527_v24, %v1321_v22  ;;  %v1309_v2 = vmul.f32 %v2967_v42, %v3486_v37 }
 0x54a   : > { %v1368_v47 = vadd.f32 %v1360_v40, %v1352_v43  ;;  %v1344_v0 = vmax.f32 %v1336_v44, 0.0  ;;  %v1324_v35 = vmul.f32 %v2499_v19, %v1310_v45 }
 0x54b   : > { %v2969_v25 = vpop.eup %2968  ;;  %v1343_v30 = vmax.f32 %v1335_v46, 0.0  ;;  %v1323_v52 = vmul.f32 %v2499_v19, %v1309_v2 }
 0x54c   : > { %v2971_v33 = vpop.eup %2970  ;;  %1376 = vst.msk [vmem:[#allocation2 + $0x10] sm:$0xff] %vm483_vm0, %v1368_v47  ;;  %v1354_v28 = vmul.f32 %v3531_v34, %v1344_v0  ;;  %v1338_v23 = vadd.f32 %v3527_v24, %v1324_v35  ;;  %v1312_v36 = vmul.f32 %v2969_v25, %v3494_v32 }
 0x54d   : > { %v1353_v53 = vmul.f32 %v3531_v34, %v1343_v30  ;;  %v1337_v37 = vadd.f32 %v3527_v24, %v1323_v52  ;;  %v1311_v54 = vmul.f32 %v2971_v33, %v3496_v21 }
 0x54e   : > { %v1370_v41 = vadd.f32 %v1362_v48, %v1354_v28  ;;  %v1346_v55 = vmax.f32 %v1338_v23, 0.0  ;;  %v1326_v56 = vmul.f32 %v2499_v19, %v1312_v36 }
 0x54f   : > { %v2973_v38 = vpop.eup %2972  ;;  %v1369_v58 = vadd.f32 %v1361_v39, %v1353_v53  ;;  %v1345_v49 = vmax.f32 %v1337_v37, 0.0  ;;  %v1325_v60 = vmul.f32 %v2499_v19, %v1311_v54 }
 0x550   : > { %1378 = vst.msk [vmem:[#allocation2 + $0x20] sm:$0xff] %vm483_vm0, %v1370_v41  ;;  %v1356_v32 = vmul.f32 %v3531_v34, %v1346_v55  ;;  %v1340_v50 = vadd.f32 %v3527_v24, %v1326_v56  ;;  %v1313_v21 = vmul.f32 %v2973_v38, %v3504_v51 }
 0x551   : > { %1377 = vst.msk [vmem:[#allocation2 + $0x18] sm:$0xff] %vm483_vm0, %v1369_v58  ;;  %v1355_v1 = vmul.f32 %v3531_v34, %v1345_v49  ;;  %v1339_v16 = vadd.f32 %v3527_v24, %v1325_v60 }
 0x552   : > { %v1372_v3 = vadd.f32 %v1364_v59, %v1356_v32  ;;  %v1348_v4 = vmax.f32 %v1340_v50, 0.0  ;;  %v1327_v5 = vmul.f32 %v2499_v19, %v1313_v21 }
 0x553   : > { %v1371_v8 = vadd.f32 %v1363_v61, %v1355_v1  ;;  %v1347_v10 = vmax.f32 %v1339_v16, 0.0  ;;  %v3562_v17 = vld [vmem:[#allocation2 + $0x10] sm:$0xff] }
 0x554   : > { %1380 = vst.msk [vmem:[#allocation2 + $0x30] sm:$0xff] %vm483_vm0, %v1372_v3  ;;  %v1358_v51 = vmul.f32 %v3531_v34, %v1348_v4  ;;  %v1341_v13 = vadd.f32 %v3527_v24, %v1327_v5  ;;  %v1421_v24 = vrot.slane %v3564_v63, 4  ;;  %v1422_v12 = vrot.slane %v3562_v17, 4 }
 0x555   : > { %1379 = vst.msk [vmem:[#allocation2 + $0x28] sm:$0xff] %vm483_vm0, %v1371_v8  ;;  %v1357_v19 = vmul.f32 %v3531_v34, %v1347_v10 }
 0x556   : > { %v1374_v20 = vadd.f32 %v1366_v9, %v1358_v51  ;;  %v1349_v62 = vmax.f32 %v1341_v13, 0.0  ;;  %v1423_v22 = vsel %vm1010_vm6, %v1421_v24, %v1422_v12 }
 0x557   : > { %v1373_v27 = vadd.f32 %v1365_v11, %v1357_v19  ;;  %v3577_v14 = vld [vmem:[#allocation2 + $0x20] sm:$0xff] }
 0x558   : > { %1382 = vst.msk [vmem:[#allocation2 + $0x40] sm:$0xff] %vm483_vm0, %v1374_v20  ;;  %v1359_v31 = vmul.f32 %v3531_v34, %v1349_v62  ;;  %v3575_v15 = vld [vmem:[#allocation2 + $0x18] sm:$0xff]  ;;  %v1426_v42 = vrot.slane %v3577_v14, 4 }
 0x559   : > { %1381 = vst.msk [vmem:[#allocation2 + $0x38] sm:$0xff] %vm483_vm0, %v1373_v27  ;;  %v2834_v18 = vpack.i.bf16 %v3575_v15, %v3562_v17  ;;  %v1424_v29 = vrot.slane %v3575_v15, 4 }
 0x55a   : > { %v1375_v40 = vadd.f32 %v1367_v7, %v1359_v31 }
 0x55b   : > { %2835 = vrot.lane.b32.xlu1 %v2834_v18, %s3036_s24  ;;  %v1425_v34 = vsel %vm1010_vm6, %v1422_v12, %v1424_v29  ;;  %v3590_v45 = vld [vmem:[#allocation2 + $0x30] sm:$0xff]  ;;  %v1427_v2 = vsel %vm1010_vm6, %v1424_v29, %v1426_v42 }
 0x55c   : > { %1383 = vst.msk [vmem:[#allocation2 + $0x48] sm:$0xff] %vm483_vm0, %v1375_v40  ;;  %v2839_v43 = vpack.i.bf16 %v1425_v34, %v1423_v22  ;;  %v3588_v44 = vld [vmem:[#allocation2 + $0x28] sm:$0xff]  ;;  %v1430_v0 = vrot.slane %v3590_v45, 4 }
 0x55d   : > { %v1428_v46 = vrot.slane %v3588_v44, 4  ;;  %v2844_v30 = vpack.i.bf16 %v3588_v44, %v3577_v14 }
 0x55f   : > { %2840 = vrot.lane.b32.xlu1 %v2839_v43, %s3035_s23  ;;  %v1429_v47 = vsel %vm1010_vm6, %v1426_v42, %v1428_v46  ;;  %v3597_v35 = vld [vmem:[#allocation2 + $0x40] sm:$0xff]  ;;  %v1431_v28 = vsel %vm1010_vm6, %v1428_v46, %v1430_v0 }
 0x560   : > { %v2849_v25 = vpack.i.bf16 %v1429_v47, %v1427_v2  ;;  %v3599_v48 = vld [vmem:[#allocation2 + $0x38] sm:$0xff]  ;;  %v1434_v33 = vrot.slane %v3597_v35, 4 }
 0x561   : > { %v1432_v52 = vrot.slane %v3599_v48, 4  ;;  %v2859_v55 = vpack.i.bf16 %v3599_v48, %v3590_v45 }
 0x562   : > { %2850 = vrot.lane.b32.xlu0 %v2849_v25, %s3035_s23 }
 0x563   : > { %2845 = vrot.lane.b32.xlu1 %v2844_v30, %s3036_s24  ;;  %v1433_v39 = vsel %vm1010_vm6, %v1430_v0, %v1432_v52  ;;  %v1411_v23 = vld [vmem:[#allocation2 + $0x48] sm:$0xff]  ;;  %v1435_v37 = vsel %vm1010_vm6, %v1432_v52, %v1434_v33  ;;  %v2516_v30 = vld [vmem:[%s3888_s2 + $0x1] ss:$0 sm:$0xff] }
 0x564   : > { %v2854_v36 = vpack.i.bf16 %v1433_v39, %v1431_v28  ;;  %v1436_v53 = vrot.slane %v1411_v23, 4  ;;  %v2869_v56 = vpack.i.bf16 %v1411_v23, %v3597_v35 }
 0x566   : > { %2855 = vrot.lane.b32.xlu0 %v2854_v36, %s3035_s23  ;;  %v1437_v54 = vsel %vm1010_vm6, %v1434_v33, %v1436_v53 }
 0x567   : > { %v2864_v41 = vpack.i.bf16 %v1437_v54, %v1435_v37 }
 0x569   : > { %2865 = vrot.lane.b32.xlu1 %v2864_v41, %s3035_s23 }
 0x56a   : > { %2860 = vrot.lane.b32.xlu0 %v2859_v55, %s3036_s24 }
 0x56d   : > { %2870 = vrot.lane.b32.xlu1 %v2869_v56, %s3036_s24 }
 0x5cd   : > { %v2836_v57 = vpop.permute.xlu1 %2835 }
 0x5ce   : > { %v2838_v49 = vunpack.i.h.bf16 %v2836_v57  ;;  %v2837_v60 = vunpack.i.l.bf16 %v2836_v57 }
 0x5d1   : > { %v2841_v38 = vpop.permute.xlu1 %2840 }
 0x5d2   : > { %v2843_v58 = vunpack.i.h.bf16 %v2841_v38  ;;  %v2842_v59 = vunpack.i.l.bf16 %v2841_v38 }
 0x5d4   : > { %v1487_v32 = vsel %vm483_vm0, %v3562_v17, %v2843_v58  ;;  %v1486_v61 = vsel %vm483_vm0, %v3564_v63, %v2842_v59  ;;  %v2851_v50 = vpop.permute.xlu0 %2850 }
 0x5d5   : > { %v2853_v21 = vunpack.i.h.bf16 %v2851_v50  ;;  %v2852_v1 = vunpack.i.l.bf16 %v2851_v50  ;;  %v2846_v16 = vpop.permute.xlu1 %2845  ;;  %v1494_v3 = vsel %vm634_vm3, %v1486_v61, %v2837_v60  ;;  %v1495_v4 = vsel %vm634_vm3, %v1487_v32, %v2838_v49 }
 0x5d6   : > { %v2848_v5 = vunpack.i.h.bf16 %v2846_v16  ;;  %v2847_v6 = vunpack.i.l.bf16 %v2846_v16  ;;  %v1502_v8 = vpack.c.bf16 %v1495_v4, %v1494_v3 }
 0x5d7   : > { %v1489_v9 = vsel %vm483_vm0, %v3577_v14, %v2853_v21  ;;  %v1488_v10 = vsel %vm483_vm0, %v3575_v15, %v2852_v1 }
 0x5d8   : > { %v1496_v51 = vsel %vm634_vm3, %v1488_v10, %v2847_v6  ;;  %v1497_v11 = vsel %vm634_vm3, %v1489_v9, %v2848_v5  ;;  %2680 = vmatprep.mubr.msk.bf16.mxu0 %vm706_vm5, %v1502_v8  ;;  %v2856_v13 = vpop.permute.xlu0 %2855 }
 0x5d9   : > { %v1503_v63 = vpack.c.bf16 %v1497_v11, %v1496_v51  ;;  %v2858_v19 = vunpack.i.h.bf16 %v2856_v13  ;;  %v2857_v20 = vunpack.i.l.bf16 %v2856_v13 }
 0x5db   : > { %2681 = vmatmul.mubr.msk.bf16.vlgmr.msra.gmra.mxu0 %vm706_vm5, %v1503_v63  ;;  %v2866_v62 = vpop.permute.xlu1 %2865  ;;  %v1491_v31 = vsel %vm483_vm0, %v3590_v45, %v2858_v19  ;;  %v1490_v18 = vsel %vm483_vm0, %v3588_v44, %v2857_v20 }
 0x5dc   : > { %v2861_v26 = vpop.permute.xlu0 %2860  ;;  %v2868_v27 = vunpack.i.h.bf16 %v2866_v62  ;;  %v2867_v7 = vunpack.i.l.bf16 %v2866_v62 }
 0x5dd   : > { %v2863_v24 = vunpack.i.h.bf16 %v2861_v26  ;;  %v2862_v12 = vunpack.i.l.bf16 %v2861_v26 }
 0x5de   : > { %v1493_v46 = vsel %vm483_vm0, %v3597_v35, %v2868_v27  ;;  %v1492_v2 = vsel %vm483_vm0, %v3599_v48, %v2867_v7 }
 0x5df   : > { %v1498_v29 = vsel %vm634_vm3, %v1490_v18, %v2862_v12  ;;  %v1499_v40 = vsel %vm634_vm3, %v1491_v31, %v2863_v24  ;;  %v2871_v22 = vpop.permute.xlu1 %2870 }
 0x5e0   : > { %v1504_v34 = vpack.c.bf16 %v1499_v40, %v1498_v29  ;;  %v2873_v42 = vunpack.i.h.bf16 %v2871_v22  ;;  %v2872_v43 = vunpack.i.l.bf16 %v2871_v22 }
 0x5e2   : > { %v1500_v47 = vsel %vm634_vm3, %v1492_v2, %v2872_v43  ;;  %v1501_v0 = vsel %vm634_vm3, %v1493_v46, %v2873_v42  ;;  %2684 = vmatprep.mubr.msk.bf16.mxu0 %vm706_vm5, %v1504_v34 }
 0x5e3   : > { %v1505_v25 = vpack.c.bf16 %v1501_v0, %v1500_v47 }
 0x5e5   : > { %2685 = vmatmul.mubr.msk.bf16.gmra.mxu0 %vm706_vm5, %v1505_v25 }
 0x69b   : > { %v2682_v52 = vpop.f32.mrf.mxu0 }
 0x69c   : > { %v1603_v33 = vadd.f32 %v2682_v52, %v2516_v30 }
 0x69d   : > { %v1594_v28 = vpop.f32.mrf.mxu0 }
 0x69e   : > { %v1595_v39 = vadd.f32 %v2516_v30, %v1594_v28  ;;  %v1631_v23 = vsel %vm483_vm0, %v1603_v33, 0.0 }
 0x69f   : > { %1632 = vadd.xlane.f32.xlu0 %v1631_v23  ;;  %v2683_v48 = vpop.f32.mrf.mxu0 }
 0x6a0   : > { %v1606_v53 = vadd.f32 %v2683_v48, %v2516_v30  ;;  %v1625_v54 = vsel %vm483_vm0, %v1595_v39, 0.0 }
 0x6a1   : > { %v1597_v36 = vpop.f32.mrf.mxu0 }
 0x6a2   : > { %v1598_v37 = vadd.f32 %v2516_v30, %v1597_v36  ;;  %v1634_v56 = vsel %vm483_vm0, %v1606_v53, 0.0  ;;  %v2932_v36 = vld [vmem:[%s3891_s5 + $0x58] sm:$0xff]  }
 0x6a3   : > { %1626 = vadd.xlane.f32.xlu0 %v1625_v54  ;;  %2688 = vmatprep.subr.bf16.mxu1 %v2932_v36 }
 0x6a4   : > { %v1628_v41 = vsel %vm483_vm0, %v1598_v37, 0.0  ;;  %2689 = vmatpush3.bf16.msra.mxu1 %v2932_v36 }
 0x6a5   : > { %1629 = vadd.xlane.f32.xlu1 %v1628_v41  ;;  %v2686_v55 = vpop.f32.mrf.mxu0 }
 0x6a6   : > { %v1619_v59 = vadd.f32 %v2686_v55, %v2516_v30 }
 0x6a7   : > { %1635 = vadd.xlane.f32.xlu0 %v1634_v56  ;;  %v1610_v57 = vpop.f32.mrf.mxu0 }
 0x6a8   : > { %v1611_v38 = vadd.f32 %v2516_v30, %v1610_v57  ;;  %v1643_v50 = vsel %vm483_vm0, %v1619_v59, 0.0 }
 0x6a9   : > { %v2687_v58 = vpop.f32.mrf.mxu0 }
 0x6aa   : > { %v1637_v49 = vsel %vm483_vm0, %v1611_v38, 0.0  ;;  %v1622_v61 = vadd.f32 %v2687_v58, %v2516_v30 }
 0x6ab   : > { %v1613_v60 = vpop.f32.mrf.mxu0  ;;  %1638 = vadd.xlane.f32.xlu1 %v1637_v49 }
 0x6ac   : > { %v1614_v32 = vadd.f32 %v2516_v30, %v1613_v60  ;;  %v1646_v1 = vsel %vm483_vm0, %v1622_v61, 0.0 }
 0x6ae   : > { %v1640_v21 = vsel %vm483_vm0, %v1614_v32, 0.0 }
 0x6af   : > { %1644 = vadd.xlane.f32.xlu1 %v1643_v50  ;;  %1641 = vadd.xlane.f32.xlu0 %v1640_v21 }
 0x6b3   : > { %1647 = vadd.xlane.f32.xlu0 %v1646_v1 }
 0x728   : > { %v1633_v16 = vpop.xlane.xlu0 %1632 }
 0x729   : > { %v1651_v3 = vmul.f32 0.03125, %v1633_v16 }
 0x72b   : > { %v3657_v8 = vsub.f32 %v1603_v33, %v1651_v3 }
 0x72c   : > { %v1627_v4 = vpop.xlane.xlu0 %1626 }
 0x72d   : > { %v1649_v5 = vmul.f32 0.03125, %v1627_v4  ;;  %v1667_v26 = vmul.f32 %v3657_v8, %v3657_v8 }
 0x72e   : > { %v1630_v6 = vpop.xlane.xlu1 %1629 }
 0x72f   : > { %v3659_v9 = vsub.f32 %v1595_v39, %v1649_v5  ;;  %v1650_v10 = vmul.f32 0.03125, %v1630_v6  ;;  %v1679_v18 = vsel %vm483_vm0, %v1667_v26, 0.0 }
 0x730   : > { %v1636_v51 = vpop.xlane.xlu0 %1635 }
 0x731   : > { %v3661_v11 = vsub.f32 %v1598_v37, %v1650_v10  ;;  %v1652_v13 = vmul.f32 0.03125, %v1636_v51  ;;  %v1665_v63 = vmul.f32 %v3659_v9, %v3659_v9  ;;  %v2934_v37 = vld [vmem:[%s3891_s5 + $0x48] sm:$0xff]  }
 0x733   : > { %v3665_v19 = vsub.f32 %v1606_v53, %v1652_v13  ;;  %v1673_v20 = vsel %vm483_vm0, %v1665_v63, 0.0  ;;  %v1666_v62 = vmul.f32 %v3661_v11, %v3661_v11  ;;  %v2933_v53 = vld [vmem:[%s3891_s5 + $0x50] sm:$0xff]  }
 0x734   : > { %1674 = vadd.xlane.f32.xlu1 %v1673_v20  ;;  %v1639_v27 = vpop.xlane.xlu1 %1638  ;;  %2690 = vmatprep.subr.bf16.mxu1 %v2933_v53  ;;  %v2527_v20 = vld [vmem:[%s3889_s3 + $0x1] ss:$0 sm:$0xff] }
 0x735   : > { %v1653_v7 = vmul.f32 0.03125, %v1639_v27  ;;  %v1676_v24 = vsel %vm483_vm0, %v1666_v62, 0.0  ;;  %v1668_v12 = vmul.f32 %v3665_v19, %v3665_v19  ;;  %2691 = vmatpush3.bf16.msra.mxu1 %v2933_v53 }
 0x736   : > { %1677 = vadd.xlane.f32.xlu0 %v1676_v24  ;;  %2692 = vmatprep.subr.bf16.mxu1 %v2934_v37 }
 0x737   : > { %v3675_v31 = vsub.f32 %v1611_v38, %v1653_v7  ;;  %v1682_v42 = vsel %vm483_vm0, %v1668_v12, 0.0  ;;  %v2528_v7 = vld [vmem:[%s3890_s4 + $0x1] ss:$0 sm:$0xff] }
 0x738   : > { %1680 = vadd.xlane.f32.xlu1 %v1679_v18  ;;  %v1645_v29 = vpop.xlane.xlu1 %1644  ;;  %v1642_v40 = vpop.xlane.xlu0 %1641 }
 0x739   : > { %v1655_v22 = vmul.f32 0.03125, %v1645_v29  ;;  %v1654_v34 = vmul.f32 0.03125, %v1642_v40  ;;  %v1669_v43 = vmul.f32 %v3675_v31, %v3675_v31  ;;  %2693 = vmatpush3.bf16.msra.mxu1 %v2934_v37 }
 0x73a   : > { %1683 = vadd.xlane.f32.xlu0 %v1682_v42 }
 0x73b   : > { %v3681_v46 = vsub.f32 %v1619_v59, %v1655_v22  ;;  %v3683_v2 = vsub.f32 %v1614_v32, %v1654_v34  ;;  %v1685_v47 = vsel %vm483_vm0, %v1669_v43, 0.0 }
 0x73c   : > { %1686 = vadd.xlane.f32.xlu1 %v1685_v47  ;;  %v1648_v0 = vpop.xlane.xlu0 %1647 }
 0x73d   : > { %v1656_v25 = vmul.f32 0.03125, %v1648_v0  ;;  %v1671_v30 = vmul.f32 %v3681_v46, %v3681_v46  ;;  %v1670_v52 = vmul.f32 %v3683_v2, %v3683_v2 }
 0x73f   : > { %v3690_v33 = vsub.f32 %v1622_v61, %v1656_v25  ;;  %v1691_v28 = vsel %vm483_vm0, %v1671_v30, 0.0  ;;  %v1688_v39 = vsel %vm483_vm0, %v1670_v52, 0.0 }
 0x740   : > { %1692 = vadd.xlane.f32.xlu1 %v1691_v28  ;;  %1689 = vadd.xlane.f32.xlu0 %v1688_v39 }
 0x741   : > { %v1672_v23 = vmul.f32 %v3690_v33, %v3690_v33 }
 0x743   : > { %v1694_v48 = vsel %vm483_vm0, %v1672_v23, 0.0 }
 0x744   : > { %1695 = vadd.xlane.f32.xlu0 %v1694_v48 }
 0x7bd   : > { %v1675_v54 = vpop.xlane.xlu1 %1674 }
 0x7be   : > { %v1697_v41 = vmul.f32 0.03125, %v1675_v54 }
 0x7bf   : > { %v1678_v55 = vpop.xlane.xlu0 %1677 }
 0x7c0   : > { %v1705_v56 = vadd.f32 1e-08, %v1697_v41  ;;  %v1698_v57 = vmul.f32 0.03125, %v1678_v55  ;;  %v1793_v41 = vld [vmem:[#allocation3 + $0x8] sm:$0xff]  ;;  %v2937_v55 = vld [vmem:[%s3891_s5 + $0x30] sm:$0xff]  }
 0x7c1   : > { %v1681_v38 = vpop.xlane.xlu1 %1680 }
 0x7c2   : > { %2974 = vrsqrt.f32 %v1705_v56  ;;  %v1706_v58 = vadd.f32 1e-08, %v1698_v57  ;;  %v1699_v59 = vmul.f32 0.03125, %v1681_v38 }
 0x7c3   : > { %v1684_v49 = vpop.xlane.xlu0 %1683 }
 0x7c4   : > { %2976 = vrsqrt.f32 %v1706_v58  ;;  %v1707_v60 = vadd.f32 1e-08, %v1699_v59  ;;  %v1700_v32 = vmul.f32 0.03125, %v1684_v49 }
 0x7c5   : > { %v1687_v61 = vpop.xlane.xlu1 %1686 }
 0x7c6   : > { %2978 = vrsqrt.f32 %v1707_v60  ;;  %v1708_v50 = vadd.f32 1e-08, %v1700_v32  ;;  %v1701_v21 = vmul.f32 0.03125, %v1687_v61 }
 0x7c8   : > { %2980 = vrsqrt.f32 %v1708_v50  ;;  %v1709_v1 = vadd.f32 1e-08, %v1701_v21 }
 0x7c9   : > { %v1693_v16 = vpop.xlane.xlu1 %1692  ;;  %v1690_v3 = vpop.xlane.xlu0 %1689 }
 0x7ca   : > { %2982 = vrsqrt.f32 %v1709_v1  ;;  %v1703_v4 = vmul.f32 0.03125, %v1693_v16  ;;  %v1702_v5 = vmul.f32 0.03125, %v1690_v3 }
 0x7cc   : > { %v1711_v6 = vadd.f32 1e-08, %v1703_v4  ;;  %v1710_v10 = vadd.f32 1e-08, %v1702_v5 }
 0x7cd   : > { %v1696_v51 = vpop.xlane.xlu0 %1695 }
 0x7ce   : > { %2984 = vrsqrt.f32 %v1711_v6  ;;  %v1704_v13 = vmul.f32 0.03125, %v1696_v51 }
 0x7cf   : > { %v2975_v63 = vpop.eup %2974  ;;  %2986 = vrsqrt.f32 %v1710_v10 }
 0x7d0   : > { %v1721_v62 = vmul.f32 %v2975_v63, %v3659_v9  ;;  %v1712_v26 = vadd.f32 1e-08, %v1704_v13  ;;  %v2935_v9 = vld [vmem:[%s3891_s5 + $0x40] sm:$0xff]  }
 0x7d1   : > { %v2977_v27 = vpop.eup %2976  ;;  %2694 = vmatprep.subr.bf16.mxu1 %v2935_v9 }
 0x7d2   : > { %v1735_v24 = vmul.f32 %v2527_v20, %v1721_v62  ;;  %v1722_v12 = vmul.f32 %v2977_v27, %v3661_v11  ;;  %2988 = vrsqrt.f32 %v1712_v26  ;;  %2695 = vmatpush3.bf16.msra.mxu1 %v2935_v9 }
 0x7d3   : > { %v2979_v18 = vpop.eup %2978 }
 0x7d4   : > { %v1749_v29 = vadd.f32 %v2528_v7, %v1735_v24  ;;  %v1736_v40 = vmul.f32 %v2527_v20, %v1722_v12  ;;  %v1723_v22 = vmul.f32 %v2979_v18, %v3657_v8  ;;  %v2936_v8 = vld [vmem:[%s3891_s5 + $0x38] sm:$0xff]   ;;  %v1792_v18 = vld [vmem:[#allocation3] sm:$0xff] }
 0x7d5   : > { %v2981_v34 = vpop.eup %2980  ;;  %2696 = vmatprep.subr.bf16.mxu1 %v2936_v8 }
 0x7d6   : > { %v1757_v42 = vmax.f32 %v1749_v29, 0.0  ;;  %v1750_v43 = vadd.f32 %v2528_v7, %v1736_v40  ;;  %v1737_v47 = vmul.f32 %v2527_v20, %v1723_v22  ;;  %v1724_v0 = vmul.f32 %v2981_v34, %v3665_v19  ;;  %2697 = vmatpush3.bf16.msra.mxu1 %v2936_v8 }
 0x7d7   : > { %v2983_v25 = vpop.eup %2982  ;;  %2698 = vmatprep.subr.bf16.mxu1 %v2937_v55 }
 0x7d8   : > { %1765 = vst.msk [vmem:[#allocation3 + $0x10] sm:$0xff] %vm483_vm0, %v1757_v42  ;;  %v1758_v11 = vmax.f32 %v1750_v43, 0.0  ;;  %v1751_v30 = vadd.f32 %v2528_v7, %v1737_v47  ;;  %v1738_v52 = vmul.f32 %v2527_v20, %v1724_v0  ;;  %v1725_v28 = vmul.f32 %v2983_v25, %v3675_v31 }
 0x7da   : > { %1766 = vst.msk [vmem:[#allocation3 + $0x18] sm:$0xff] %vm483_vm0, %v1758_v11  ;;  %v1759_v39 = vmax.f32 %v1751_v30, 0.0  ;;  %v1752_v23 = vadd.f32 %v2528_v7, %v1738_v52  ;;  %v1739_v48 = vmul.f32 %v2527_v20, %v1725_v28  ;;  %2699 = vmatpush3.bf16.msra.mxu1 %v2937_v55 }
 0x7db   : > { %v2985_v19 = vpop.eup %2984 }
 0x7dc   : > { %v2987_v36 = vpop.eup %2986  ;;  %1767 = vst.msk [vmem:[#allocation3 + $0x20] sm:$0xff] %vm483_vm0, %v1759_v39  ;;  %v1760_v53 = vmax.f32 %v1752_v23, 0.0  ;;  %v1753_v37 = vadd.f32 %v2528_v7, %v1739_v48  ;;  %v1727_v54 = vmul.f32 %v2985_v19, %v3681_v46 }
 0x7dd   : > { %v1726_v31 = vmul.f32 %v2987_v36, %v3683_v2 }
 0x7de   : > { %1768 = vst.msk [vmem:[#allocation3 + $0x28] sm:$0xff] %vm483_vm0, %v1760_v53  ;;  %v1761_v56 = vmax.f32 %v1753_v37, 0.0  ;;  %v1741_v57 = vmul.f32 %v2527_v20, %v1727_v54 }
 0x7df   : > { %v2989_v38 = vpop.eup %2988  ;;  %v1740_v58 = vmul.f32 %v2527_v20, %v1726_v31  ;;  %v1794_v59 = vld [vmem:[#allocation3 + $0x10] sm:$0xff] }
 0x7e0   : > { %1769 = vst.msk [vmem:[#allocation3 + $0x30] sm:$0xff] %vm483_vm0, %v1761_v56  ;;  %v1755_v49 = vadd.f32 %v2528_v7, %v1741_v57  ;;  %v1728_v46 = vmul.f32 %v2989_v38, %v3690_v33  ;;  %v2874_v60 = vpack.i.bf16 %v1794_v59, %v1793_v41 }
 0x7e1   : > { %v1754_v2 = vadd.f32 %v2528_v7, %v1740_v58  ;;  %v1795_v32 = vld [vmem:[#allocation3 + $0x18] sm:$0xff] }
 0x7e2   : > { %v1763_v61 = vmax.f32 %v1755_v49, 0.0  ;;  %v1742_v50 = vmul.f32 %v2527_v20, %v1728_v46  ;;  %2875 = vrot.lane.b32.xlu1 %v2874_v60, %s3035_s23  ;;  %v2884_v3 = vpack.i.bf16 %v1795_v32, %v1794_v59 }
 0x7e3   : > { %v1762_v21 = vmax.f32 %v1754_v2, 0.0  ;;  %v1796_v1 = vld [vmem:[#allocation3 + $0x20] sm:$0xff] }
 0x7e4   : > { %1771 = vst.msk [vmem:[#allocation3 + $0x40] sm:$0xff] %vm483_vm0, %v1763_v61  ;;  %v1756_v16 = vadd.f32 %v2528_v7, %v1742_v50  ;;  %v2879_v4 = vpack.i.bf16 %v1796_v1, %v1795_v32 }
 0x7e5   : > { %1770 = vst.msk [vmem:[#allocation3 + $0x38] sm:$0xff] %vm483_vm0, %v1762_v21  ;;  %v1797_v5 = vld [vmem:[#allocation3 + $0x28] sm:$0xff] }
 0x7e6   : > { %v1764_v6 = vmax.f32 %v1756_v16, 0.0  ;;  %2885 = vrot.lane.b32.xlu1 %v2884_v3, %s3036_s24  ;;  %2880 = vrot.lane.b32.xlu0 %v2879_v4, %s3035_s23  ;;  %v2889_v10 = vpack.i.bf16 %v1797_v5, %v1796_v1  ;;  %v2544_v4 = vld [vmem:[%s3892_s6 + $0x1] ss:$0 sm:$0xff] }
 0x7e7   : > { %v1798_v33 = vld [vmem:[#allocation3 + $0x30] sm:$0xff] }
 0x7e8   : > { %1772 = vst.msk [vmem:[#allocation3 + $0x48] sm:$0xff] %vm483_vm0, %v1764_v6  ;;  %v2894_v51 = vpack.i.bf16 %v1798_v33, %v1797_v5 }
 0x7ea   : > { %2890 = vrot.lane.b32.xlu1 %v2889_v10, %s3036_s24  ;;  %2895 = vrot.lane.b32.xlu0 %v2894_v51, %s3035_s23 }
 0x7eb   : > { %v1800_v13 = vld [vmem:[#allocation3 + $0x40] sm:$0xff] }
 0x7ec   : > { %v1799_v63 = vld [vmem:[#allocation3 + $0x38] sm:$0xff] }
 0x7ed   : > { %v2904_v20 = vpack.i.bf16 %v1799_v63, %v1798_v33  ;;  %v2899_v62 = vpack.i.bf16 %v1800_v13, %v1799_v63 }
 0x7ef   : > { %2905 = vrot.lane.b32.xlu0 %v2904_v20, %s3036_s24  ;;  %2900 = vrot.lane.b32.xlu1 %v2899_v62, %s3035_s23  ;;  %v1801_v26 = vld [vmem:[#allocation3 + $0x48] sm:$0xff] }
 0x7f0   : > { %v2909_v27 = vpack.i.bf16 %v1801_v26, %v1800_v13 }
 0x7f3   : > { %2910 = vrot.lane.b32.xlu1 %v2909_v27, %s3036_s24 }
 0x854   : > { %v2876_v7 = vpop.permute.xlu1 %2875 }
 0x855   : > { %v2878_v24 = vunpack.i.h.bf16 %v2876_v7  ;;  %v2877_v12 = vunpack.i.l.bf16 %v2876_v7 }
 0x857   : > { %v1860_v9 = vsel %vm483_vm0, %v1793_v41, %v2878_v24  ;;  %v1859_v42 = vsel %vm483_vm0, %v1792_v18, %v2877_v12 }
 0x858   : > { %v2886_v29 = vpop.permute.xlu1 %2885  ;;  %v2881_v40 = vpop.permute.xlu0 %2880 }
 0x859   : > { %v2888_v22 = vunpack.i.h.bf16 %v2886_v29  ;;  %v2887_v34 = vunpack.i.l.bf16 %v2886_v29  ;;  %v2883_v43 = vunpack.i.h.bf16 %v2881_v40  ;;  %v2882_v47 = vunpack.i.l.bf16 %v2881_v40 }
 0x85b   : > { %v1868_v0 = vsel %vm634_vm3, %v1860_v9, %v2888_v22  ;;  %v1867_v25 = vsel %vm634_vm3, %v1859_v42, %v2887_v34  ;;  %v1862_v39 = vsel %vm483_vm0, %v1795_v32, %v2883_v43  ;;  %v1861_v23 = vsel %vm483_vm0, %v1794_v59, %v2882_v47 }
 0x85c   : > { %v1875_v11 = vpack.c.bf16 %v1868_v0, %v1867_v25  ;;  %v2891_v30 = vpop.permute.xlu1 %2890  ;;  %v2896_v52 = vpop.permute.xlu0 %2895 }
 0x85d   : > { %v2893_v28 = vunpack.i.h.bf16 %v2891_v30  ;;  %v2892_v8 = vunpack.i.l.bf16 %v2891_v30  ;;  %v2898_v36 = vunpack.i.h.bf16 %v2896_v52  ;;  %v2897_v53 = vunpack.i.l.bf16 %v2896_v52 }
 0x85e   : > { %2700 = vmatprep.mubr.msk.bf16.mxu1 %vm706_vm5, %v1875_v11 }
 0x85f   : > { %v1869_v48 = vsel %vm634_vm3, %v1861_v23, %v2892_v8  ;;  %v1870_v19 = vsel %vm634_vm3, %v1862_v39, %v2893_v28  ;;  %v1864_v56 = vsel %vm483_vm0, %v1797_v5, %v2898_v36  ;;  %v1863_v57 = vsel %vm483_vm0, %v1796_v1, %v2897_v53 }
 0x860   : > { %v1876_v37 = vpack.c.bf16 %v1870_v19, %v1869_v48 }
 0x861   : > { %v2901_v54 = vpop.permute.xlu1 %2900  ;;  %v2906_v31 = vpop.permute.xlu0 %2905 }
 0x862   : > { %v2908_v41 = vunpack.i.h.bf16 %v2906_v31  ;;  %v2907_v55 = vunpack.i.l.bf16 %v2906_v31  ;;  %2701 = vmatmul.mubr.msk.bf16.vlgmr.msra.gmra.mxu1 %vm706_vm5, %v1876_v37  ;;  %v2903_v38 = vunpack.i.h.bf16 %v2901_v54  ;;  %v2902_v58 = vunpack.i.l.bf16 %v2901_v54 }
 0x864   : > { %v1871_v59 = vsel %vm634_vm3, %v1863_v57, %v2907_v55  ;;  %v1872_v49 = vsel %vm634_vm3, %v1864_v56, %v2908_v41  ;;  %v1866_v61 = vsel %vm483_vm0, %v1799_v63, %v2903_v38  ;;  %v1865_v50 = vsel %vm483_vm0, %v1798_v33, %v2902_v58 }
 0x865   : > { %v1877_v46 = vpack.c.bf16 %v1872_v49, %v1871_v59  ;;  %v2911_v60 = vpop.permute.xlu1 %2910 }
 0x866   : > { %v2913_v2 = vunpack.i.h.bf16 %v2911_v60  ;;  %v2912_v32 = vunpack.i.l.bf16 %v2911_v60 }
 0x867   : > { %2704 = vmatprep.mubr.msk.bf16.mxu1 %vm706_vm5, %v1877_v46 }
 0x868   : > { %v1874_v21 = vsel %vm634_vm3, %v1866_v61, %v2913_v2  ;;  %v1873_v1 = vsel %vm634_vm3, %v1865_v50, %v2912_v32 }
 0x869   : > { %v1878_v16 = vpack.c.bf16 %v1874_v21, %v1873_v1 }
 0x86b   : > { %2705 = vmatmul.mubr.msk.bf16.gmra.mxu1 %vm706_vm5, %v1878_v16 }
 0x922   : > { %v2702_v3 = vpop.f32.mrf.mxu1 }
 0x923   : > { %v1976_v51 = vadd.f32 %v2702_v3, %v2544_v4 }
 0x924   : > { %v1967_v5 = vpop.f32.mrf.mxu1 }
 0x925   : > { %v1968_v6 = vadd.f32 %v2544_v4, %v1967_v5  ;;  %v2004_v27 = vsel %vm483_vm0, %v1976_v51, 0.0 }
 0x926   : > { %v2703_v10 = vpop.f32.mrf.mxu1 }
 0x927   : > { %v1998_v33 = vsel %vm483_vm0, %v1968_v6, 0.0  ;;  %v1979_v20 = vadd.f32 %v2703_v10, %v2544_v4 }
 0x928   : > { %v1970_v13 = vpop.f32.mrf.mxu1  ;;  %1999 = vadd.xlane.f32.xlu0 %v1998_v33 }
 0x929   : > { %v1971_v63 = vadd.f32 %v2544_v4, %v1970_v13  ;;  %v2007_v18 = vsel %vm483_vm0, %v1979_v20, 0.0  ;;  %v2938_v13 = vld [vmem:[%s3896_s10 + $0x8] sm:$0xff]  }
 0x92a   : > { %2708 = vmatprep.subr.bf16.mxu0 %v2938_v13 }
 0x92b   : > { %v2706_v62 = vpop.f32.mrf.mxu1  ;;  %v2001_v26 = vsel %vm483_vm0, %v1971_v63, 0.0  ;;  %2709 = vmatpush3.bf16.msra.mxu0 %v2938_v13 }
 0x92c   : > { %2002 = vadd.xlane.f32.xlu1 %v2001_v26  ;;  %2005 = vadd.xlane.f32.xlu0 %v2004_v27  ;;  %v1992_v29 = vadd.f32 %v2706_v62, %v2544_v4 }
 0x92d   : > { %v1983_v7 = vpop.f32.mrf.mxu1 }
 0x92e   : > { %v1984_v24 = vadd.f32 %v2544_v4, %v1983_v7  ;;  %v2016_v42 = vsel %vm483_vm0, %v1992_v29, 0.0 }
 0x92f   : > { %v2707_v12 = vpop.f32.mrf.mxu1 }
 0x930   : > { %2008 = vadd.xlane.f32.xlu0 %v2007_v18  ;;  %v2010_v40 = vsel %vm483_vm0, %v1984_v24, 0.0  ;;  %v1995_v9 = vadd.f32 %v2707_v12, %v2544_v4 }
 0x931   : > { %v1986_v22 = vpop.f32.mrf.mxu1  ;;  %2011 = vadd.xlane.f32.xlu1 %v2010_v40 }
 0x932   : > { %v1987_v34 = vadd.f32 %v2544_v4, %v1986_v22  ;;  %v2019_v47 = vsel %vm483_vm0, %v1995_v9, 0.0 }
 0x934   : > { %v2013_v43 = vsel %vm483_vm0, %v1987_v34, 0.0 }
 0x935   : > { %2017 = vadd.xlane.f32.xlu1 %v2016_v42  ;;  %2014 = vadd.xlane.f32.xlu0 %v2013_v43 }
 0x939   : > { %2020 = vadd.xlane.f32.xlu0 %v2019_v47 }
 0x9b1   : > { %v2000_v0 = vpop.xlane.xlu0 %1999 }
 0x9b2   : > { %v2022_v25 = vmul.f32 0.03125, %v2000_v0 }
 0x9b4   : > { %v3776_v11 = vsub.f32 %v1968_v6, %v2022_v25 }
 0x9b5   : > { %v2003_v30 = vpop.xlane.xlu1 %2002  ;;  %v2006_v52 = vpop.xlane.xlu0 %2005 }
 0x9b6   : > { %v2023_v28 = vmul.f32 0.03125, %v2003_v30  ;;  %v2024_v8 = vmul.f32 0.03125, %v2006_v52  ;;  %v2038_v39 = vmul.f32 %v3776_v11, %v3776_v11 }
 0x9b8   : > { %v3780_v23 = vsub.f32 %v1971_v63, %v2023_v28  ;;  %v3782_v48 = vsub.f32 %v1976_v51, %v2024_v8  ;;  %v2046_v19 = vsel %vm483_vm0, %v2038_v39, 0.0  ;;  %v2939_v63 = vld [vmem:[%s3896_s10] sm:$0xff]  }
 0x9b9   : > { %2047 = vadd.xlane.f32.xlu1 %v2046_v19  ;;  %v2009_v36 = vpop.xlane.xlu0 %2008  ;;  %2710 = vmatprep.subr.bf16.mxu0 %v2939_v63 }
 0x9ba   : > { %v2025_v53 = vmul.f32 0.03125, %v2009_v36  ;;  %v2012_v37 = vpop.xlane.xlu1 %2011  ;;  %v2039_v54 = vmul.f32 %v3780_v23, %v3780_v23  ;;  %v2040_v31 = vmul.f32 %v3782_v48, %v3782_v48  ;;  %2711 = vmatpush3.bf16.msra.mxu0 %v2939_v63  ;;  %v2555_v36 = vld [vmem:[%s3893_s7 + $0x1] ss:$0 sm:$0xff] }
 0x9bb   : > { %v2026_v41 = vmul.f32 0.03125, %v2012_v37 }
 0x9bc   : > { %v3789_v55 = vsub.f32 %v1979_v20, %v2025_v53  ;;  %v2049_v56 = vsel %vm483_vm0, %v2039_v54, 0.0  ;;  %v2052_v57 = vsel %vm483_vm0, %v2040_v31, 0.0  ;;  %v2940_v20 = vld [vmem:[%s3898_s12 + $0x8] sm:$0xff]   ;;  %v2556_v54 = vld [vmem:[%s3894_s8 + $0x1] ss:$0 sm:$0xff] }
 0x9bd   : > { %v3793_v38 = vsub.f32 %v1984_v24, %v2026_v41  ;;  %2050 = vadd.xlane.f32.xlu0 %v2049_v56  ;;  %2053 = vadd.xlane.f32.xlu1 %v2052_v57 }
 0x9be   : > { %v2018_v58 = vpop.xlane.xlu1 %2017  ;;  %v2015_v59 = vpop.xlane.xlu0 %2014  ;;  %v2041_v49 = vmul.f32 %v3789_v55, %v3789_v55  ;;  %2720 = vmatprep.subr.bf16.mxu1 %v2940_v20 }
 0x9bf   : > { %v2028_v46 = vmul.f32 0.03125, %v2018_v58  ;;  %v2027_v60 = vmul.f32 0.03125, %v2015_v59  ;;  %v2042_v2 = vmul.f32 %v3793_v38, %v3793_v38  ;;  %2721 = vmatpush3.bf16.msra.mxu1 %v2940_v20 }
 0x9c0   : > { %v2055_v32 = vsel %vm483_vm0, %v2041_v49, 0.0  ;;  %v2139_v49 = vstv %s2557_s18  ;;  %s481_s18 = scalar_lea.vmem %s3900_s14, %s2574_s25 }
 0x9c1   : > { %v3800_v61 = vsub.f32 %v1992_v29, %v2028_v46  ;;  %v3802_v50 = vsub.f32 %v1987_v34, %v2027_v60  ;;  %2056 = vadd.xlane.f32.xlu0 %v2055_v32  ;;  %v2058_v21 = vsel %vm483_vm0, %v2042_v2, 0.0 }
 0x9c2   : > { %2059 = vadd.xlane.f32.xlu1 %v2058_v21  ;;  %v2021_v1 = vpop.xlane.xlu0 %2020 }
 0x9c3   : > { %v2029_v16 = vmul.f32 0.03125, %v2021_v1  ;;  %v2044_v3 = vmul.f32 %v3800_v61, %v3800_v61  ;;  %v2043_v4 = vmul.f32 %v3802_v50, %v3802_v50 }
 0x9c5   : > { %v3809_v5 = vsub.f32 %v1995_v9, %v2029_v16  ;;  %v2064_v6 = vsel %vm483_vm0, %v2044_v3, 0.0  ;;  %v2061_v10 = vsel %vm483_vm0, %v2043_v4, 0.0 }
 0x9c6   : > { %2065 = vadd.xlane.f32.xlu1 %v2064_v6  ;;  %2062 = vadd.xlane.f32.xlu0 %v2061_v10 }
 0x9c7   : > { %v2045_v51 = vmul.f32 %v3809_v5, %v3809_v5 }
 0x9c9   : > { %v2067_v33 = vsel %vm483_vm0, %v2045_v51, 0.0 }
 0x9ca   : > { %2068 = vadd.xlane.f32.xlu0 %v2067_v33 }
 0xa42   : > { %v2048_v62 = vpop.xlane.xlu1 %2047 }
 0xa43   : > { %v2070_v26 = vmul.f32 0.03125, %v2048_v62 }
 0xa45   : > { %v2078_v27 = vadd.f32 1e-08, %v2070_v26 }
 0xa46   : > { %v2054_v7 = vpop.xlane.xlu1 %2053  ;;  %v2051_v24 = vpop.xlane.xlu0 %2050 }
 0xa47   : > { %2990 = vrsqrt.f32 %v2078_v27  ;;  %v2072_v12 = vmul.f32 0.03125, %v2054_v7  ;;  %v2071_v18 = vmul.f32 0.03125, %v2051_v24 }
 0xa49   : > { %v2080_v29 = vadd.f32 1e-08, %v2072_v12  ;;  %v2079_v40 = vadd.f32 1e-08, %v2071_v18 }
 0xa4a   : > { %v2057_v22 = vpop.xlane.xlu0 %2056 }
 0xa4b   : > { %2992 = vrsqrt.f32 %v2080_v29  ;;  %v2073_v34 = vmul.f32 0.03125, %v2057_v22  ;;  %v2060_v9 = vpop.xlane.xlu1 %2059 }
 0xa4c   : > { %2994 = vrsqrt.f32 %v2079_v40  ;;  %v2074_v42 = vmul.f32 0.03125, %v2060_v9 }
 0xa4d   : > { %v2081_v43 = vadd.f32 1e-08, %v2073_v34 }
 0xa4e   : > { %v2082_v47 = vadd.f32 1e-08, %v2074_v42 }
 0xa4f   : > { %2996 = vrsqrt.f32 %v2081_v43  ;;  %v2066_v0 = vpop.xlane.xlu1 %2065  ;;  %v2063_v25 = vpop.xlane.xlu0 %2062 }
 0xa50   : > { %2998 = vrsqrt.f32 %v2082_v47  ;;  %v2076_v30 = vmul.f32 0.03125, %v2066_v0  ;;  %v2075_v52 = vmul.f32 0.03125, %v2063_v25 }
 0xa52   : > { %v2084_v28 = vadd.f32 1e-08, %v2076_v30  ;;  %v2083_v8 = vadd.f32 1e-08, %v2075_v52 }
 0xa53   : > { %v2069_v39 = vpop.xlane.xlu0 %2068 }
 0xa54   : > { %v2991_v19 = vpop.eup %2990  ;;  %3000 = vrsqrt.f32 %v2084_v28  ;;  %v2077_v53 = vmul.f32 0.03125, %v2069_v39  ;;  %v2153_v28 = vld [vmem:[#allocation2 + $0x38] sm:$0xff] }
 0xa55   : > { %v2094_v37 = vmul.f32 %v2991_v19, %v3776_v11  ;;  %3002 = vrsqrt.f32 %v2083_v8 }
 0xa56   : > { %v2085_v31 = vadd.f32 1e-08, %v2077_v53 }
 0xa57   : > { %v2108_v41 = vmul.f32 %v2555_v36, %v2094_v37 }
 0xa58   : > { %v2993_v56 = vpop.eup %2992  ;;  %3004 = vrsqrt.f32 %v2085_v31 }
 0xa59   : > { %v2995_v57 = vpop.eup %2994  ;;  %v2122_v58 = vadd.f32 %v2556_v54, %v2108_v41  ;;  %v2096_v59 = vmul.f32 %v2993_v56, %v3782_v48 }
 0xa5a   : > { %v2095_v46 = vmul.f32 %v2995_v57, %v3780_v23 }
 0xa5b   : > { %v2130_v60 = vmax.f32 %v2122_v58, 0.0  ;;  %v2110_v2 = vmul.f32 %v2555_v36, %v2096_v59 }
 0xa5c   : > { %v2997_v32 = vpop.eup %2996  ;;  %v2109_v11 = vmul.f32 %v2555_v36, %v2095_v46 }
 0xa5d   : > { %v2999_v21 = vpop.eup %2998  ;;  %v2140_v1 = vmul.f32 %v2139_v49, %v2130_v60  ;;  %v2124_v16 = vadd.f32 %v2556_v54, %v2110_v2  ;;  %v2097_v3 = vmul.f32 %v2997_v32, %v3789_v55  ;;  %v2558_v32 = vld [vmem:[%s3897_s11] ss:$0 sm:$0xff] }
 0xa5e   : > { %v2123_v4 = vadd.f32 %v2556_v54, %v2109_v11  ;;  %v2098_v6 = vmul.f32 %v2999_v21, %v3793_v38 }
 0xa5f   : > { %v2156_v10 = vadd.f32 %v2140_v1, %v3562_v17  ;;  %v2132_v51 = vmax.f32 %v2124_v16, 0.0  ;;  %v2111_v33 = vmul.f32 %v2555_v36, %v2097_v3 }
 0xa60   : > { %v2131_v48 = vmax.f32 %v2123_v4, 0.0  ;;  %v2112_v13 = vmul.f32 %v2555_v36, %v2098_v6 }
 0xa61   : > { %v3001_v63 = vpop.eup %3000  ;;  %2164 = vst.msk [vmem:[#allocation2 + $0x10] sm:$0xff] %vm483_vm0, %v2156_v10  ;;  %v2142_v23 = vmul.f32 %v2139_v49, %v2132_v51  ;;  %v2125_v20 = vadd.f32 %v2556_v54, %v2111_v33 }
 0xa62   : > { %v3003_v62 = vpop.eup %3002  ;;  %v2141_v26 = vmul.f32 %v2139_v49, %v2131_v48  ;;  %v2126_v27 = vadd.f32 %v2556_v54, %v2112_v13  ;;  %v2100_v7 = vmul.f32 %v3001_v63, %v3800_v61 }
 0xa63   : > { %v2158_v55 = vadd.f32 %v2142_v23, %v3577_v14  ;;  %v2133_v24 = vmax.f32 %v2125_v20, 0.0  ;;  %v2099_v38 = vmul.f32 %v3003_v62, %v3802_v50 }
 0xa64   : > { %v2157_v17 = vadd.f32 %v2141_v26, %v3575_v15  ;;  %v2134_v12 = vmax.f32 %v2126_v27, 0.0  ;;  %v2114_v18 = vmul.f32 %v2555_v36, %v2100_v7  ;;  %v2565_v27 = vld [vmem:[%s3899_s13] ss:$0 sm:$0xff] }
 0xa65   : > { %v3005_v29 = vpop.eup %3004  ;;  %2166 = vst.msk [vmem:[#allocation2 + $0x20] sm:$0xff] %vm483_vm0, %v2158_v55  ;;  %v2143_v40 = vmul.f32 %v2139_v49, %v2133_v24  ;;  %v2113_v22 = vmul.f32 %v2555_v36, %v2099_v38 }
 0xa66   : > { %2165 = vst.msk [vmem:[#allocation2 + $0x18] sm:$0xff] %vm483_vm0, %v2157_v17  ;;  %v2144_v34 = vmul.f32 %v2139_v49, %v2134_v12  ;;  %v2128_v9 = vadd.f32 %v2556_v54, %v2114_v18  ;;  %v2101_v61 = vmul.f32 %v3005_v29, %v3809_v5 }
 0xa67   : > { %v2159_v14 = vadd.f32 %v2143_v40, %v3588_v44  ;;  %v2127_v42 = vadd.f32 %v2556_v54, %v2113_v22 }
 0xa68   : > { %v2160_v50 = vadd.f32 %v2144_v34, %v3590_v45  ;;  %v2136_v43 = vmax.f32 %v2128_v9, 0.0  ;;  %v2115_v15 = vmul.f32 %v2555_v36, %v2101_v61  ;;  %v2172_v39 = vld [vmem:[#allocation2 + $0x10] sm:$0xff]  ;;  %v2155_v36 = vld [vmem:[#allocation2 + $0x48] sm:$0xff] }
 0xa69   : > { %2167 = vst.msk [vmem:[#allocation2 + $0x28] sm:$0xff] %vm483_vm0, %v2159_v14  ;;  %v2135_v47 = vmax.f32 %v2127_v42, 0.0 }
 0xa6a   : > { %2168 = vst.msk [vmem:[#allocation2 + $0x30] sm:$0xff] %vm483_vm0, %v2160_v50  ;;  %v2146_v0 = vmul.f32 %v2139_v49, %v2136_v43  ;;  %v2129_v25 = vadd.f32 %v2556_v54, %v2115_v15 }
 0xa6b   : > { %v2145_v30 = vmul.f32 %v2139_v49, %v2135_v47 }
 0xa6c   : > { %v2162_v52 = vadd.f32 %v2146_v0, %v3597_v35  ;;  %v2137_v8 = vmax.f32 %v2129_v25, 0.0  ;;  %v2174_v37 = vld [vmem:[#allocation2 + $0x20] sm:$0xff] }
 0xa6d   : > { %v2161_v5 = vadd.f32 %v2153_v28, %v2145_v30  ;;  %v2173_v44 = vld [vmem:[#allocation2 + $0x18] sm:$0xff] }
 0xa6e   : > { %2170 = vst.msk [vmem:[#allocation2 + $0x40] sm:$0xff] %vm483_vm0, %v2162_v52  ;;  %v2147_v45 = vmul.f32 %v2139_v49, %v2137_v8  ;;  %v2180_v19 = vpack.c.bf16 %v2173_v44, %v2172_v39  ;;  %v2941_v49 = vld [vmem:[%s3898_s12] sm:$0xff]  }
 0xa6f   : > { %2169 = vst.msk [vmem:[#allocation2 + $0x38] sm:$0xff] %vm483_vm0, %v2161_v5  ;;  %2722 = vmatprep.subr.bf16.mxu1 %v2941_v49 }
 0xa70   : > { %v2163_v53 = vadd.f32 %v2155_v36, %v2147_v45  ;;  %2712 = vmatprep.mubr.msk.bf16.mxu0 %vm483_vm0, %v2180_v19  ;;  %v2175_v54 = vld [vmem:[#allocation2 + $0x28] sm:$0xff]  ;;  %2723 = vmatpush3.bf16.msra.mxu1 %v2941_v49 }
 0xa71   : > { %v2181_v31 = vpack.c.bf16 %v2175_v54, %v2174_v37  ;;  %v2176_v35 = vld [vmem:[#allocation2 + $0x30] sm:$0xff] }
 0xa72   : > { %2171 = vst.msk [vmem:[#allocation2 + $0x48] sm:$0xff] %vm483_vm0, %v2163_v53 }
 0xa73   : > { %2713 = vmatmul.mubr.msk.bf16.vlgmr.msra.gmra.mxu0 %vm483_vm0, %v2181_v31 }
 0xa75   : > { %v2178_v57 = vld [vmem:[#allocation2 + $0x40] sm:$0xff] }
 0xa76   : > { %v2177_v41 = vld [vmem:[#allocation2 + $0x38] sm:$0xff] }
 0xa77   : > { %v2182_v56 = vpack.c.bf16 %v2177_v41, %v2176_v35 }
 0xa79   : > { %2716 = vmatprep.mubr.msk.bf16.mxu0 %vm483_vm0, %v2182_v56  ;;  %v2179_v58 = vld [vmem:[#allocation2 + $0x48] sm:$0xff] }
 0xa7a   : > { %v2183_v59 = vpack.c.bf16 %v2179_v58, %v2178_v57 }
 0xa7c   : > { %2717 = vmatmul.mubr.msk.bf16.gmra.mxu0 %vm483_vm0, %v2183_v59 }
 0xb33   : > { %v2714_v46 = vpop.f32.mrf.mxu0 }
 0xb34   : > { %v2262_v3 = vadd.f32 %v2714_v46, %v2558_v32 }
 0xb35   : > { %v2253_v60 = vpop.f32.mrf.mxu0 }
 0xb36   : > { %v2254_v1 = vadd.f32 %v2558_v32, %v2253_v60 }
 0xb37   : > { %v2715_v2 = vpop.f32.mrf.mxu0 }
 0xb38   : > { %v2265_v11 = vadd.f32 %v2715_v2, %v2558_v32 }
 0xb39   : > { %v2256_v21 = vpop.f32.mrf.mxu0 }
 0xb3a   : > { %v2257_v16 = vadd.f32 %v2558_v32, %v2256_v21  ;;  %v2285_v10 = vpack.c.bf16 %v2265_v11, %v2262_v3 }
 0xb3c   : > { %v2284_v4 = vpack.c.bf16 %v2257_v16, %v2254_v1  ;;  %v2718_v6 = vpop.f32.mrf.mxu0 }
 0xb3d   : > { %v2278_v20 = vadd.f32 %v2718_v6, %v2558_v32 }
 0xb3e   : > { %v2269_v51 = vpop.f32.mrf.mxu0  ;;  %2724 = vmatprep.mubr.msk.bf16.mxu1 %vm483_vm0, %v2284_v4 }
 0xb3f   : > { %2725 = vmatmul.mubr.msk.bf16.vlgmr.msra.gmra.mxu1 %vm483_vm0, %v2285_v10  ;;  %v2270_v63 = vadd.f32 %v2558_v32, %v2269_v51 }
 0xb40   : > { %v2719_v33 = vpop.f32.mrf.mxu0 }
 0xb41   : > { %v2281_v48 = vadd.f32 %v2719_v33, %v2558_v32 }
 0xb42   : > { %v2272_v13 = vpop.f32.mrf.mxu0 }
 0xb43   : > { %v2273_v23 = vadd.f32 %v2558_v32, %v2272_v13  ;;  %v2287_v26 = vpack.c.bf16 %v2281_v48, %v2278_v20 }
 0xb45   : > { %v2286_v62 = vpack.c.bf16 %v2273_v23, %v2270_v63 }
 0xb47   : > { %2728 = vmatprep.mubr.msk.bf16.mxu1 %vm483_vm0, %v2286_v62 }
 0xb48   : > { %2729 = vmatmul.mubr.msk.bf16.gmra.mxu1 %vm483_vm0, %v2287_v26 }
 0xbff   : > { %v2726_v7 = vpop.f32.mrf.mxu1 }
 0xc00   : > { %v2366_v55 = vadd.f32 %v2726_v7, %v2565_v27 }
 0xc01   : > { %v2357_v24 = vpop.f32.mrf.mxu1 }
 0xc02   : > { %2391 = vst.msk [vmem:[%s481_s18 + $0x10] sm:$0xff] %vm2388_vm7, %v2366_v55  ;;  %v2358_v38 = vadd.f32 %v2565_v27, %v2357_v24 }
 0xc03   : > { %v2727_v17 = vpop.f32.mrf.mxu1 }
 0xc04   : > { %2389 = vst.msk [vmem:[%s481_s18] sm:$0xff] %vm2388_vm7, %v2358_v38  ;;  %v2369_v12 = vadd.f32 %v2727_v17, %v2565_v27 }
 0xc05   : > { %v2360_v18 = vpop.f32.mrf.mxu1 }
 0xc06   : > { %2392 = vst.msk [vmem:[%s481_s18 + $0x18] sm:$0xff] %vm2388_vm7, %v2369_v12  ;;  %v2361_v29 = vadd.f32 %v2565_v27, %v2360_v18 }
 0xc08   : > { %2390 = vst.msk [vmem:[%s481_s18 + $0x8] sm:$0xff] %vm2388_vm7, %v2361_v29  ;;  %v2730_v40 = vpop.f32.mrf.mxu1 }
 0xc09   : > { %v2382_v22 = vadd.f32 %v2730_v40, %v2565_v27 }
 0xc0a   : > { %v2373_v34 = vpop.f32.mrf.mxu1 }
 0xc0b   : > { %2395 = vst.msk [vmem:[%s481_s18 + $0x30] sm:$0xff] %vm2388_vm7, %v2382_v22  ;;  %v2374_v9 = vadd.f32 %v2565_v27, %v2373_v34 }
 0xc0c   : > { %v2731_v61 = vpop.f32.mrf.mxu1 }
 0xc0d   : > { %2393 = vst.msk [vmem:[%s481_s18 + $0x20] sm:$0xff] %vm2388_vm7, %v2374_v9  ;;  %v2385_v14 = vadd.f32 %v2731_v61, %v2565_v27 }
 0xc0e   : > { %v2376_v42 = vpop.f32.mrf.mxu1 }
 0xc0f   : > { %2396 = vst.msk [vmem:[%s481_s18 + $0x38] sm:$0xff] %vm2388_vm7, %v2385_v14  ;;  %v2377_v50 = vadd.f32 %v2565_v27, %v2376_v42 }
 0xc11   : > { %2394 = vst.msk [vmem:[%s481_s18 + $0x28] sm:$0xff] %vm2388_vm7, %v2377_v50 }
 0xc12 PF: > { %s25_s29 = sadd.s32 1, %s3031_s29  }
 0xc13   : > { %p22_p1 = scmp.ge.s32.totalorder %s25_s29, 4  }
 0xc15   :  { %24 = sbr.rel (!%p22_p1) target bundleno = 1 (0x1), region = 119 }
 0xc1a   :  { %2418 = vsyncpa [#allocation5], 1 }
 0xc1b   :  { %2420 = vsyncpa [#allocation5 + $0x1], 1 }

</bundles_post_ra>
